<compile_context>
chip_gen: v7x
topology: tpu7x:2x2x1
jax: 0.10.0
libtpu: 0.0.40
codegen_flags: <defaults>
</compile_context>

<pallas_src>
import functools

import jax
import jax.numpy as jnp
from jax.experimental import pallas as pl
from jax.experimental.pallas import tpu as pltpu

LEAKY_SLOPE = 0.2
GCHUNK = 256          # output-channel chunk size for the 128 -> 1024 layer


def _pointnet_kernel(x_ref,
                     w1, b1, w2, b2, w3, b3, w4, b4, w5, b5,
                     gfeat_ref, pfeat_ref,
                     acc_ref, *, n_valid, tile_n):
    """One (batch, point-tile) grid step, channel-major layout.

    x_ref:     (1, 3, TN)    input points (f32)
    w_k:       (Cout, Cin)   bf16 conv weight with BN scale folded in
    b_k:       (Cout, 1)     f32  conv bias + BN shift folded in
    gfeat_ref: (1, 1024, 1)  global feature (max over all points)
    pfeat_ref: (1, 64, TN)   per-point feature after conv1 (lane-dense)
    acc_ref:   (1024, 1)     f32 running-max scratch, persists over the N axis
    """
    n_i = pl.program_id(1)

    @pl.when(n_i == 0)
    def _init():
        acc_ref[...] = jnp.full(acc_ref.shape, -jnp.inf, dtype=acc_ref.dtype)

    def layer(h_bf16, w_ref, b_ref):
        y = jnp.dot(w_ref[...], h_bf16, preferred_element_type=jnp.float32)
        y = y + b_ref[...]
        return jnp.maximum(y, LEAKY_SLOPE * y)          # LeakyReLU(0.2)

    x = x_ref[0].astype(jnp.bfloat16)                   # (3, TN)
    h = layer(x, w1, b1)                                # (64, TN)   conv1[0]
    h = layer(h.astype(jnp.bfloat16), w2, b2)           # (64, TN)   conv1[1] -> point_feat
    pfeat_ref[0] = h.astype(pfeat_ref.dtype)
    g = layer(h.astype(jnp.bfloat16), w3, b3)           # (64, TN)   conv2[0]
    g = layer(g.astype(jnp.bfloat16), w4, b4)           # (128, TN)  conv2[1]
    g = g.astype(jnp.bfloat16)

    # Lane mask for padded point columns (only needed when N was padded).
    if n_valid % tile_n != 0:
        col = jax.lax.broadcasted_iota(jnp.int32, (1, tile_n), 1) + n_i * tile_n
        valid = col < n_valid                            # (1, TN) bool
    else:
        valid = None

    # conv2[2]: 128 -> 1024, chunked over output channels; fold running max.
    n_out = w5.shape[0]
    for c in range(0, n_out, GCHUNK):
        ch = min(GCHUNK, n_out - c)
        yc = jnp.dot(w5[pl.ds(c, ch), :], g, preferred_element_type=jnp.float32)
        yc = yc + b5[pl.ds(c, ch), :]
        yc = jnp.maximum(yc, LEAKY_SLOPE * yc)
        if valid is not None:
            yc = jnp.where(valid, yc, -jnp.inf)
        tile_max = jnp.max(yc, axis=1, keepdims=True)    # (ch, 1)
        acc_ref[pl.ds(c, ch), :] = jnp.maximum(acc_ref[pl.ds(c, ch), :], tile_max)

    @pl.when(n_i == pl.num_programs(1) - 1)
    def _finalize():
        gfeat_ref[0] = acc_ref[...]


def pointnet_feat(x_ncl, params, *, tile_n=256):
    """x_ncl: (B, 3, N) float32.

    params: list of (w_bf16 (Cout, Cin), b_f32 (Cout, 1)) with BN folded in.
    Returns (global_feat (B, 1024) f32, point_feat (B, 64, N) f32).
    """
    B, C, N = x_ncl.shape

    if N <= tile_n:
        tn = N
        n_pad = N
    else:
        assert tile_n % 128 == 0, "tile_n must be a multiple of 128"
        tn = tile_n
        n_pad = pl.cdiv(N, tn) * tn
    num_tiles = n_pad // tn

    x = x_ncl
    if n_pad != N:
        x = jnp.pad(x, ((0, 0), (0, 0), (0, n_pad - N)))

    in_specs = [pl.BlockSpec((1, C, tn), lambda b, n: (b, 0, n))]
    args = [x]
    for (w, bvec) in params:
        in_specs.append(pl.BlockSpec(w.shape, lambda b, n: (0, 0)))
        in_specs.append(pl.BlockSpec(bvec.shape, lambda b, n: (0, 0)))
        args += [w, bvec]

    c_last = params[-1][0].shape[0]            # 1024
    c_pfeat = params[1][0].shape[0]            # 64

    out_shape = (jax.ShapeDtypeStruct((B, c_last, 1), jnp.float32),
                 jax.ShapeDtypeStruct((B, c_pfeat, n_pad), jnp.float32))
    out_specs = (pl.BlockSpec((1, c_last, 1), lambda b, n: (b, 0, 0)),
                 pl.BlockSpec((1, c_pfeat, tn), lambda b, n: (b, 0, n)))

    flops = 2 * B * n_pad * sum(int(w.shape[0]) * int(w.shape[1]) for w, _ in params)
    bytes_accessed = (x.size * 4
                      + sum(w.size * 2 + bvec.size * 4 for w, bvec in params)
                      + B * c_last * 4 + B * c_pfeat * n_pad * 4)

    gfeat, pfeat = pl.pallas_call(
        functools.partial(_pointnet_kernel, n_valid=N, tile_n=tn),
        out_shape=out_shape,
        grid=(B, num_tiles),
        in_specs=in_specs,
        out_specs=out_specs,
        scratch_shapes=[pltpu.VMEM((c_last, 1), jnp.float32)],
        compiler_params=pltpu.CompilerParams(
            dimension_semantics=("parallel", "arbitrary"),
            vmem_limit_bytes=32 * 1024 * 1024),
        cost_estimate=pl.CostEstimate(flops=int(flops), transcendentals=0,
                                      bytes_accessed=int(bytes_accessed)),
    )(*args)

    global_feat = gfeat[:, :, 0]                 # (B, 1024)
    point_feat = pfeat[:, :, :N]                 # (B, 64, N)
    return global_feat, point_feat


def make_params(key):
    """Deterministic parameters for all 5 PointNetConv1d blocks, BN folded (eval mode)."""
    dims = [(3, 64), (64, 64), (64, 64), (64, 128), (128, 1024)]
    eps = 1e-5
    params, raw = [], []
    for (cin, cout) in dims:
        key, k1, k2, k3, k4, k5, k6 = jax.random.split(key, 7)
        w = jax.random.normal(k1, (cout, cin), jnp.float32) * 0.1    # Conv1d weight (O, I, 1) squeezed
        bias = jax.random.normal(k2, (cout,), jnp.float32) * 0.1     # Conv1d bias
        gamma = 1.0 + 0.1 * jax.random.normal(k3, (cout,), jnp.float32)
        beta = 0.1 * jax.random.normal(k4, (cout,), jnp.float32)
        rmean = 0.1 * jax.random.normal(k5, (cout,), jnp.float32)
        rvar = jnp.abs(jax.random.normal(k6, (cout,), jnp.float32)) + 0.5
        s = gamma / jnp.sqrt(rvar + eps)
        w_eff = (w * s[:, None]).astype(jnp.bfloat16)                # (Cout, Cin) bf16
        b_eff = ((bias - rmean) * s + beta).reshape(cout, 1)         # (Cout, 1) f32
        params.append((w_eff, b_eff))
        raw.append((w, bias, gamma, beta, rmean, rvar))
    return params, raw, eps


def reference_forward(x_ncl, raw, eps):
    """Pure-JAX f32 reference mirroring the PyTorch forward (eval-mode BN)."""
    def block(h, p):                                     # h: (B, C, N)
        w, bias, gamma, beta, rmean, rvar = p
        y = jnp.einsum('oc,bcn->bon', w, h) + bias[None, :, None]
        y = (y - rmean[None, :, None]) / jnp.sqrt(rvar[None, :, None] + eps)
        y = y * gamma[None, :, None] + beta[None, :, None]
        return jnp.where(y >= 0, y, 0.2 * y)
    h = block(x_ncl, raw[0])
    point_feat = block(h, raw[1])
    g = block(point_feat, raw[2])
    g = block(g, raw[3])
    g = block(g, raw[4])
    global_feat = jnp.max(g, axis=-1)
    return global_feat, point_feat


if __name__ == "__main__":
    key = jax.random.PRNGKey(0)
    kx, kp, kx2 = jax.random.split(key, 3)
    params, raw, eps = make_params(kp)

    # Small single-tile case (tile = full point dim).
    B, C, N = 2, 3, 16
    x = jax.random.normal(kx, (B, C, N), jnp.float32)
    global_feat, point_feat = pointnet_feat(x, params)
    jax.block_until_ready((global_feat, point_feat))
    ref_g, ref_p = reference_forward(x, raw, eps)
    assert global_feat.shape == (B, 1024) and point_feat.shape == (B, 64, N)
    assert jnp.allclose(global_feat, ref_g, atol=5e-2, rtol=5e-2)   # bf16 matmuls
    assert jnp.allclose(point_feat, ref_p, atol=5e-2, rtol=5e-2)

    # Multi-tile case exercising N padding + masking of the global max.
    N2 = 160
    x2 = jax.random.normal(kx2, (B, C, N2), jnp.float32)
    g2, p2 = pointnet_feat(x2, params, tile_n=128)
    jax.block_until_ready((g2, p2))
    ref_g2, ref_p2 = reference_forward(x2, raw, eps)
    assert g2.shape == (B, 1024) and p2.shape == (B, 64, N2)
    assert jnp.allclose(g2, ref_g2, atol=5e-2, rtol=5e-2)
    assert jnp.allclose(p2, ref_p2, atol=5e-2, rtol=5e-2)

    print("KERNEL_OK")
</pallas_src>

<mosaic_0001>
module attributes {stable_mosaic.version = 11 : i64} {
  func.func @_pointnet_kernel(%arg0: i32, %arg1: i32, %arg2: memref<1x3x16xf32, #tpu.memory_space<vmem>>, %arg3: memref<64x3xbf16, #tpu.memory_space<vmem>>, %arg4: memref<64x1xf32, #tpu.memory_space<vmem>>, %arg5: memref<64x64xbf16, #tpu.memory_space<vmem>>, %arg6: memref<64x1xf32, #tpu.memory_space<vmem>>, %arg7: memref<64x64xbf16, #tpu.memory_space<vmem>>, %arg8: memref<64x1xf32, #tpu.memory_space<vmem>>, %arg9: memref<128x64xbf16, #tpu.memory_space<vmem>>, %arg10: memref<128x1xf32, #tpu.memory_space<vmem>>, %arg11: memref<1024x128xbf16, #tpu.memory_space<vmem>>, %arg12: memref<1024x1xf32, #tpu.memory_space<vmem>>, %arg13: memref<1x1024x1xf32, #tpu.memory_space<vmem>>, %arg14: memref<1x64x16xf32, #tpu.memory_space<vmem>>, %arg15: memref<1024x1xf32, #tpu.memory_space<vmem>>) attributes {dimension_semantics = [#tpu.dimension_semantics<parallel>, #tpu.dimension_semantics<arbitrary>], iteration_bounds = array<i64: 2, 1>, scalar_prefetch = 0 : i64, scratch_operands = 1 : i64, tpu.core_type = #tpu.core_type<tc>, window_params = [{transform_indices = @transform_0, window_bounds = array<i64: 1, 3, 16>}, {pipeline_mode = #tpu.pipeline_mode<synchronous>, transform_indices = @transform_1, window_bounds = array<i64: 64, 3>}, {pipeline_mode = #tpu.pipeline_mode<synchronous>, transform_indices = @transform_2, window_bounds = array<i64: 64, 1>}, {pipeline_mode = #tpu.pipeline_mode<synchronous>, transform_indices = @transform_3, window_bounds = array<i64: 64, 64>}, {pipeline_mode = #tpu.pipeline_mode<synchronous>, transform_indices = @transform_4, window_bounds = array<i64: 64, 1>}, {pipeline_mode = #tpu.pipeline_mode<synchronous>, transform_indices = @transform_5, window_bounds = array<i64: 64, 64>}, {pipeline_mode = #tpu.pipeline_mode<synchronous>, transform_indices = @transform_6, window_bounds = array<i64: 64, 1>}, {pipeline_mode = #tpu.pipeline_mode<synchronous>, transform_indices = @transform_7, window_bounds = array<i64: 128, 64>}, {pipeline_mode = #tpu.pipeline_mode<synchronous>, transform_indices = @transform_8, window_bounds = array<i64: 128, 1>}, {pipeline_mode = #tpu.pipeline_mode<synchronous>, transform_indices = @transform_9, window_bounds = array<i64: 1024, 128>}, {pipeline_mode = #tpu.pipeline_mode<synchronous>, transform_indices = @transform_10, window_bounds = array<i64: 1024, 1>}, {transform_indices = @transform_11, window_bounds = array<i64: 1, 1024, 1>}, {transform_indices = @transform_12, window_bounds = array<i64: 1, 64, 16>}]} {
    %c0_i32 = arith.constant 0 : i32
    %0 = arith.cmpi eq, %arg1, %c0_i32 : i32
    %1 = arith.extui %0 : i1 to i32
    %c0_i32_0 = arith.constant 0 : i32
    %2 = arith.cmpi ne, %1, %c0_i32_0 : i32
    scf.if %2 {
      %cst_72 = arith.constant 0xFF800000 : f32
      %100 = vector.broadcast %cst_72 : f32 to vector<1024x1xf32>
      %c0_73 = arith.constant 0 : index
      %c0_74 = arith.constant 0 : index
      %101 = vector.load %arg15[%c0_73, %c0_74] : memref<1024x1xf32, #tpu.memory_space<vmem>>, vector<1024x1xf32>
      tpu.vector_store %arg15[%c0_73, %c0_74], %100 {strides = array<i32>} : memref<1024x1xf32, #tpu.memory_space<vmem>>, vector<1024x1xf32>,
    } else {
    }
    %c0 = arith.constant 0 : index
    %c0_1 = arith.constant 0 : index
    %c0_2 = arith.constant 0 : index
    %3 = vector.load %arg2[%c0, %c0_1, %c0_2] : memref<1x3x16xf32, #tpu.memory_space<vmem>>, vector<1x3x16xf32>
    %4 = vector.shape_cast %3 : vector<1x3x16xf32> to vector<3x16xf32>
    %5 = arith.truncf %4 : vector<3x16xf32> to vector<3x16xbf16>
    %c0_3 = arith.constant 0 : index
    %c0_4 = arith.constant 0 : index
    %6 = vector.load %arg3[%c0_3, %c0_4] : memref<64x3xbf16, #tpu.memory_space<vmem>>, vector<64x3xbf16>
    %cst = arith.constant dense<0.000000e+00> : vector<64x16xf32>
    %7 = tpu.matmul %6, %5, %cst {dimension_numbers = #tpu.dot_dimension_numbers<[1], [0], [0], [1], [0, 0, 1, 1], [], []>} : vector<64x3xbf16>, vector<3x16xbf16>, vector<64x16xf32> -> vector<64x16xf32>
    %c0_5 = arith.constant 0 : index
    %c0_6 = arith.constant 0 : index
    %8 = vector.load %arg4[%c0_5, %c0_6] : memref<64x1xf32, #tpu.memory_space<vmem>>, vector<64x1xf32>
    %9 = vector.broadcast %8 : vector<64x1xf32> to vector<64x16xf32>
    %10 = arith.addf %7, %9 : vector<64x16xf32>
    %cst_7 = arith.constant 2.000000e-01 : f32
    %11 = vector.broadcast %cst_7 : f32 to vector<64x16xf32>
    %12 = arith.mulf %11, %10 : vector<64x16xf32>
    %13 = arith.maximumf %10, %12 : vector<64x16xf32>
    %14 = arith.truncf %13 : vector<64x16xf32> to vector<64x16xbf16>
    %c0_8 = arith.constant 0 : index
    %c0_9 = arith.constant 0 : index
    %15 = vector.load %arg5[%c0_8, %c0_9] : memref<64x64xbf16, #tpu.memory_space<vmem>>, vector<64x64xbf16>
    %cst_10 = arith.constant dense<0.000000e+00> : vector<64x16xf32>
    %16 = tpu.matmul %15, %14, %cst_10 {dimension_numbers = #tpu.dot_dimension_numbers<[1], [0], [0], [1], [0, 0, 1, 1], [], []>} : vector<64x64xbf16>, vector<64x16xbf16>, vector<64x16xf32> -> vector<64x16xf32>
    %c0_11 = arith.constant 0 : index
    %c0_12 = arith.constant 0 : index
    %17 = vector.load %arg6[%c0_11, %c0_12] : memref<64x1xf32, #tpu.memory_space<vmem>>, vector<64x1xf32>
    %18 = vector.broadcast %17 : vector<64x1xf32> to vector<64x16xf32>
    %19 = arith.addf %16, %18 : vector<64x16xf32>
    %cst_13 = arith.constant 2.000000e-01 : f32
    %20 = vector.broadcast %cst_13 : f32 to vector<64x16xf32>
    %21 = arith.mulf %20, %19 : vector<64x16xf32>
    %22 = arith.maximumf %19, %21 : vector<64x16xf32>
    %c0_14 = arith.constant 0 : index
    %c0_15 = arith.constant 0 : index
    %c0_16 = arith.constant 0 : index
    %23 = vector.load %arg14[%c0_14, %c0_15, %c0_16] : memref<1x64x16xf32, #tpu.memory_space<vmem>>, vector<1x64x16xf32>
    %24 = vector.shape_cast %23 : vector<1x64x16xf32> to vector<64x16xf32>
    %25 = vector.shape_cast %22 : vector<64x16xf32> to vector<1x64x16xf32>
    tpu.vector_store %arg14[%c0_14, %c0_15, %c0_16], %25 {strides = array<i32>} : memref<1x64x16xf32, #tpu.memory_space<vmem>>, vector<1x64x16xf32>,
    %26 = arith.truncf %22 : vector<64x16xf32> to vector<64x16xbf16>
    %c0_17 = arith.constant 0 : index
    %c0_18 = arith.constant 0 : index
    %27 = vector.load %arg7[%c0_17, %c0_18] : memref<64x64xbf16, #tpu.memory_space<vmem>>, vector<64x64xbf16>
    %cst_19 = arith.constant dense<0.000000e+00> : vector<64x16xf32>
    %28 = tpu.matmul %27, %26, %cst_19 {dimension_numbers = #tpu.dot_dimension_numbers<[1], [0], [0], [1], [0, 0, 1, 1], [], []>} : vector<64x64xbf16>, vector<64x16xbf16>, vector<64x16xf32> -> vector<64x16xf32>
    %c0_20 = arith.constant 0 : index
    %c0_21 = arith.constant 0 : index
    %29 = vector.load %arg8[%c0_20, %c0_21] : memref<64x1xf32, #tpu.memory_space<vmem>>, vector<64x1xf32>
    %30 = vector.broadcast %29 : vector<64x1xf32> to vector<64x16xf32>
    %31 = arith.addf %28, %30 : vector<64x16xf32>
    %cst_22 = arith.constant 2.000000e-01 : f32
    %32 = vector.broadcast %cst_22 : f32 to vector<64x16xf32>
    %33 = arith.mulf %32, %31 : vector<64x16xf32>
    %34 = arith.maximumf %31, %33 : vector<64x16xf32>
    %35 = arith.truncf %34 : vector<64x16xf32> to vector<64x16xbf16>
    %c0_23 = arith.constant 0 : index
    %c0_24 = arith.constant 0 : index
    %36 = vector.load %arg9[%c0_23, %c0_24] : memref<128x64xbf16, #tpu.memory_space<vmem>>, vector<128x64xbf16>
    %cst_25 = arith.constant dense<0.000000e+00> : vector<128x16xf32>
    %37 = tpu.matmul %36, %35, %cst_25 {dimension_numbers = #tpu.dot_dimension_numbers<[1], [0], [0], [1], [0, 0, 1, 1], [], []>} : vector<128x64xbf16>, vector<64x16xbf16>, vector<128x16xf32> -> vector<128x16xf32>
    %c0_26 = arith.constant 0 : index
    %c0_27 = arith.constant 0 : index
    %38 = vector.load %arg10[%c0_26, %c0_27] : memref<128x1xf32, #tpu.memory_space<vmem>>, vector<128x1xf32>
    %39 = vector.broadcast %38 : vector<128x1xf32> to vector<128x16xf32>
    %40 = arith.addf %37, %39 : vector<128x16xf32>
    %cst_28 = arith.constant 2.000000e-01 : f32
    %41 = vector.broadcast %cst_28 : f32 to vector<128x16xf32>
    %42 = arith.mulf %41, %40 : vector<128x16xf32>
    %43 = arith.maximumf %40, %42 : vector<128x16xf32>
    %44 = arith.truncf %43 : vector<128x16xf32> to vector<128x16xbf16>
    %c0_29 = arith.constant 0 : index
    %c0_30 = arith.constant 0 : index
    %45 = vector.load %arg11[%c0_29, %c0_30] : memref<1024x128xbf16, #tpu.memory_space<vmem>>, vector<256x128xbf16>
    %cst_31 = arith.constant dense<0.000000e+00> : vector<256x16xf32>
    %46 = tpu.matmul %45, %44, %cst_31 {dimension_numbers = #tpu.dot_dimension_numbers<[1], [0], [0], [1], [0, 0, 1, 1], [], []>} : vector<256x128xbf16>, vector<128x16xbf16>, vector<256x16xf32> -> vector<256x16xf32>
    %c0_32 = arith.constant 0 : index
    %c0_33 = arith.constant 0 : index
    %47 = vector.load %arg12[%c0_32, %c0_33] : memref<1024x1xf32, #tpu.memory_space<vmem>>, vector<256x1xf32>
    %48 = vector.broadcast %47 : vector<256x1xf32> to vector<256x16xf32>
    %49 = arith.addf %46, %48 : vector<256x16xf32>
    %cst_34 = arith.constant 2.000000e-01 : f32
    %50 = vector.broadcast %cst_34 : f32 to vector<256x16xf32>
    %51 = arith.mulf %50, %49 : vector<256x16xf32>
    %52 = arith.maximumf %49, %51 : vector<256x16xf32>
    %cst_35 = arith.constant dense<0xFF800000> : vector<256xf32>
    %53 = vector.multi_reduction <maximumf>, %52, %cst_35 [1] : vector<256x16xf32> to vector<256xf32>
    %54 = vector.shape_cast %53 : vector<256xf32> to vector<256x1xf32>
    %c0_36 = arith.constant 0 : index
    %c0_37 = arith.constant 0 : index
    %55 = vector.load %arg15[%c0_36, %c0_37] : memref<1024x1xf32, #tpu.memory_space<vmem>>, vector<256x1xf32>
    %56 = arith.maximumf %55, %54 : vector<256x1xf32>
    %c0_38 = arith.constant 0 : index
    %c0_39 = arith.constant 0 : index
    %57 = vector.load %arg15[%c0_38, %c0_39] : memref<1024x1xf32, #tpu.memory_space<vmem>>, vector<256x1xf32>
    tpu.vector_store %arg15[%c0_38, %c0_39], %56 {strides = array<i32>} : memref<1024x1xf32, #tpu.memory_space<vmem>>, vector<256x1xf32>,
    %c256 = arith.constant 256 : index
    %c0_40 = arith.constant 0 : index
    %58 = vector.load %arg11[%c256, %c0_40] : memref<1024x128xbf16, #tpu.memory_space<vmem>>, vector<256x128xbf16>
    %cst_41 = arith.constant dense<0.000000e+00> : vector<256x16xf32>
    %59 = tpu.matmul %58, %44, %cst_41 {dimension_numbers = #tpu.dot_dimension_numbers<[1], [0], [0], [1], [0, 0, 1, 1], [], []>} : vector<256x128xbf16>, vector<128x16xbf16>, vector<256x16xf32> -> vector<256x16xf32>
    %c256_42 = arith.constant 256 : index
    %c0_43 = arith.constant 0 : index
    %60 = vector.load %arg12[%c256_42, %c0_43] : memref<1024x1xf32, #tpu.memory_space<vmem>>, vector<256x1xf32>
    %61 = vector.broadcast %60 : vector<256x1xf32> to vector<256x16xf32>
    %62 = arith.addf %59, %61 : vector<256x16xf32>
    %cst_44 = arith.constant 2.000000e-01 : f32
    %63 = vector.broadcast %cst_44 : f32 to vector<256x16xf32>
    %64 = arith.mulf %63, %62 : vector<256x16xf32>
    %65 = arith.maximumf %62, %64 : vector<256x16xf32>
    %cst_45 = arith.constant dense<0xFF800000> : vector<256xf32>
    %66 = vector.multi_reduction <maximumf>, %65, %cst_45 [1] : vector<256x16xf32> to vector<256xf32>
    %67 = vector.shape_cast %66 : vector<256xf32> to vector<256x1xf32>
    %c256_46 = arith.constant 256 : index
    %c0_47 = arith.constant 0 : index
    %68 = vector.load %arg15[%c256_46, %c0_47] : memref<1024x1xf32, #tpu.memory_space<vmem>>, vector<256x1xf32>
    %69 = arith.maximumf %68, %67 : vector<256x1xf32>
    %c256_48 = arith.constant 256 : index
    %c0_49 = arith.constant 0 : index
    %70 = vector.load %arg15[%c256_48, %c0_49] : memref<1024x1xf32, #tpu.memory_space<vmem>>, vector<256x1xf32>
    tpu.vector_store %arg15[%c256_48, %c0_49], %69 {strides = array<i32>} : memref<1024x1xf32, #tpu.memory_space<vmem>>, vector<256x1xf32>,
    %c512 = arith.constant 512 : index
    %c0_50 = arith.constant 0 : index
    %71 = vector.load %arg11[%c512, %c0_50] : memref<1024x128xbf16, #tpu.memory_space<vmem>>, vector<256x128xbf16>
    %cst_51 = arith.constant dense<0.000000e+00> : vector<256x16xf32>
    %72 = tpu.matmul %71, %44, %cst_51 {dimension_numbers = #tpu.dot_dimension_numbers<[1], [0], [0], [1], [0, 0, 1, 1], [], []>} : vector<256x128xbf16>, vector<128x16xbf16>, vector<256x16xf32> -> vector<256x16xf32>
    %c512_52 = arith.constant 512 : index
    %c0_53 = arith.constant 0 : index
    %73 = vector.load %arg12[%c512_52, %c0_53] : memref<1024x1xf32, #tpu.memory_space<vmem>>, vector<256x1xf32>
    %74 = vector.broadcast %73 : vector<256x1xf32> to vector<256x16xf32>
    %75 = arith.addf %72, %74 : vector<256x16xf32>
    %cst_54 = arith.constant 2.000000e-01 : f32
    %76 = vector.broadcast %cst_54 : f32 to vector<256x16xf32>
    %77 = arith.mulf %76, %75 : vector<256x16xf32>
    %78 = arith.maximumf %75, %77 : vector<256x16xf32>
    %cst_55 = arith.constant dense<0xFF800000> : vector<256xf32>
    %79 = vector.multi_reduction <maximumf>, %78, %cst_55 [1] : vector<256x16xf32> to vector<256xf32>
    %80 = vector.shape_cast %79 : vector<256xf32> to vector<256x1xf32>
    %c512_56 = arith.constant 512 : index
    %c0_57 = arith.constant 0 : index
    %81 = vector.load %arg15[%c512_56, %c0_57] : memref<1024x1xf32, #tpu.memory_space<vmem>>, vector<256x1xf32>
    %82 = arith.maximumf %81, %80 : vector<256x1xf32>
    %c512_58 = arith.constant 512 : index
    %c0_59 = arith.constant 0 : index
    %83 = vector.load %arg15[%c512_58, %c0_59] : memref<1024x1xf32, #tpu.memory_space<vmem>>, vector<256x1xf32>
    tpu.vector_store %arg15[%c512_58, %c0_59], %82 {strides = array<i32>} : memref<1024x1xf32, #tpu.memory_space<vmem>>, vector<256x1xf32>,
    %c768 = arith.constant 768 : index
    %c0_60 = arith.constant 0 : index
    %84 = vector.load %arg11[%c768, %c0_60] : memref<1024x128xbf16, #tpu.memory_space<vmem>>, vector<256x128xbf16>
    %cst_61 = arith.constant dense<0.000000e+00> : vector<256x16xf32>
    %85 = tpu.matmul %84, %44, %cst_61 {dimension_numbers = #tpu.dot_dimension_numbers<[1], [0], [0], [1], [0, 0, 1, 1], [], []>} : vector<256x128xbf16>, vector<128x16xbf16>, vector<256x16xf32> -> vector<256x16xf32>
    %c768_62 = arith.constant 768 : index
    %c0_63 = arith.constant 0 : index
    %86 = vector.load %arg12[%c768_62, %c0_63] : memref<1024x1xf32, #tpu.memory_space<vmem>>, vector<256x1xf32>
    %87 = vector.broadcast %86 : vector<256x1xf32> to vector<256x16xf32>
    %88 = arith.addf %85, %87 : vector<256x16xf32>
    %cst_64 = arith.constant 2.000000e-01 : f32
    %89 = vector.broadcast %cst_64 : f32 to vector<256x16xf32>
    %90 = arith.mulf %89, %88 : vector<256x16xf32>
    %91 = arith.maximumf %88, %90 : vector<256x16xf32>
    %cst_65 = arith.constant dense<0xFF800000> : vector<256xf32>
    %92 = vector.multi_reduction <maximumf>, %91, %cst_65 [1] : vector<256x16xf32> to vector<256xf32>
    %93 = vector.shape_cast %92 : vector<256xf32> to vector<256x1xf32>
    %c768_66 = arith.constant 768 : index
    %c0_67 = arith.constant 0 : index
    %94 = vector.load %arg15[%c768_66, %c0_67] : memref<1024x1xf32, #tpu.memory_space<vmem>>, vector<256x1xf32>
    %95 = arith.maximumf %94, %93 : vector<256x1xf32>
    %c768_68 = arith.constant 768 : index
    %c0_69 = arith.constant 0 : index
    %96 = vector.load %arg15[%c768_68, %c0_69] : memref<1024x1xf32, #tpu.memory_space<vmem>>, vector<256x1xf32>
    tpu.vector_store %arg15[%c768_68, %c0_69], %95 {strides = array<i32>} : memref<1024x1xf32, #tpu.memory_space<vmem>>, vector<256x1xf32>,
    %c0_i32_70 = arith.constant 0 : i32
    %97 = arith.cmpi eq, %arg1, %c0_i32_70 : i32
    %98 = arith.extui %97 : i1 to i32
    %c0_i32_71 = arith.constant 0 : i32
    %99 = arith.cmpi ne, %98, %c0_i32_71 : i32
    scf.if %99 {
      %c0_72 = arith.constant 0 : index
      %c0_73 = arith.constant 0 : index
      %100 = vector.load %arg15[%c0_72, %c0_73] : memref<1024x1xf32, #tpu.memory_space<vmem>>, vector<1024x1xf32>
      %c0_74 = arith.constant 0 : index
      %c0_75 = arith.constant 0 : index
      %c0_76 = arith.constant 0 : index
      %101 = vector.load %arg13[%c0_74, %c0_75, %c0_76] : memref<1x1024x1xf32, #tpu.memory_space<vmem>>, vector<1x1024x1xf32>
      %102 = vector.shape_cast %101 : vector<1x1024x1xf32> to vector<1024x1xf32>
      %103 = vector.shape_cast %100 : vector<1024x1xf32> to vector<1x1024x1xf32>
      tpu.vector_store %arg13[%c0_74, %c0_75, %c0_76], %103 {strides = array<i32>} : memref<1x1024x1xf32, #tpu.memory_space<vmem>>, vector<1x1024x1xf32>,
    } else {
    }
    return
  }
  func.func @transform_0(%arg0: i32, %arg1: i32) -> (i32, i32, i32) {
    %c0_i32 = arith.constant 0 : i32
    %c0_i32_0 = arith.constant 0 : i32
    return %arg0, %c0_i32, %arg1 : i32, i32, i32
  }
  func.func @transform_1(%arg0: i32, %arg1: i32) -> (i32, i32) {
    %c0_i32 = arith.constant 0 : i32
    %c0_i32_0 = arith.constant 0 : i32
    %c0_i32_1 = arith.constant 0 : i32
    return %c0_i32, %c0_i32_0 : i32, i32
  }
  func.func @transform_2(%arg0: i32, %arg1: i32) -> (i32, i32) {
    %c0_i32 = arith.constant 0 : i32
    %c0_i32_0 = arith.constant 0 : i32
    %c0_i32_1 = arith.constant 0 : i32
    return %c0_i32, %c0_i32_0 : i32, i32
  }
  func.func @transform_3(%arg0: i32, %arg1: i32) -> (i32, i32) {
    %c0_i32 = arith.constant 0 : i32
    %c0_i32_0 = arith.constant 0 : i32
    %c0_i32_1 = arith.constant 0 : i32
    return %c0_i32, %c0_i32_0 : i32, i32
  }
  func.func @transform_4(%arg0: i32, %arg1: i32) -> (i32, i32) {
    %c0_i32 = arith.constant 0 : i32
    %c0_i32_0 = arith.constant 0 : i32
    %c0_i32_1 = arith.constant 0 : i32
    return %c0_i32, %c0_i32_0 : i32, i32
  }
  func.func @transform_5(%arg0: i32, %arg1: i32) -> (i32, i32) {
    %c0_i32 = arith.constant 0 : i32
    %c0_i32_0 = arith.constant 0 : i32
    %c0_i32_1 = arith.constant 0 : i32
    return %c0_i32, %c0_i32_0 : i32, i32
  }
  func.func @transform_6(%arg0: i32, %arg1: i32) -> (i32, i32) {
    %c0_i32 = arith.constant 0 : i32
    %c0_i32_0 = arith.constant 0 : i32
    %c0_i32_1 = arith.constant 0 : i32
    return %c0_i32, %c0_i32_0 : i32, i32
  }
  func.func @transform_7(%arg0: i32, %arg1: i32) -> (i32, i32) {
    %c0_i32 = arith.constant 0 : i32
    %c0_i32_0 = arith.constant 0 : i32
    %c0_i32_1 = arith.constant 0 : i32
    return %c0_i32, %c0_i32_0 : i32, i32
  }
  func.func @transform_8(%arg0: i32, %arg1: i32) -> (i32, i32) {
    %c0_i32 = arith.constant 0 : i32
    %c0_i32_0 = arith.constant 0 : i32
    %c0_i32_1 = arith.constant 0 : i32
    return %c0_i32, %c0_i32_0 : i32, i32
  }
  func.func @transform_9(%arg0: i32, %arg1: i32) -> (i32, i32) {
    %c0_i32 = arith.constant 0 : i32
    %c0_i32_0 = arith.constant 0 : i32
    %c0_i32_1 = arith.constant 0 : i32
    return %c0_i32, %c0_i32_0 : i32, i32
  }
  func.func @transform_10(%arg0: i32, %arg1: i32) -> (i32, i32) {
    %c0_i32 = arith.constant 0 : i32
    %c0_i32_0 = arith.constant 0 : i32
    %c0_i32_1 = arith.constant 0 : i32
    return %c0_i32, %c0_i32_0 : i32, i32
  }
  func.func @transform_11(%arg0: i32, %arg1: i32) -> (i32, i32, i32) {
    %c0_i32 = arith.constant 0 : i32
    %c0_i32_0 = arith.constant 0 : i32
    %c0_i32_1 = arith.constant 0 : i32
    return %arg0, %c0_i32, %c0_i32_0 : i32, i32, i32
  }
  func.func @transform_12(%arg0: i32, %arg1: i32) -> (i32, i32, i32) {
    %c0_i32 = arith.constant 0 : i32
    %c0_i32_0 = arith.constant 0 : i32
    return %arg0, %c0_i32, %arg1 : i32, i32, i32
  }
}

</mosaic_0001>

<bundles_post_ra>
// kernel: tpu_custom_call.1
= control target key start
LH: loop header
LB: loop body
LE: loop exit
PB: predicated region body
PF: predicated region fallthrough
CT: control target
= control target key end

     0   :  { %s5472_s21 = smov 0   ;;  %s5474_s22 = smov 0   ;;  %s8190_s0 = inlined_call_operand.vmem [shape: f32[2,3,16], index: 0, kind: input, shape index: {}]   ;;  %s8191_s1 = inlined_call_operand.vmem [shape: bf16[64,3], index: 1, kind: input, shape index: {}]   ;;  %s8192_s2 = inlined_call_operand.vmem [shape: f32[64,1], index: 2, kind: input, shape index: {}]   ;;  %s8193_s3 = inlined_call_operand.vmem [shape: bf16[64,64], index: 3, kind: input, shape index: {}]   ;;  %s8194_s4 = inlined_call_operand.vmem [shape: f32[64,1], index: 4, kind: input, shape index: {}]   ;;  %s8195_s5 = inlined_call_operand.vmem [shape: bf16[64,64], index: 5, kind: input, shape index: {}]   ;;  %s8196_s6 = inlined_call_operand.vmem [shape: f32[64,1], index: 6, kind: input, shape index: {}]   ;;  %s8197_s7 = inlined_call_operand.vmem [shape: bf16[128,64], index: 7, kind: input, shape index: {}]   ;;  %s8198_s8 = inlined_call_operand.vmem [shape: f32[128,1], index: 8, kind: input, shape index: {}]   ;;  %s8199_s9 = inlined_call_operand.vmem [shape: bf16[1024,128], index: 9, kind: input, shape index: {}]   ;;  %s8200_s10 = inlined_call_operand.vmem [shape: f32[1024,1], index: 10, kind: input, shape index: {}]   ;;  %s8201_s11 = inlined_call_operand.vmem [shape: f32[2,1024,1], index: 11, kind: output, shape index: {0}]   ;;  %s8202_s12 = inlined_call_operand.vmem [shape: f32[2,64,16], index: 12, kind: output, shape index: {1}]  }
   0x1   :  { %s5476_s23 = smov 0  }
   0x2 LB: > { %s35_s24 = sadd.s32 1, %s5398_s22  ;;  %p4766_p0 = scmp.ge.s32.totalorder %s5402_s23, 1  ;;  %s5402_s23 = sphi %s5476_s23, %s23_s23   ;;  %s5398_s22 = sphi %s5474_s22, %s8394_s22   ;;  %s5394_s21 = sphi %s5472_s21, %s8393_s21  }
   0x3   : > { %p37_p1 = scmp.ge.s32.totalorder %s35_s24, 2  ;;  %p383_p2 = scmp.lt.s32.totalorder %s5402_s23, 3 }
   0x5   : > { %s8396_s24 = smov (%p37_p1, %s35_s24), 0  ;;  %p384_p3 = pnand %p4766_p0, %p383_p2 }
   0x7   : > { %387 = sbr.rel (%p384_p3) target bundleno = 1692 (0x69c), region = 64 }
   0xe   : > { %v601_v0 = vld [vmem:[%s8192_s2 + $0x10] sm:$0xff]  ;;  %v599_v1 = vld [vmem:[%s8192_s2] sm:$0xff]  ;;  %p435_p4 = scmp.lt.s32.totalorder %s5394_s21, 1  ;;  %vm680_vm0 = vcmask 1040384   ;;  %v5404_v2 = vmov 0   ;;  %v602_v3 = vld [vmem:[%s8192_s2 + $0x18] sm:$0xff] }
   0xf   : > { %5295 = vset.pattern.permute.xlu1 %v5404_v2  ;;  %5294 = vset.pattern.permute.xlu0 %v5404_v2  ;;  %v600_v4 = vld [vmem:[%s8192_s2 + $0x8] sm:$0xff]  ;;  %vm681_vm1 = vcmask 1041408   ;;  %vm667_vm2 = vcmask 23552   ;;  %v5405_v5 = vmov 65535   ;;  %v5296_v7 = vld [vmem:[%s8191_s1] sm:$0xff]   ;;  %v606_v14 = vld [vmem:[%s8192_s2 + $0x38] sm:$0xff] }
  0x10   : > { %619 = vperm.xlu1 %5295, %v601_v0   ;;  %609 = vperm.xlu0 %5294, %v599_v1   ;;  %s8398_s21 = smov (!%p435_p4, %s5394_s21), 1  ;;  %v682_v6 = vsel %vm680_vm0, 4294967295, %v5405_v5  ;;  %v604_v8 = vld [vmem:[%s8192_s2 + $0x28] sm:$0xff]  ;;  %v603_v9 = vld [vmem:[%s8192_s2 + $0x20] sm:$0xff]  ;;  %v605_v15 = vld [vmem:[%s8192_s2 + $0x30] sm:$0xff]  ;;  %vm848_vm3 = vcmask 523264  }
  0x11   : > { %s4767_s17 = sshll.u32 %s8398_s21, 2  ;;  %5011 = vmatprep.mubr.msk.bf16.mxu0 %vm667_vm2, %v5296_v7  ;;  %v683_v11 = vsel %vm681_vm1, %v682_v6, 0  ;;  %v5297_v16 = vld [vmem:[%s8191_s1 + $0x8] sm:$0xff]   ;;  %v5298_v17 = vld [vmem:[%s8191_s1 + $0x10] sm:$0xff]   ;;  %v780_v19 = vld [vmem:[%s8194_s4] sm:$0xff]  ;;  %s4879_s15 = sshll.u32 %s8398_s21, 6 }
  0x12   : > { %s441_s26 = scalar_lea.vmem %s8190_s0, %s4767_s17  ;;  %v781_v18 = vld [vmem:[%s8194_s4 + $0x8] sm:$0xff]  ;;  %v783_v20 = vld [vmem:[%s8194_s4 + $0x18] sm:$0xff]  ;;  %v782_v21 = vld [vmem:[%s8194_s4 + $0x10] sm:$0xff]  ;;  %s6191_s18 = scalar_lea.vmem %s8202_s12, %s4879_s15  ;;  %vm942_vm4 = vcmask 130048   ;;  %vm460_vm5 = vcmask 7168  }
  0x13   : > { %v589_v10 = vld [vmem:[%s441_s26] sm:$0x7]  ;;  %v5299_v22 = vld [vmem:[%s8191_s1 + $0x18] sm:$0xff]   ;;  %v785_v23 = vld [vmem:[%s8194_s4 + $0x28] sm:$0xff]  ;;  %s4878_s15 = sshll.u32 %s8398_s21, 10 }
  0x14   : > { %624 = vperm.xlu1 %5295, %v602_v3   ;;  %614 = vperm.xlu0 %5294, %v600_v4   ;;  %v590_v12 = vpack.c.bf16 %v589_v10, %v589_v10  ;;  %v784_v24 = vld [vmem:[%s8194_s4 + $0x20] sm:$0xff]  ;;  %v787_v25 = vld [vmem:[%s8194_s4 + $0x38] sm:$0xff]  ;;  %v786_v26 = vld [vmem:[%s8194_s4 + $0x30] sm:$0xff]  ;;  %s7494_s17 = scalar_lea.vmem %s8201_s11, %s4878_s15 }
  0x15   : > { %v964_v27 = vld [vmem:[%s8196_s6 + $0x8] sm:$0xff]  ;;  %v963_v28 = vld [vmem:[%s8196_s6] sm:$0xff]  ;;  %v966_v29 = vld [vmem:[%s8196_s6 + $0x18] sm:$0xff] }
  0x16   : > { %v685_v13 = vand.u32 %v683_v11, %v590_v12  ;;  %v965_v30 = vld [vmem:[%s8196_s6 + $0x10] sm:$0xff]  ;;  %v968_v31 = vld [vmem:[%s8196_s6 + $0x28] sm:$0xff]  ;;  %v967_v32 = vld [vmem:[%s8196_s6 + $0x20] sm:$0xff] }
  0x17   : > { %v970_v33 = vld [vmem:[%s8196_s6 + $0x38] sm:$0xff]  ;;  %v969_v34 = vld [vmem:[%s8196_s6 + $0x30] sm:$0xff]  ;;  %v1145_v35 = vld [vmem:[%s8198_s8 + $0x8] sm:$0xff] }
  0x18   : > { %634 = vperm.xlu1 %5295, %v604_v8   ;;  %629 = vperm.xlu0 %5294, %v603_v9   ;;  %v1144_v36 = vld [vmem:[%s8198_s8] sm:$0xff]  ;;  %v1147_v37 = vld [vmem:[%s8198_s8 + $0x18] sm:$0xff]  ;;  %v1146_v38 = vld [vmem:[%s8198_s8 + $0x10] sm:$0xff] }
  0x19   : > { %5009 = vmatprep.subr.bf16.mxu0 %v685_v13  ;;  %v1149_v39 = vld [vmem:[%s8198_s8 + $0x28] sm:$0xff]  ;;  %v1148_v40 = vld [vmem:[%s8198_s8 + $0x20] sm:$0xff]  ;;  %v1151_v41 = vld [vmem:[%s8198_s8 + $0x38] sm:$0xff] }
  0x1a   : > { %5010 = vmatpush3.bf16.msra.mxu0 %v685_v13  ;;  %v1150_v42 = vld [vmem:[%s8198_s8 + $0x30] sm:$0xff]  ;;  %v1153_v43 = vld [vmem:[%s8198_s8 + $0x48] sm:$0xff]  ;;  %v1152_v44 = vld [vmem:[%s8198_s8 + $0x40] sm:$0xff] }
  0x1b   : > { %v1155_v45 = vld [vmem:[%s8198_s8 + $0x58] sm:$0xff]  ;;  %v1154_v46 = vld [vmem:[%s8198_s8 + $0x50] sm:$0xff]  ;;  %v1157_v47 = vld [vmem:[%s8198_s8 + $0x68] sm:$0xff] }
  0x1c   : > { %644 = vperm.xlu1 %5295, %v606_v14   ;;  %639 = vperm.xlu0 %5294, %v605_v15   ;;  %v1156_v48 = vld [vmem:[%s8198_s8 + $0x60] sm:$0xff]  ;;  %v1159_v49 = vld [vmem:[%s8198_s8 + $0x78] sm:$0xff]  ;;  %v1158_v50 = vld [vmem:[%s8198_s8 + $0x70] sm:$0xff] }
  0x1d   : > { %5012 = vmatmul.mubr.msk.bf16.vlgmr.msra.gmra.mrb[0].mxu0 %vm667_vm2, %v5297_v16  ;;  %v1474_v51 = vld [vmem:[%s8200_s10 + $0x8] sm:$0xff]  ;;  %v1473_v52 = vld [vmem:[%s8200_s10] sm:$0xff]  ;;  %v1476_v53 = vld [vmem:[%s8200_s10 + $0x18] sm:$0xff] }
  0x1e   : > { %5015 = vmatprep.mubr.msk.bf16.mxu0 %vm667_vm2, %v5298_v17  ;;  %v1475_v54 = vld [vmem:[%s8200_s10 + $0x10] sm:$0xff]  ;;  %v1478_v55 = vld [vmem:[%s8200_s10 + $0x28] sm:$0xff]  ;;  %v1477_v56 = vld [vmem:[%s8200_s10 + $0x20] sm:$0xff] }
  0x1f   : > { %v1480_v57 = vld [vmem:[%s8200_s10 + $0x38] sm:$0xff]  ;;  %v1479_v58 = vld [vmem:[%s8200_s10 + $0x30] sm:$0xff]  ;;  %v1482_v59 = vld [vmem:[%s8200_s10 + $0x48] sm:$0xff] }
  0x20   : > { %795 = vperm.xlu1 %5295, %v781_v18   ;;  %790 = vperm.xlu0 %5294, %v780_v19   ;;  %v1481_v60 = vld [vmem:[%s8200_s10 + $0x40] sm:$0xff]  ;;  %v1484_v61 = vld [vmem:[%s8200_s10 + $0x58] sm:$0xff]  ;;  %v1483_v62 = vld [vmem:[%s8200_s10 + $0x50] sm:$0xff] }
  0x21   : > { %v1486_v63 = vld [vmem:[%s8200_s10 + $0x68] sm:$0xff]  ;;  %v1485_v0 = vld [vmem:[%s8200_s10 + $0x60] sm:$0xff]  ;;  %v1488_v1 = vld [vmem:[%s8200_s10 + $0x78] sm:$0xff] }
  0x22   : > { %v1487_v2 = vld [vmem:[%s8200_s10 + $0x70] sm:$0xff]  ;;  %v1490_v3 = vld [vmem:[%s8200_s10 + $0x88] sm:$0xff]  ;;  %v1489_v4 = vld [vmem:[%s8200_s10 + $0x80] sm:$0xff] }
  0x23   : > { %v1492_v5 = vld [vmem:[%s8200_s10 + $0x98] sm:$0xff]  ;;  %v1491_v6 = vld [vmem:[%s8200_s10 + $0x90] sm:$0xff]  ;;  %v1494_v7 = vld [vmem:[%s8200_s10 + $0xa8] sm:$0xff] }
  0x24   : > { %805 = vperm.xlu1 %5295, %v783_v20   ;;  %800 = vperm.xlu0 %5294, %v782_v21   ;;  %v1493_v8 = vld [vmem:[%s8200_s10 + $0xa0] sm:$0xff]  ;;  %v1496_v9 = vld [vmem:[%s8200_s10 + $0xb8] sm:$0xff]  ;;  %v1495_v10 = vld [vmem:[%s8200_s10 + $0xb0] sm:$0xff] }
  0x25   : > { %5016 = vmatmul.mubr.msk.bf16.gmra.mrb[4].mxu0 %vm667_vm2, %v5299_v22  ;;  %v5300_v11 = vld [vmem:[%s8193_s3] sm:$0xff]   ;;  %v1498_v12 = vld [vmem:[%s8200_s10 + $0xc8] sm:$0xff]  ;;  %v1500_v15 = vld [vmem:[%s8200_s10 + $0xd8] sm:$0xff] }
  0x26   : > { %v1497_v13 = vld [vmem:[%s8200_s10 + $0xc0] sm:$0xff]  ;;  %5027 = vmatprep.mubr.msk.bf16.mxu1 %vm848_vm3, %v5300_v11  ;;  %v1499_v16 = vld [vmem:[%s8200_s10 + $0xd0] sm:$0xff]  ;;  %v1502_v19 = vld [vmem:[%s8200_s10 + $0xe8] sm:$0xff] }
  0x27   : > { %v1501_v20 = vld [vmem:[%s8200_s10 + $0xe0] sm:$0xff]  ;;  %v1504_v22 = vld [vmem:[%s8200_s10 + $0xf8] sm:$0xff] }
  0x28   : > { %815 = vperm.xlu1 %5295, %v785_v23   ;;  %810 = vperm.xlu0 %5294, %v784_v24   ;;  %v1503_v23 = vld [vmem:[%s8200_s10 + $0xf0] sm:$0xff] }
  0x2c   : > { %825 = vperm.xlu1 %5295, %v787_v25   ;;  %820 = vperm.xlu0 %5294, %v786_v26   ;;  %v2211_v26 = vld [vmem:[%s8200_s10 + $0x100] sm:$0xff] }
  0x30   : > { %978 = vperm.xlu1 %5295, %v964_v27   ;;  %973 = vperm.xlu0 %5294, %v963_v28   ;;  %v2212_v27 = vld [vmem:[%s8200_s10 + $0x108] sm:$0xff] }
  0x34   : > { %988 = vperm.xlu1 %5295, %v966_v29   ;;  %983 = vperm.xlu0 %5294, %v965_v30   ;;  %v2213_v29 = vld [vmem:[%s8200_s10 + $0x110] sm:$0xff]  ;;  %v2215_v30 = vld [vmem:[%s8200_s10 + $0x120] sm:$0xff] }
  0x38   : > { %998 = vperm.xlu1 %5295, %v968_v31   ;;  %993 = vperm.xlu0 %5294, %v967_v32   ;;  %v2214_v32 = vld [vmem:[%s8200_s10 + $0x118] sm:$0xff] }
  0x3c   : > { %1008 = vperm.xlu1 %5295, %v970_v33   ;;  %1003 = vperm.xlu0 %5294, %v969_v34   ;;  %v2217_v33 = vld [vmem:[%s8200_s10 + $0x130] sm:$0xff] }
  0x40   : > { %1167 = vperm.xlu1 %5295, %v1145_v35   ;;  %1162 = vperm.xlu0 %5294, %v1144_v36   ;;  %v2216_v36 = vld [vmem:[%s8200_s10 + $0x128] sm:$0xff] }
  0x44   : > { %1177 = vperm.xlu1 %5295, %v1147_v37   ;;  %1172 = vperm.xlu0 %5294, %v1146_v38   ;;  %v2219_v37 = vld [vmem:[%s8200_s10 + $0x140] sm:$0xff] }
  0x48   : > { %1187 = vperm.xlu1 %5295, %v1149_v39   ;;  %1182 = vperm.xlu0 %5294, %v1148_v40   ;;  %v2218_v39 = vld [vmem:[%s8200_s10 + $0x138] sm:$0xff]  ;;  %v2221_v40 = vld [vmem:[%s8200_s10 + $0x150] sm:$0xff] }
  0x4c   : > { %1197 = vperm.xlu1 %5295, %v1151_v41   ;;  %1192 = vperm.xlu0 %5294, %v1150_v42   ;;  %v2220_v42 = vld [vmem:[%s8200_s10 + $0x148] sm:$0xff] }
  0x50   : > { %1207 = vperm.xlu1 %5295, %v1153_v43   ;;  %1202 = vperm.xlu0 %5294, %v1152_v44   ;;  %v2223_v43 = vld [vmem:[%s8200_s10 + $0x160] sm:$0xff] }
  0x54   : > { %1217 = vperm.xlu1 %5295, %v1155_v45   ;;  %1212 = vperm.xlu0 %5294, %v1154_v46   ;;  %v2222_v46 = vld [vmem:[%s8200_s10 + $0x158] sm:$0xff] }
  0x58   : > { %1227 = vperm.xlu1 %5295, %v1157_v47   ;;  %1222 = vperm.xlu0 %5294, %v1156_v48   ;;  %v2225_v47 = vld [vmem:[%s8200_s10 + $0x170] sm:$0xff] }
  0x5c   : > { %1237 = vperm.xlu1 %5295, %v1159_v49   ;;  %1232 = vperm.xlu0 %5294, %v1158_v50   ;;  %v2224_v49 = vld [vmem:[%s8200_s10 + $0x168] sm:$0xff]  ;;  %v2227_v50 = vld [vmem:[%s8200_s10 + $0x180] sm:$0xff] }
  0x60   : > { %1512 = vperm.xlu1 %5295, %v1474_v51   ;;  %1507 = vperm.xlu0 %5294, %v1473_v52   ;;  %v2226_v52 = vld [vmem:[%s8200_s10 + $0x178] sm:$0xff] }
  0x64   : > { %1522 = vperm.xlu1 %5295, %v1476_v53   ;;  %1517 = vperm.xlu0 %5294, %v1475_v54   ;;  %v2229_v53 = vld [vmem:[%s8200_s10 + $0x190] sm:$0xff] }
  0x68   : > { %1532 = vperm.xlu1 %5295, %v1478_v55   ;;  %1527 = vperm.xlu0 %5294, %v1477_v56   ;;  %v2228_v56 = vld [vmem:[%s8200_s10 + $0x188] sm:$0xff] }
  0x6c   : > { %1542 = vperm.xlu1 %5295, %v1480_v57   ;;  %1537 = vperm.xlu0 %5294, %v1479_v58   ;;  %v2231_v57 = vld [vmem:[%s8200_s10 + $0x1a0] sm:$0xff] }
  0x70   : > { %1552 = vperm.xlu1 %5295, %v1482_v59   ;;  %1547 = vperm.xlu0 %5294, %v1481_v60   ;;  %v2230_v59 = vld [vmem:[%s8200_s10 + $0x198] sm:$0xff]  ;;  %v2233_v60 = vld [vmem:[%s8200_s10 + $0x1b0] sm:$0xff] }
  0x74   : > { %1562 = vperm.xlu1 %5295, %v1484_v61   ;;  %1557 = vperm.xlu0 %5294, %v1483_v62   ;;  %v2232_v62 = vld [vmem:[%s8200_s10 + $0x1a8] sm:$0xff] }
  0x78   : > { %1572 = vperm.xlu1 %5295, %v1486_v63   ;;  %1567 = vperm.xlu0 %5294, %v1485_v0   ;;  %v2235_v63 = vld [vmem:[%s8200_s10 + $0x1c0] sm:$0xff] }
  0x7c   : > { %1582 = vperm.xlu1 %5295, %v1488_v1   ;;  %1577 = vperm.xlu0 %5294, %v1487_v2   ;;  %v2234_v2 = vld [vmem:[%s8200_s10 + $0x1b8] sm:$0xff] }
  0x80   : > { %1592 = vperm.xlu1 %5295, %v1490_v3   ;;  %1587 = vperm.xlu0 %5294, %v1489_v4   ;;  %v2237_v3 = vld [vmem:[%s8200_s10 + $0x1d0] sm:$0xff] }
  0x84   : > { %1602 = vperm.xlu1 %5295, %v1492_v5   ;;  %1597 = vperm.xlu0 %5294, %v1491_v6   ;;  %v2236_v5 = vld [vmem:[%s8200_s10 + $0x1c8] sm:$0xff]  ;;  %v2239_v6 = vld [vmem:[%s8200_s10 + $0x1e0] sm:$0xff] }
  0x88   : > { %1612 = vperm.xlu1 %5295, %v1494_v7   ;;  %1607 = vperm.xlu0 %5294, %v1493_v8   ;;  %v2238_v8 = vld [vmem:[%s8200_s10 + $0x1d8] sm:$0xff] }
  0x8c   : > { %1622 = vperm.xlu1 %5295, %v1496_v9   ;;  %1617 = vperm.xlu0 %5294, %v1495_v10   ;;  %v2241_v9 = vld [vmem:[%s8200_s10 + $0x1f0] sm:$0xff] }
  0x8f   : > { %v5714_v14 = vpop.permute.xlu1 %619  ;;  %v5724_v18 = vpop.permute.xlu0 %609 }
  0x90   : > { %1632 = vperm.xlu1 %5295, %v1498_v12   ;;  %1627 = vperm.xlu0 %5294, %v1497_v13   ;;  %v2240_v12 = vld [vmem:[%s8200_s10 + $0x1e8] sm:$0xff] }
  0x91   : > { %v2949_v13 = vld [vmem:[%s8200_s10 + $0x208] sm:$0xff] }
  0x93   : > { %v5722_v17 = vpop.permute.xlu1 %624  ;;  %v5740_v24 = vpop.permute.xlu0 %614 }
  0x94   : > { %1642 = vperm.xlu1 %5295, %v1500_v15   ;;  %1637 = vperm.xlu0 %5294, %v1499_v16   ;;  %v2242_v16 = vld [vmem:[%s8200_s10 + $0x1f8] sm:$0xff] }
  0x97   : > { %v5732_v21 = vpop.permute.xlu1 %634  ;;  %v5750_v28 = vpop.permute.xlu0 %629 }
  0x98   : > { %1652 = vperm.xlu1 %5295, %v1502_v19   ;;  %1647 = vperm.xlu0 %5294, %v1501_v20   ;;  %v2952_v19 = vld [vmem:[%s8200_s10 + $0x220] sm:$0xff] }
  0x9b   : > { %v5742_v25 = vpop.permute.xlu1 %644  ;;  %v5766_v34 = vpop.permute.xlu0 %639 }
  0x9c   : > { %1662 = vperm.xlu1 %5295, %v1504_v22   ;;  %1657 = vperm.xlu0 %5294, %v1503_v23   ;;  %v2948_v22 = vld [vmem:[%s8200_s10 + $0x200] sm:$0xff]  ;;  %v2954_v23 = vld [vmem:[%s8200_s10 + $0x230] sm:$0xff] }
  0x9f   : > { %v5758_v31 = vpop.permute.xlu1 %795  ;;  %v5776_v38 = vpop.permute.xlu0 %790 }
  0xa0   : > { %2245 = vperm.xlu1 %5295, %v2211_v26   ;;  %2250 = vperm.xlu0 %5294, %v2212_v27  }
  0xa3   : > { %v5768_v35 = vpop.permute.xlu1 %805  ;;  %v5792_v44 = vpop.permute.xlu0 %800 }
  0xa4   : > { %2255 = vperm.xlu1 %5295, %v2213_v29   ;;  %2265 = vperm.xlu0 %5294, %v2215_v30   ;;  %v2950_v29 = vld [vmem:[%s8200_s10 + $0x210] sm:$0xff]  ;;  %v2956_v30 = vld [vmem:[%s8200_s10 + $0x240] sm:$0xff] }
  0xa7   : > { %v5784_v41 = vpop.permute.xlu1 %815  ;;  %v5802_v48 = vpop.permute.xlu0 %810 }
  0xa8   : > { %2260 = vperm.xlu1 %5295, %v2214_v32   ;;  %2275 = vperm.xlu0 %5294, %v2217_v33   ;;  %v2951_v33 = vld [vmem:[%s8200_s10 + $0x218] sm:$0xff] }
  0xab   : > { %v5794_v45 = vpop.permute.xlu1 %825  ;;  %v5818_v54 = vpop.permute.xlu0 %820 }
  0xac   : > { %2270 = vperm.xlu1 %5295, %v2216_v36   ;;  %2285 = vperm.xlu0 %5294, %v2219_v37   ;;  %v2958_v36 = vld [vmem:[%s8200_s10 + $0x250] sm:$0xff] }
  0xaf   : > { %v5810_v51 = vpop.permute.xlu1 %978  ;;  %v5828_v58 = vpop.permute.xlu0 %973 }
  0xb0   : > { %2280 = vperm.xlu1 %5295, %v2218_v39   ;;  %2295 = vperm.xlu0 %5294, %v2221_v40   ;;  %v2953_v39 = vld [vmem:[%s8200_s10 + $0x228] sm:$0xff]  ;;  %v2960_v40 = vld [vmem:[%s8200_s10 + $0x260] sm:$0xff] }
  0xb3   : > { %v5820_v55 = vpop.permute.xlu1 %988  ;;  %v5844_v0 = vpop.permute.xlu0 %983 }
  0xb4   : > { %2290 = vperm.xlu1 %5295, %v2220_v42   ;;  %2305 = vperm.xlu0 %5294, %v2223_v43  }
  0xb7   : > { %v5836_v61 = vpop.permute.xlu1 %998  ;;  %v5854_v4 = vpop.permute.xlu0 %993 }
  0xb8   : > { %2300 = vperm.xlu1 %5295, %v2222_v46   ;;  %2315 = vperm.xlu0 %5294, %v2225_v47  }
  0xbb   : > { %v5846_v1 = vpop.permute.xlu1 %1008  ;;  %v5870_v10 = vpop.permute.xlu0 %1003 }
  0xbc   : > { %2310 = vperm.xlu1 %5295, %v2224_v49   ;;  %2325 = vperm.xlu0 %5294, %v2227_v50   ;;  %v2955_v50 = vld [vmem:[%s8200_s10 + $0x238] sm:$0xff] }
  0xbf   : > { %v5862_v7 = vpop.permute.xlu1 %1167  ;;  %v5880_v15 = vpop.permute.xlu0 %1162 }
  0xc0   : > { %2320 = vperm.xlu1 %5295, %v2226_v52   ;;  %2335 = vperm.xlu0 %5294, %v2229_v53   ;;  %v2962_v52 = vld [vmem:[%s8200_s10 + $0x270] sm:$0xff] }
  0xc3   : > { %v5872_v11 = vpop.permute.xlu1 %1177  ;;  %v5896_v26 = vpop.permute.xlu0 %1172 }
  0xc4   : > { %2330 = vperm.xlu1 %5295, %v2228_v56   ;;  %2345 = vperm.xlu0 %5294, %v2231_v57  }
  0xc7   : > { %v5888_v20 = vpop.permute.xlu1 %1187  ;;  %v5906_v32 = vpop.permute.xlu0 %1182 }
  0xc8   : > { %2340 = vperm.xlu1 %5295, %v2230_v59   ;;  %2355 = vperm.xlu0 %5294, %v2233_v60  }
  0xcb   : > { %v5898_v27 = vpop.permute.xlu1 %1197  ;;  %v5922_v42 = vpop.permute.xlu0 %1192 }
  0xcc   : > { %2350 = vperm.xlu1 %5295, %v2232_v62   ;;  %2365 = vperm.xlu0 %5294, %v2235_v63  }
  0xcf   : > { %v5914_v37 = vpop.permute.xlu1 %1207  ;;  %v5935_v62 = vpop.permute.xlu0 %1202 }
  0xd0   : > { %2360 = vperm.xlu1 %5295, %v2234_v2   ;;  %2375 = vperm.xlu0 %5294, %v2237_v3   ;;  %v2957_v3 = vld [vmem:[%s8200_s10 + $0x248] sm:$0xff] }
  0xd3   : > { %v5924_v43 = vpop.permute.xlu1 %1217 }
  0xd4   : > { %2370 = vperm.xlu1 %5295, %v2236_v5   ;;  %2385 = vperm.xlu0 %5294, %v2239_v6  }
  0xd7   : > { %v5944_v5 = vpop.permute.xlu1 %1227 }
  0xd8   : > { %2380 = vperm.xlu1 %5295, %v2238_v8   ;;  %2395 = vperm.xlu0 %5294, %v2241_v9  }
  0xdc   : > { %2390 = vperm.xlu1 %5295, %v2240_v12   ;;  %2987 = vperm.xlu0 %5294, %v2949_v13  }
  0xe0   : > { %2400 = vperm.xlu1 %5295, %v2242_v16   ;;  %3002 = vperm.xlu0 %5294, %v2952_v19   ;;  %v2959_v19 = vld [vmem:[%s8200_s10 + $0x258] sm:$0xff] }
  0xe4   : > { %2982 = vperm.xlu1 %5295, %v2948_v22   ;;  %3012 = vperm.xlu0 %5294, %v2954_v23   ;;  %v2966_v22 = vld [vmem:[%s8200_s10 + $0x290] sm:$0xff] }
  0xe8   : > { %2992 = vperm.xlu1 %5295, %v2950_v29   ;;  %3022 = vperm.xlu0 %5294, %v2956_v30  }
  0xec   : > { %2997 = vperm.xlu1 %5295, %v2951_v33   ;;  %3032 = vperm.xlu0 %5294, %v2958_v36   ;;  %v5954_v33 = vpop.permute.xlu0 %1212 }
  0xf0   : > { %3007 = vperm.xlu1 %5295, %v2953_v39   ;;  %3042 = vperm.xlu0 %5294, %v2960_v40   ;;  %v5013_v46 = vpop.f32.mrb[0].mxu0 }
  0xf1   : > { %v730_v47 = vadd.f32 %v5013_v46, %v5714_v14  ;;  %v721_v49 = vpop.f32.mrb[1].mxu0 }
  0xf2   : > { %v722_v53 = vadd.f32 %v721_v49, %v5724_v18  ;;  %v5014_v56 = vpop.f32.mrb[2].mxu0  ;;  %v2964_v18 = vld [vmem:[%s8200_s10 + $0x280] sm:$0xff] }
  0xf3   : > { %v754_v57 = vmul.f32 0.2, %v730_v47  ;;  %v733_v59 = vadd.f32 %v5014_v56, %v5722_v17  ;;  %v724_v60 = vpop.f32.mrb[3].mxu0 }
  0xf4   : > { %3017 = vperm.xlu1 %5295, %v2955_v50   ;;  %3052 = vperm.xlu0 %5294, %v2962_v52   ;;  %v752_v14 = vmul.f32 0.2, %v722_v53  ;;  %v725_v2 = vadd.f32 %v724_v60, %v5740_v24  ;;  %v2968_v52 = vld [vmem:[%s8200_s10 + $0x2a0] sm:$0xff]  ;;  %v2970_v60 = vld [vmem:[%s8200_s10 + $0x2b0] sm:$0xff] }
  0xf5   : > { %v755_v63 = vmul.f32 0.2, %v733_v59  ;;  %v762_v17 = vmax.f32 %v730_v47, %v754_v57 }
  0xf6   : > { %v753_v8 = vmul.f32 0.2, %v725_v2  ;;  %v760_v12 = vmax.f32 %v722_v53, %v752_v14 }
  0xf7   : > { %v763_v6 = vmax.f32 %v733_v59, %v755_v63  ;;  %v5972_v63 = vpop.permute.xlu0 %1222 }
  0xf8   : > { %3027 = vperm.xlu1 %5295, %v2957_v3   ;;  %3062 = vperm.xlu0 %5294, %v2964_v18   ;;  %v5017_v9 = vpop.f32.mrb[4].mxu0  ;;  %v761_v13 = vmax.f32 %v725_v2, %v753_v8  ;;  %v2965_v18 = vld [vmem:[%s8200_s10 + $0x288] sm:$0xff] }
  0xf9   : > { %v746_v24 = vadd.f32 %v5017_v9, %v5766_v34  ;;  %v737_v16 = vpop.f32.mrb[5].mxu0  ;;  %v769_v23 = vpack.c.bf16 %v763_v6, %v762_v17  ;;  %v5957_v34 = vpop.permute.xlu1 %1237  ;;  %v2972_v17 = vld [vmem:[%s8200_s10 + $0x2c0] sm:$0xff]  ;;  %v2967_v9 = vld [vmem:[%s8200_s10 + $0x298] sm:$0xff] }
  0xfa   : > { %v738_v29 = vadd.f32 %v737_v16, %v5750_v28  ;;  %v5018_v30 = vpop.f32.mrb[6].mxu0  ;;  %v768_v40 = vpack.c.bf16 %v761_v13, %v760_v12  ;;  %v2961_v28 = vld [vmem:[%s8200_s10 + $0x268] sm:$0xff]  ;;  %v2974_v12 = vld [vmem:[%s8200_s10 + $0x2d0] sm:$0xff] }
  0xfb   : > { %v758_v36 = vmul.f32 0.2, %v746_v24  ;;  %v749_v39 = vadd.f32 %v5018_v30, %v5742_v25  ;;  %v740_v46 = vpop.f32.mrb[7].mxu0  ;;  %v5982_v6 = vpop.permute.xlu0 %1232  ;;  %v5301_v13 = vld [vmem:[%s8193_s3 + $0x8] sm:$0xff]   ;;  %v2978_v30 = vld [vmem:[%s8200_s10 + $0x2f0] sm:$0xff] }
  0xfc   : > { %3037 = vperm.xlu1 %5295, %v2959_v19   ;;  %3072 = vperm.xlu0 %5294, %v2966_v22   ;;  %v756_v47 = vmul.f32 0.2, %v738_v29  ;;  %v741_v50 = vadd.f32 %v740_v46, %v5732_v21  ;;  %v2963_v21 = vld [vmem:[%s8200_s10 + $0x278] sm:$0xff]  ;;  %v2969_v16 = vld [vmem:[%s8200_s10 + $0x2a8] sm:$0xff]  ;;  %v2976_v19 = vld [vmem:[%s8200_s10 + $0x2e0] sm:$0xff] }
  0xfd   : > { %v759_v49 = vmul.f32 0.2, %v749_v39  ;;  %5019 = vmatprep.subr.bf16.mxu1 %v768_v40  ;;  %v766_v25 = vmax.f32 %v746_v24, %v758_v36  ;;  %v5974_v2 = vpop.permute.xlu1 %1512  ;;  %v5302_v24 = vld [vmem:[%s8193_s3 + $0x10] sm:$0xff]   ;;  %v5303_v36 = vld [vmem:[%s8193_s3 + $0x18] sm:$0xff]   ;;  %v2973_v46 = vld [vmem:[%s8200_s10 + $0x2c8] sm:$0xff] }
  0xfe   : > { %5020 = vmatpush3.bf16.msra.mxu1 %v768_v40  ;;  %v757_v56 = vmul.f32 0.2, %v741_v50  ;;  %v764_v57 = vmax.f32 %v738_v29, %v756_v47  ;;  %v2971_v29 = vld [vmem:[%s8200_s10 + $0x2b8] sm:$0xff]  ;;  %v3686_v47 = vld [vmem:[%s8200_s10 + $0x308] sm:$0xff] }
  0xff   : > { %v767_v53 = vmax.f32 %v749_v39, %v759_v49  ;;  %5021 = vmatprep.subr.bf16.mxu1 %v769_v23  ;;  %v6005_v22 = vpop.permute.xlu0 %1507  ;;  %v2975_v49 = vld [vmem:[%s8200_s10 + $0x2d8] sm:$0xff] }
 0x100   : > { %3047 = vperm.xlu1 %5295, %v2961_v28   ;;  %3082 = vperm.xlu0 %5294, %v2968_v52   ;;  %v765_v59 = vmax.f32 %v741_v50, %v757_v56  ;;  %v3689_v50 = vld [vmem:[%s8200_s10 + $0x320] sm:$0xff] }
 0x101   : > { %v771_v14 = vpack.c.bf16 %v767_v53, %v766_v25  ;;  %v5984_v8 = vpop.permute.xlu1 %1522  ;;  %v2977_v25 = vld [vmem:[%s8200_s10 + $0x2e8] sm:$0xff]  ;;  %v3691_v53 = vld [vmem:[%s8200_s10 + $0x330] sm:$0xff] }
 0x102   : > { %5022 = vmatpush3.bf16.msra.mxu1 %v769_v23  ;;  %v770_v3 = vpack.c.bf16 %v765_v59, %v764_v57  ;;  %v2979_v59 = vld [vmem:[%s8200_s10 + $0x2f8] sm:$0xff] }
 0x103   : > { %v6019_v39 = vpop.permute.xlu0 %1517 }
 0x104   : > { %3057 = vperm.xlu1 %5295, %v2963_v21   ;;  %3092 = vperm.xlu0 %5294, %v2970_v60   ;;  %v3693_v21 = vld [vmem:[%s8200_s10 + $0x340] sm:$0xff] }
 0x105   : > { %5023 = vmatprep.subr.bf16.mxu1 %v770_v3  ;;  %v6007_v23 = vpop.permute.xlu1 %1532  ;;  %v3685_v60 = vld [vmem:[%s8200_s10 + $0x300] sm:$0xff] }
 0x106   : > { %5024 = vmatpush3.bf16.msra.mxu1 %v770_v3 }
 0x107   : > { %5025 = vmatprep.subr.bf16.mxu1 %v771_v14  ;;  %v6036_v28 = vpop.permute.xlu0 %1527 }
 0x108   : > { %3067 = vperm.xlu1 %5295, %v2965_v18   ;;  %3102 = vperm.xlu0 %5294, %v2972_v17   ;;  %v3687_v17 = vld [vmem:[%s8200_s10 + $0x310] sm:$0xff] }
 0x109   : > { %v6021_v40 = vpop.permute.xlu1 %1542 }
 0x10a   : > { %5026 = vmatpush3.bf16.msra.mxu1 %v771_v14  ;;  %v3695_v14 = vld [vmem:[%s8200_s10 + $0x350] sm:$0xff] }
 0x10b   : > { %v6046_v56 = vpop.permute.xlu0 %1537 }
 0x10c   : > { %3077 = vperm.xlu1 %5295, %v2967_v9   ;;  %3112 = vperm.xlu0 %5294, %v2974_v12   ;;  %v3697_v9 = vld [vmem:[%s8200_s10 + $0x360] sm:$0xff] }
 0x10d   : > { %5028 = vmatmul.mubr.msk.bf16.vlgmr.msra.gmra.mrb[0].mxu1 %vm848_vm3, %v5301_v13  ;;  %v6038_v52 = vpop.permute.xlu1 %1552 }
 0x10e   : > { %5031 = vmatprep.mubr.msk.bf16.mxu1 %vm848_vm3, %v5302_v24  ;;  %v3688_v24 = vld [vmem:[%s8200_s10 + $0x318] sm:$0xff] }
 0x10f   : > { %v6062_v3 = vpop.permute.xlu0 %1547 }
 0x110   : > { %3087 = vperm.xlu1 %5295, %v2969_v16   ;;  %3122 = vperm.xlu0 %5294, %v2976_v19   ;;  %v3699_v16 = vld [vmem:[%s8200_s10 + $0x370] sm:$0xff]  ;;  %v3690_v19 = vld [vmem:[%s8200_s10 + $0x328] sm:$0xff] }
 0x111   : > { %v6048_v57 = vpop.permute.xlu1 %1562 }
 0x113   : > { %v6072_v12 = vpop.permute.xlu0 %1557 }
 0x114   : > { %3097 = vperm.xlu1 %5295, %v2971_v29   ;;  %3132 = vperm.xlu0 %5294, %v2978_v30   ;;  %v3701_v29 = vld [vmem:[%s8200_s10 + $0x380] sm:$0xff] }
 0x115   : > { %5032 = vmatmul.mubr.msk.bf16.gmra.mrb[4].mxu1 %vm848_vm3, %v5303_v36  ;;  %v6064_v18 = vpop.permute.xlu1 %1572 }
 0x116   : > { %8204 = vst [vmem:[#allocation3_spill] sm:$0xff] %v6064_v18 }
 0x117   : > { %v6088_v30 = vpop.permute.xlu0 %1567 }
 0x118   : > { %3107 = vperm.xlu1 %5295, %v2973_v46   ;;  %3724 = vperm.xlu0 %5294, %v3686_v47   ;;  %v3692_v46 = vld [vmem:[%s8200_s10 + $0x338] sm:$0xff]  ;;  %v3703_v47 = vld [vmem:[%s8200_s10 + $0x390] sm:$0xff] }
 0x119   : > { %v6074_v13 = vpop.permute.xlu1 %1582 }
 0x11c   : > { %3117 = vperm.xlu1 %5295, %v2975_v49   ;;  %3739 = vperm.xlu0 %5294, %v3689_v50   ;;  %v6098_v49 = vpop.permute.xlu0 %1577 }
 0x11d   : > { %v6090_v36 = vpop.permute.xlu1 %1592 }
 0x11e   : > { %8205 = vst [vmem:[#allocation4_spill] sm:$0xff] %v6090_v36 }
 0x120   : > { %3127 = vperm.xlu1 %5295, %v2977_v25   ;;  %3749 = vperm.xlu0 %5294, %v3691_v53   ;;  %v3694_v25 = vld [vmem:[%s8200_s10 + $0x348] sm:$0xff]  ;;  %v3705_v53 = vld [vmem:[%s8200_s10 + $0x3a0] sm:$0xff] }
 0x121   : > { %v6100_v50 = vpop.permute.xlu1 %1602 }
 0x122   : > { %8206 = vst [vmem:[#allocation5_spill] sm:$0xff] %v6100_v50 }
 0x124   : > { %3137 = vperm.xlu1 %5295, %v2979_v59   ;;  %3759 = vperm.xlu0 %5294, %v3693_v21   ;;  %v3696_v59 = vld [vmem:[%s8200_s10 + $0x358] sm:$0xff]  ;;  %v3707_v21 = vld [vmem:[%s8200_s10 + $0x3b0] sm:$0xff] }
 0x128   : > { %3719 = vperm.xlu1 %5295, %v3685_v60   ;;  %3769 = vperm.xlu0 %5294, %v3695_v14   ;;  %v6114_v60 = vpop.permute.xlu0 %1587  ;;  %v6116_v14 = vpop.permute.xlu1 %1612 }
 0x129   : > { %8207 = vst [vmem:[#allocation6_spill] sm:$0xff] %v6114_v60  ;;  %8208 = vst [vmem:[#allocation7_spill] sm:$0xff] %v6116_v14 }
 0x12c   : > { %3729 = vperm.xlu1 %5295, %v3687_v17   ;;  %3779 = vperm.xlu0 %5294, %v3697_v9   ;;  %v3698_v17 = vld [vmem:[%s8200_s10 + $0x368] sm:$0xff]  ;;  %v3709_v9 = vld [vmem:[%s8200_s10 + $0x3c0] sm:$0xff] }
 0x130   : > { %3734 = vperm.xlu1 %5295, %v3688_v24   ;;  %3789 = vperm.xlu0 %5294, %v3699_v16   ;;  %v6124_v24 = vpop.permute.xlu0 %1597  ;;  %v6126_v16 = vpop.permute.xlu1 %1622 }
 0x131   : > { %8209 = vst [vmem:[#allocation8_spill] sm:$0xff] %v6126_v16 }
 0x134   : > { %3744 = vperm.xlu1 %5295, %v3690_v19   ;;  %3799 = vperm.xlu0 %5294, %v3701_v29   ;;  %v3700_v19 = vld [vmem:[%s8200_s10 + $0x378] sm:$0xff]  ;;  %v3711_v29 = vld [vmem:[%s8200_s10 + $0x3d0] sm:$0xff] }
 0x138   : > { %3754 = vperm.xlu1 %5295, %v3692_v46   ;;  %3809 = vperm.xlu0 %5294, %v3703_v47   ;;  %v3702_v46 = vld [vmem:[%s8200_s10 + $0x388] sm:$0xff]  ;;  %v3713_v47 = vld [vmem:[%s8200_s10 + $0x3e0] sm:$0xff] }
 0x13c   : > { %3764 = vperm.xlu1 %5295, %v3694_v25   ;;  %3819 = vperm.xlu0 %5294, %v3705_v53   ;;  %v6140_v25 = vpop.permute.xlu0 %1607  ;;  %v6142_v53 = vpop.permute.xlu1 %1632 }
 0x13d   : > { %8210 = vst [vmem:[#allocation9_spill] sm:$0xff] %v6140_v25  ;;  %8211 = vst [vmem:[#allocation10_spill] sm:$0xff] %v6142_v53 }
 0x140   : > { %3774 = vperm.xlu1 %5295, %v3696_v59   ;;  %3829 = vperm.xlu0 %5294, %v3707_v21   ;;  %v3704_v59 = vld [vmem:[%s8200_s10 + $0x398] sm:$0xff]  ;;  %v3715_v21 = vld [vmem:[%s8200_s10 + $0x3f0] sm:$0xff] }
 0x144   : > { %3784 = vperm.xlu1 %5295, %v3698_v17   ;;  %3839 = vperm.xlu0 %5294, %v3709_v9   ;;  %v6150_v17 = vpop.permute.xlu0 %1617  ;;  %v6152_v9 = vpop.permute.xlu1 %1642 }
 0x145   : > { %8212 = vst [vmem:[#allocation11_spill] sm:$0xff] %v6150_v17  ;;  %8213 = vst [vmem:[#allocation12_spill] sm:$0xff] %v6152_v9 }
 0x148   : > { %3794 = vperm.xlu1 %5295, %v3700_v19   ;;  %3849 = vperm.xlu0 %5294, %v3711_v29   ;;  %v3706_v19 = vld [vmem:[%s8200_s10 + $0x3a8] sm:$0xff]  ;;  %v3708_v29 = vld [vmem:[%s8200_s10 + $0x3b8] sm:$0xff] }
 0x14c   : > { %3804 = vperm.xlu1 %5295, %v3702_v46   ;;  %3859 = vperm.xlu0 %5294, %v3713_v47   ;;  %v6160_v46 = vpop.permute.xlu1 %1652  ;;  %v3710_v47 = vld [vmem:[%s8200_s10 + $0x3c8] sm:$0xff] }
 0x14d   : > { %8214 = vst [vmem:[#allocation13_spill] sm:$0xff] %v6160_v46 }
 0x150   : > { %3814 = vperm.xlu1 %5295, %v3704_v59   ;;  %3869 = vperm.xlu0 %5294, %v3715_v21   ;;  %v6165_v53 = vpop.permute.xlu1 %1662  ;;  %v3712_v59 = vld [vmem:[%s8200_s10 + $0x3d8] sm:$0xff]  ;;  %v3714_v21 = vld [vmem:[%s8200_s10 + $0x3e8] sm:$0xff] }
 0x151   : > { %8215 = vst [vmem:[#allocation14_spill] sm:$0xff] %v6165_v53 }
 0x154   : > { %3824 = vperm.xlu1 %5295, %v3706_v19   ;;  %v6173_v19 = vpop.permute.xlu1 %2245 }
 0x158   : > { %3834 = vperm.xlu1 %5295, %v3708_v29   ;;  %v3716_v29 = vld [vmem:[%s8200_s10 + $0x3f8] sm:$0xff]  ;;  %v6178_v46 = vpop.permute.xlu1 %2255 }
 0x15c   : > { %3844 = vperm.xlu1 %5295, %v3710_v47   ;;  %v5304_v47 = vld [vmem:[%s8195_s5] sm:$0xff]  }
 0x15d   : > { %5043 = vmatprep.mubr.msk.bf16.mxu0 %vm848_vm3, %v5304_v47 }
 0x160   : > { %3854 = vperm.xlu1 %5295, %v3712_v59  }
 0x164   : > { %3864 = vperm.xlu1 %5295, %v3714_v21  }
 0x168   : > { %3874 = vperm.xlu1 %5295, %v3716_v29  }
 0x1e0   : > { %v5029_v59 = vpop.f32.mrb[0].mxu1 }
 0x1e1   : > { %v904_v53 = vadd.f32 %v5029_v59, %v5792_v44  ;;  %v895_v9 = vpop.f32.mrb[1].mxu1 }
 0x1e2   : > { %v896_v21 = vadd.f32 %v895_v9, %v5776_v38  ;;  %v5030_v14 = vpop.f32.mrb[2].mxu1 }
 0x1e3   : > { %v928_v16 = vmul.f32 0.2, %v904_v53  ;;  %v907_v25 = vadd.f32 %v5030_v14, %v5768_v35  ;;  %v898_v36 = vpop.f32.mrb[3].mxu1 }
 0x1e4   : > { %v926_v29 = vmul.f32 0.2, %v896_v21  ;;  %v899_v44 = vadd.f32 %v898_v36, %v5758_v31 }
 0x1e5   : > { %v936_v47 = vmax.f32 %v904_v53, %v928_v16  ;;  %v929_v38 = vmul.f32 0.2, %v907_v25 }
 0x1e6   : > { %v934_v9 = vmax.f32 %v896_v21, %v926_v29  ;;  %v927_v59 = vmul.f32 0.2, %v899_v44 }
 0x1e7   : > { %945 = vst.msk [vmem:[%s6191_s18 + $0x10] sm:$0xff] %vm942_vm4, %v936_v47  ;;  %v937_v35 = vmax.f32 %v907_v25, %v929_v38 }
 0x1e8   : > { %943 = vst.msk [vmem:[%s6191_s18] sm:$0xff] %vm942_vm4, %v934_v9  ;;  %v935_v14 = vmax.f32 %v899_v44, %v927_v59  ;;  %v5033_v17 = vpop.f32.mrb[4].mxu1  ;;  %v5308_v59 = vld [vmem:[%s8197_s7] sm:$0xff]  }
 0x1e9   : > { %946 = vst.msk [vmem:[%s6191_s18 + $0x18] sm:$0xff] %vm942_vm4, %v937_v35  ;;  %v920_v50 = vadd.f32 %v5033_v17, %v5818_v54  ;;  %v911_v60 = vpop.f32.mrb[5].mxu1  ;;  %v952_v18 = vpack.c.bf16 %v937_v35, %v936_v47  ;;  %5059 = vmatprep.mubr.msk.bf16.mxu1 %vm848_vm3, %v5308_v59 }
 0x1ea   : > { %944 = vst.msk [vmem:[%s6191_s18 + $0x8] sm:$0xff] %vm942_vm4, %v935_v14  ;;  %v912_v31 = vadd.f32 %v911_v60, %v5802_v48  ;;  %v5034_v36 = vpop.f32.mrb[6].mxu1  ;;  %v951_v16 = vpack.c.bf16 %v935_v14, %v934_v9  ;;  %v5306_v9 = vld [vmem:[%s8195_s5 + $0x10] sm:$0xff]  }
 0x1eb   : > { %v932_v53 = vmul.f32 0.2, %v920_v50  ;;  %v923_v25 = vadd.f32 %v5034_v36, %v5794_v45  ;;  %v914_v21 = vpop.f32.mrb[7].mxu1 }
 0x1ec   : > { %v930_v29 = vmul.f32 0.2, %v912_v31  ;;  %v915_v44 = vadd.f32 %v914_v21, %v5784_v41  ;;  %5035 = vmatprep.subr.bf16.mxu0 %v951_v16 }
 0x1ed   : > { %v940_v54 = vmax.f32 %v920_v50, %v932_v53  ;;  %v933_v17 = vmul.f32 0.2, %v923_v25  ;;  %5036 = vmatpush3.bf16.msra.mxu0 %v951_v16  ;;  %v5305_v50 = vld [vmem:[%s8195_s5 + $0x8] sm:$0xff]  }
 0x1ee   : > { %v938_v47 = vmax.f32 %v912_v31, %v930_v29  ;;  %v931_v38 = vmul.f32 0.2, %v915_v44  ;;  %5037 = vmatprep.subr.bf16.mxu0 %v952_v18 }
 0x1ef   : > { %949 = vst.msk [vmem:[%s6191_s18 + $0x30] sm:$0xff] %vm942_vm4, %v940_v54  ;;  %v941_v48 = vmax.f32 %v923_v25, %v933_v17 }
 0x1f0   : > { %947 = vst.msk [vmem:[%s6191_s18 + $0x20] sm:$0xff] %vm942_vm4, %v938_v47  ;;  %v939_v60 = vmax.f32 %v915_v44, %v931_v38 }
 0x1f1   : > { %950 = vst.msk [vmem:[%s6191_s18 + $0x38] sm:$0xff] %vm942_vm4, %v941_v48  ;;  %5038 = vmatpush3.bf16.msra.mxu0 %v952_v18  ;;  %v954_v45 = vpack.c.bf16 %v941_v48, %v940_v54  ;;  %v5307_v18 = vld [vmem:[%s8195_s5 + $0x18] sm:$0xff]  }
 0x1f2   : > { %948 = vst.msk [vmem:[%s6191_s18 + $0x28] sm:$0xff] %vm942_vm4, %v939_v60  ;;  %v953_v41 = vpack.c.bf16 %v939_v60, %v938_v47 }
 0x1f4   : > { %5039 = vmatprep.subr.bf16.mxu0 %v953_v41 }
 0x1f5   : > { %5040 = vmatpush3.bf16.msra.mxu0 %v953_v41 }
 0x1f6   : > { %5041 = vmatprep.subr.bf16.mxu0 %v954_v45 }
 0x1f9   : > { %5042 = vmatpush3.bf16.msra.mxu0 %v954_v45 }
 0x1fc   : > { %5044 = vmatmul.mubr.msk.bf16.vlgmr.msra.gmra.mrb[8].mxu0 %vm848_vm3, %v5305_v50 }
 0x1fd   : > { %5047 = vmatprep.mubr.msk.bf16.mxu0 %vm848_vm3, %v5306_v9 }
 0x204   : > { %5048 = vmatmul.mubr.msk.bf16.gmra.mrb[12].mxu0 %vm848_vm3, %v5307_v18 }
 0x2cf   : > { %v5045_v35 = vpop.f32.mrb[8].mxu0 }
 0x2d0   : > { %v1086_v14 = vadd.f32 %v5045_v35, %v5844_v0  ;;  %v1077_v31 = vpop.f32.mrb[9].mxu0 }
 0x2d1   : > { %v1078_v36 = vadd.f32 %v1077_v31, %v5828_v58  ;;  %v5046_v16 = vpop.f32.mrb[10].mxu0 }
 0x2d2   : > { %v1110_v53 = vmul.f32 0.2, %v1086_v14  ;;  %v1089_v25 = vadd.f32 %v5046_v16, %v5820_v55  ;;  %v1080_v21 = vpop.f32.mrb[11].mxu0 }
 0x2d3   : > { %v1108_v29 = vmul.f32 0.2, %v1078_v36  ;;  %v1081_v44 = vadd.f32 %v1080_v21, %v5810_v51 }
 0x2d4   : > { %v1111_v54 = vmul.f32 0.2, %v1089_v25  ;;  %v1118_v47 = vmax.f32 %v1086_v14, %v1110_v53 }
 0x2d5   : > { %v1109_v17 = vmul.f32 0.2, %v1081_v44  ;;  %v1116_v48 = vmax.f32 %v1078_v36, %v1108_v29  ;;  %v5311_v29 = vld [vmem:[%s8197_s7 + $0x18] sm:$0xff]  }
 0x2d6   : > { %v1119_v38 = vmax.f32 %v1089_v25, %v1111_v54  ;;  %v5313_v54 = vld [vmem:[%s8197_s7 + $0x28] sm:$0xff]  }
 0x2d7   : > { %v1117_v60 = vmax.f32 %v1081_v44, %v1109_v17  ;;  %v5049_v45 = vpop.f32.mrb[12].mxu0  ;;  %v5312_v44 = vld [vmem:[%s8197_s7 + $0x20] sm:$0xff]   ;;  %v5314_v17 = vld [vmem:[%s8197_s7 + $0x30] sm:$0xff]  }
 0x2d8   : > { %v1102_v0 = vadd.f32 %v5049_v45, %v5870_v10  ;;  %v1093_v41 = vpop.f32.mrb[13].mxu0  ;;  %v1125_v50 = vpack.c.bf16 %v1119_v38, %v1118_v47  ;;  %v5315_v47 = vld [vmem:[%s8197_s7 + $0x38] sm:$0xff]   ;;  %v5316_v38 = vld [vmem:[%s8199_s9] sm:$0xff]  }
 0x2d9   : > { %v1094_v58 = vadd.f32 %v1093_v41, %v5854_v4  ;;  %v5050_v9 = vpop.f32.mrb[14].mxu0  ;;  %v1124_v18 = vpack.c.bf16 %v1117_v60, %v1116_v48  ;;  %v5317_v48 = vld [vmem:[%s8199_s9 + $0x80] sm:$0xff]   ;;  %5091 = vmatprep.mubr.bf16.mxu0 %v5316_v38 }
 0x2da   : > { %v1114_v55 = vmul.f32 0.2, %v1102_v0  ;;  %v1105_v59 = vadd.f32 %v5050_v9, %v5846_v1  ;;  %v1096_v35 = vpop.f32.mrb[15].mxu0  ;;  %v5309_v1 = vld [vmem:[%s8197_s7 + $0x8] sm:$0xff]  }
 0x2db   : > { %v1112_v51 = vmul.f32 0.2, %v1094_v58  ;;  %v1097_v31 = vadd.f32 %v1096_v35, %v5836_v61  ;;  %5051 = vmatprep.subr.bf16.mxu1 %v1124_v18  ;;  %v5310_v61 = vld [vmem:[%s8197_s7 + $0x10] sm:$0xff]  }
 0x2dc   : > { %v1115_v14 = vmul.f32 0.2, %v1105_v59  ;;  %5052 = vmatpush3.bf16.msra.mxu1 %v1124_v18  ;;  %v1122_v16 = vmax.f32 %v1102_v0, %v1114_v55 }
 0x2dd   : > { %v1113_v36 = vmul.f32 0.2, %v1097_v31  ;;  %5053 = vmatprep.subr.bf16.mxu1 %v1125_v50  ;;  %v1120_v53 = vmax.f32 %v1094_v58, %v1112_v51 }
 0x2de   : > { %v1123_v10 = vmax.f32 %v1105_v59, %v1115_v14 }
 0x2df   : > { %v1121_v25 = vmax.f32 %v1097_v31, %v1113_v36 }
 0x2e0   : > { %5054 = vmatpush3.bf16.msra.mxu1 %v1125_v50  ;;  %v1127_v4 = vpack.c.bf16 %v1123_v10, %v1122_v16 }
 0x2e1   : > { %v1126_v21 = vpack.c.bf16 %v1121_v25, %v1120_v53 }
 0x2e3   : > { %5055 = vmatprep.subr.bf16.mxu1 %v1126_v21 }
 0x2e4   : > { %5056 = vmatpush3.bf16.msra.mxu1 %v1126_v21 }
 0x2e5   : > { %5057 = vmatprep.subr.bf16.mxu1 %v1127_v4 }
 0x2e8   : > { %5058 = vmatpush3.bf16.msra.mxu1 %v1127_v4 }
 0x2eb   : > { %5060 = vmatmul.mubr.msk.bf16.vlgmr.msra.gmra.mrb[8].mxu1 %vm848_vm3, %v5309_v1 }
 0x2ec   : > { %5063 = vmatprep.mubr.msk.bf16.mxu1 %vm848_vm3, %v5310_v61 }
 0x2f3   : > { %5064 = vmatmul.mubr.msk.bf16.gmra.mrb[12].mxu1 %vm848_vm3, %v5311_v29 }
 0x2f4   : > { %5067 = vmatprep.mubr.msk.bf16.mxu1 %vm848_vm3, %v5312_v44 }
 0x2fb   : > { %5068 = vmatmul.mubr.msk.bf16.gmra.mrb[16].mxu1 %vm848_vm3, %v5313_v54 }
 0x2fc   : > { %5071 = vmatprep.mubr.msk.bf16.mxu1 %vm848_vm3, %v5314_v17 }
 0x303   : > { %5072 = vmatmul.mubr.msk.bf16.gmra.mrb[20].mxu1 %vm848_vm3, %v5315_v47 }
 0x304   : > { %5139 = vmatprep.mubr.bf16.mxu1 %v5317_v48 }
 0x3be   : > { %v5061_v60 = vpop.f32.mrb[8].mxu1 }
 0x3bf   : > { %v1347_v45 = vadd.f32 %v5061_v60, %v5896_v26  ;;  %v1338_v0 = vpop.f32.mrb[9].mxu1 }
 0x3c0   : > { %v1339_v41 = vadd.f32 %v1338_v0, %v5880_v15  ;;  %v5062_v50 = vpop.f32.mrb[10].mxu1 }
 0x3c1   : > { %v1403_v58 = vmul.f32 0.2, %v1347_v45  ;;  %v1350_v9 = vadd.f32 %v5062_v50, %v5872_v11  ;;  %v1341_v18 = vpop.f32.mrb[11].mxu1 }
 0x3c2   : > { %v1401_v55 = vmul.f32 0.2, %v1339_v41  ;;  %v1342_v59 = vadd.f32 %v1341_v18, %v5862_v7 }
 0x3c3   : > { %v1404_v35 = vmul.f32 0.2, %v1350_v9  ;;  %v1419_v31 = vmax.f32 %v1347_v45, %v1403_v58 }
 0x3c4   : > { %v1402_v51 = vmul.f32 0.2, %v1342_v59  ;;  %v1417_v36 = vmax.f32 %v1339_v41, %v1401_v55 }
 0x3c5   : > { %v1420_v14 = vmax.f32 %v1350_v9, %v1404_v35 }
 0x3c6   : > { %v1418_v16 = vmax.f32 %v1342_v59, %v1402_v51  ;;  %v5065_v10 = vpop.f32.mrb[12].mxu1 }
 0x3c7   : > { %v6276_v53 = vpack.c.bf16 %v1420_v14, %v1419_v31  ;;  %v1363_v26 = vadd.f32 %v5065_v10, %v5922_v42  ;;  %v1354_v15 = vpop.f32.mrb[13].mxu1 }
 0x3c8   : > { %v6279_v25 = vpack.c.bf16 %v1418_v16, %v1417_v36  ;;  %v1355_v11 = vadd.f32 %v1354_v15, %v5906_v32  ;;  %v5066_v4 = vpop.f32.mrb[14].mxu1 }
 0x3c9   : > { %v1407_v21 = vmul.f32 0.2, %v1363_v26  ;;  %v1366_v7 = vadd.f32 %v5066_v4, %v5898_v27  ;;  %v1357_v1 = vpop.f32.mrb[15].mxu1 }
 0x3ca   : > { %v1405_v61 = vmul.f32 0.2, %v1355_v11  ;;  %v1358_v29 = vadd.f32 %v1357_v1, %v5888_v20  ;;  %5075 = vmatprep.subr.bf16.mxu0 %v6279_v25  ;;  %5123 = vmatprep.subr.bf16.mxu1 %v6279_v25 }
 0x3cb   : > { %v1408_v44 = vmul.f32 0.2, %v1366_v7  ;;  %5076 = vmatpush3.bf16.msra.mxu0 %v6279_v25  ;;  %5124 = vmatpush3.bf16.msra.mxu1 %v6279_v25  ;;  %v1423_v32 = vmax.f32 %v1363_v26, %v1407_v21 }
 0x3cc   : > { %v1406_v42 = vmul.f32 0.2, %v1358_v29  ;;  %5077 = vmatprep.subr.bf16.mxu0 %v6276_v53  ;;  %5125 = vmatprep.subr.bf16.mxu1 %v6276_v53  ;;  %v1421_v54 = vmax.f32 %v1355_v11, %v1405_v61 }
 0x3cd   : > { %v1424_v27 = vmax.f32 %v1366_v7, %v1408_v44  ;;  %v5318_v44 = vld [vmem:[%s8199_s9 + $0x8] sm:$0xff]  }
 0x3ce   : > { %v1422_v17 = vmax.f32 %v1358_v29, %v1406_v42  ;;  %v5069_v47 = vpop.f32.mrb[16].mxu1  ;;  %v5319_v42 = vld [vmem:[%s8199_s9 + $0x88] sm:$0xff]  }
 0x3cf   : > { %v6290_v20 = vpack.c.bf16 %v1424_v27, %v1423_v32  ;;  %v1379_v38 = vadd.f32 %v5069_v47, %v5954_v33  ;;  %v1370_v48 = vpop.f32.mrb[17].mxu1  ;;  %5078 = vmatpush3.bf16.msra.mxu0 %v6276_v53  ;;  %5126 = vmatpush3.bf16.msra.mxu1 %v6276_v53  ;;  %v5320_v32 = vld [vmem:[%s8199_s9 + $0x10] sm:$0xff]   ;;  %v5325_v47 = vld [vmem:[%s8199_s9 + $0xa0] sm:$0xff]  }
 0x3d0   : > { %v6295_v60 = vpack.c.bf16 %v1422_v17, %v1421_v54  ;;  %v1371_v45 = vadd.f32 %v1370_v48, %v5935_v62  ;;  %v5070_v0 = vpop.f32.mrb[18].mxu1  ;;  %v5321_v27 = vld [vmem:[%s8199_s9 + $0x90] sm:$0xff]   ;;  %v5322_v54 = vld [vmem:[%s8199_s9 + $0x18] sm:$0xff]  }
 0x3d1   : > { %v1411_v41 = vmul.f32 0.2, %v1379_v38  ;;  %v1382_v50 = vadd.f32 %v5070_v0, %v5924_v43  ;;  %v1373_v58 = vpop.f32.mrb[19].mxu1  ;;  %v5323_v17 = vld [vmem:[%s8199_s9 + $0x98] sm:$0xff]   ;;  %v5328_v48 = vld [vmem:[%s8199_s9 + $0x30] sm:$0xff]   ;;  %v5332_v0 = vld [vmem:[%s8199_s9 + $0x40] sm:$0xff]  }
 0x3d2   : > { %v1409_v9 = vmul.f32 0.2, %v1371_v45  ;;  %v1374_v18 = vadd.f32 %v1373_v58, %v5914_v37  ;;  %5079 = vmatprep.subr.bf16.mxu0 %v6295_v60  ;;  %5127 = vmatprep.subr.bf16.mxu1 %v6295_v60  ;;  %v5335_v58 = vld [vmem:[%s8199_s9 + $0xc8] sm:$0xff]  }
 0x3d3   : > { %v1412_v33 = vmul.f32 0.2, %v1382_v50  ;;  %5080 = vmatpush3.bf16.msra.mxu0 %v6295_v60  ;;  %5128 = vmatpush3.bf16.msra.mxu1 %v6295_v60  ;;  %v1427_v62 = vmax.f32 %v1379_v38, %v1411_v41  ;;  %v5327_v38 = vld [vmem:[%s8199_s9 + $0xa8] sm:$0xff]   ;;  %v5333_v41 = vld [vmem:[%s8199_s9 + $0xc0] sm:$0xff]  }
 0x3d4   : > { %v1410_v55 = vmul.f32 0.2, %v1374_v18  ;;  %5081 = vmatprep.subr.bf16.mxu0 %v6290_v20  ;;  %5129 = vmatprep.subr.bf16.mxu1 %v6290_v20  ;;  %v1425_v59 = vmax.f32 %v1371_v45, %v1409_v9  ;;  %v5331_v45 = vld [vmem:[%s8199_s9 + $0xb8] sm:$0xff]   ;;  %v5336_v9 = vld [vmem:[%s8199_s9 + $0x50] sm:$0xff]  }
 0x3d5   : > { %v1428_v43 = vmax.f32 %v1382_v50, %v1412_v33  ;;  %v5334_v50 = vld [vmem:[%s8199_s9 + $0x48] sm:$0xff]   ;;  %v6428_v33 = vpop.permute.xlu0 %1627 }
 0x3d6   : > { %v1426_v35 = vmax.f32 %v1374_v18, %v1410_v55  ;;  %v5073_v51 = vpop.f32.mrb[20].mxu1  ;;  %v5337_v18 = vld [vmem:[%s8199_s9 + $0xd0] sm:$0xff]   ;;  %v5338_v55 = vld [vmem:[%s8199_s9 + $0x58] sm:$0xff]  }
 0x3d7   : > { %v6306_v37 = vpack.c.bf16 %v1428_v43, %v1427_v62  ;;  %v1395_v31 = vadd.f32 %v5073_v51, %v5982_v6  ;;  %v1386_v14 = vpop.f32.mrb[21].mxu1  ;;  %5082 = vmatpush3.bf16.msra.mxu0 %v6290_v20  ;;  %5130 = vmatpush3.bf16.msra.mxu1 %v6290_v20  ;;  %v5339_v62 = vld [vmem:[%s8199_s9 + $0xd8] sm:$0xff]   ;;  %v5340_v43 = vld [vmem:[%s8199_s9 + $0x60] sm:$0xff]   ;;  %v6444_v51 = vpop.permute.xlu1 %2260 }
 0x3d8   : > { %v6311_v36 = vpack.c.bf16 %v1426_v35, %v1425_v59  ;;  %v1387_v16 = vadd.f32 %v1386_v14, %v5972_v63  ;;  %v5074_v10 = vpop.f32.mrb[22].mxu1  ;;  %v5341_v59 = vld [vmem:[%s8199_s9 + $0xe0] sm:$0xff]   ;;  %v5344_v14 = vld [vmem:[%s8199_s9 + $0x70] sm:$0xff]  }
 0x3d9   : > { %v1415_v26 = vmul.f32 0.2, %v1395_v31  ;;  %v1398_v15 = vadd.f32 %v5074_v10, %v5957_v34  ;;  %v1389_v11 = vpop.f32.mrb[23].mxu1  ;;  %v6442_v35 = vpop.permute.xlu0 %1637 }
 0x3da   : > { %v1413_v4 = vmul.f32 0.2, %v1387_v16  ;;  %v1390_v21 = vadd.f32 %v1389_v11, %v5944_v5  ;;  %5083 = vmatprep.subr.bf16.mxu0 %v6311_v36  ;;  %5131 = vmatprep.subr.bf16.mxu1 %v6311_v36  ;;  %v5348_v11 = vld [vmem:[%s8199_s9 + $0x100] sm:$0xff]  }
 0x3db   : > { %v1416_v6 = vmul.f32 0.2, %v1398_v15  ;;  %5084 = vmatpush3.bf16.msra.mxu0 %v6311_v36  ;;  %5132 = vmatpush3.bf16.msra.mxu1 %v6311_v36  ;;  %v1431_v63 = vmax.f32 %v1395_v31, %v1415_v26  ;;  %v5343_v31 = vld [vmem:[%s8199_s9 + $0xe8] sm:$0xff]   ;;  %v6460_v10 = vpop.permute.xlu1 %2270  ;;  %v5346_v26 = vld [vmem:[%s8199_s9 + $0x78] sm:$0xff]  }
 0x3dc   : > { %v1414_v7 = vmul.f32 0.2, %v1390_v21  ;;  %5085 = vmatprep.subr.bf16.mxu0 %v6306_v37  ;;  %5133 = vmatprep.subr.bf16.mxu1 %v6306_v37  ;;  %v1429_v1 = vmax.f32 %v1387_v16, %v1413_v4  ;;  %v5349_v4 = vld [vmem:[%s8199_s9 + $0x180] sm:$0xff]  }
 0x3dd   : > { %v1432_v34 = vmax.f32 %v1398_v15, %v1416_v6  ;;  %v6458_v16 = vpop.permute.xlu0 %1647  ;;  %v5347_v15 = vld [vmem:[%s8199_s9 + $0xf8] sm:$0xff]  }
 0x3de   : > { %v1430_v61 = vmax.f32 %v1390_v21, %v1414_v7  ;;  %8216 = vst [vmem:[#allocation15_spill] sm:$0xff] %v6458_v16 }
 0x3df   : > { %v6322_v29 = vpack.c.bf16 %v1432_v34, %v1431_v63  ;;  %5086 = vmatpush3.bf16.msra.mxu0 %v6306_v37  ;;  %5134 = vmatpush3.bf16.msra.mxu1 %v6306_v37  ;;  %v6476_v6 = vpop.permute.xlu1 %2280  ;;  %v5350_v34 = vld [vmem:[%s8199_s9 + $0x108] sm:$0xff]  }
 0x3e0   : > { %v6326_v5 = vpack.c.bf16 %v1430_v61, %v1429_v1  ;;  %v5351_v1 = vld [vmem:[%s8199_s9 + $0x188] sm:$0xff]   ;;  %v5352_v61 = vld [vmem:[%s8199_s9 + $0x110] sm:$0xff]  }
 0x3e1   : > { %v6474_v21 = vpop.permute.xlu0 %1657 }
 0x3e2   : > { %5087 = vmatprep.subr.bf16.mxu0 %v6326_v5  ;;  %5135 = vmatprep.subr.bf16.mxu1 %v6326_v5  ;;  %8217 = vst [vmem:[#allocation16_spill] sm:$0xff] %v6474_v21 }
 0x3e3   : > { %5088 = vmatpush3.bf16.msra.mxu0 %v6326_v5  ;;  %5136 = vmatpush3.bf16.msra.mxu1 %v6326_v5  ;;  %v6480_v63 = vpop.permute.xlu1 %2290 }
 0x3e4   : > { %5089 = vmatprep.subr.bf16.mxu0 %v6322_v29  ;;  %5137 = vmatprep.subr.bf16.mxu1 %v6322_v29 }
 0x3e5   : > { %v6478_v7 = vpop.permute.xlu0 %2250 }
 0x3e7   : > { %5090 = vmatpush3.bf16.msra.mxu0 %v6322_v29  ;;  %5138 = vmatpush3.bf16.msra.mxu1 %v6322_v29 }
 0x3e8   : > { %5171 = vmatprep.subr.bf16.mxu0 %v6279_v25  ;;  %5219 = vmatprep.subr.bf16.mxu1 %v6279_v25 }
 0x3ea   : > { %5092 = vmatmul.mubr.bf16.vlgmr.msra.gmra.mrb[16].mxu0 %v5318_v44  ;;  %5140 = vmatmul.mubr.bf16.vlgmr.msra.gmra.mrb[24].mxu1 %v5319_v42  ;;  %v6496_v44 = vpop.permute.xlu1 %2300  ;;  %v5354_v42 = vld [vmem:[%s8199_s9 + $0x118] sm:$0xff]  }
 0x3eb   : > { %5172 = vmatpush3.bf16.msra.mxu0 %v6279_v25  ;;  %5220 = vmatpush3.bf16.msra.mxu1 %v6279_v25  ;;  %v5324_v25 = vld [vmem:[%s8199_s9 + $0x20] sm:$0xff]  }
 0x3ec   : > { %5173 = vmatprep.subr.bf16.mxu0 %v6276_v53  ;;  %5221 = vmatprep.subr.bf16.mxu1 %v6276_v53 }
 0x3ed   : > { %5095 = vmatprep.mubr.bf16.mxu0 %v5320_v32  ;;  %5143 = vmatprep.mubr.bf16.mxu1 %v5321_v27  ;;  %v5355_v32 = vld [vmem:[%s8199_s9 + $0x198] sm:$0xff]   ;;  %v5356_v27 = vld [vmem:[%s8199_s9 + $0x120] sm:$0xff]  }
 0x3ef   : > { %5174 = vmatpush3.bf16.msra.mxu0 %v6276_v53  ;;  %5222 = vmatpush3.bf16.msra.mxu1 %v6276_v53  ;;  %v5326_v53 = vld [vmem:[%s8199_s9 + $0x28] sm:$0xff]  }
 0x3f0   : > { %5175 = vmatprep.subr.bf16.mxu0 %v6295_v60  ;;  %5223 = vmatprep.subr.bf16.mxu1 %v6295_v60 }
 0x3f2   : > { %5096 = vmatmul.mubr.bf16.gmra.mrb[20].mxu0 %v5322_v54  ;;  %5144 = vmatmul.mubr.bf16.gmra.mrb[28].mxu1 %v5323_v17  ;;  %v5357_v54 = vld [vmem:[%s8199_s9 + $0x1a0] sm:$0xff]  }
 0x3f3   : > { %5176 = vmatpush3.bf16.msra.mxu0 %v6295_v60  ;;  %5224 = vmatpush3.bf16.msra.mxu1 %v6295_v60  ;;  %v5329_v60 = vld [vmem:[%s8199_s9 + $0xb0] sm:$0xff]  }
 0x3f4   : > { %5177 = vmatprep.subr.bf16.mxu0 %v6290_v20  ;;  %5225 = vmatprep.subr.bf16.mxu1 %v6290_v20 }
 0x3f5   : > { %5099 = vmatprep.mubr.bf16.mxu0 %v5324_v25  ;;  %5147 = vmatprep.mubr.bf16.mxu1 %v5325_v47  ;;  %v6512_v25 = vpop.permute.xlu1 %2310  ;;  %v5358_v47 = vld [vmem:[%s8199_s9 + $0x128] sm:$0xff]  }
 0x3f7   : > { %5178 = vmatpush3.bf16.msra.mxu0 %v6290_v20  ;;  %5226 = vmatpush3.bf16.msra.mxu1 %v6290_v20  ;;  %v5330_v20 = vld [vmem:[%s8199_s9 + $0x38] sm:$0xff]  }
 0x3f8   : > { %5179 = vmatprep.subr.bf16.mxu0 %v6311_v36  ;;  %5227 = vmatprep.subr.bf16.mxu1 %v6311_v36 }
 0x3fa   : > { %5100 = vmatmul.mubr.bf16.gmra.mrb[24].mxu0 %v5326_v53  ;;  %5148 = vmatmul.mubr.bf16.gmra.mrb[32].mxu1 %v5327_v38  ;;  %v5359_v53 = vld [vmem:[%s8199_s9 + $0x1a8] sm:$0xff]   ;;  %v5360_v38 = vld [vmem:[%s8199_s9 + $0x130] sm:$0xff]  }
 0x3fb   : > { %5180 = vmatpush3.bf16.msra.mxu0 %v6311_v36  ;;  %5228 = vmatpush3.bf16.msra.mxu1 %v6311_v36  ;;  %v5345_v36 = vld [vmem:[%s8199_s9 + $0xf0] sm:$0xff]  }
 0x3fc   : > { %5181 = vmatprep.subr.bf16.mxu0 %v6306_v37  ;;  %5229 = vmatprep.subr.bf16.mxu1 %v6306_v37 }
 0x3fd   : > { %5103 = vmatprep.mubr.bf16.mxu0 %v5328_v48  ;;  %5151 = vmatprep.mubr.bf16.mxu1 %v5329_v60  ;;  %v5361_v48 = vld [vmem:[%s8199_s9 + $0x1b0] sm:$0xff]  }
 0x3ff   : > { %5182 = vmatpush3.bf16.msra.mxu0 %v6306_v37  ;;  %5230 = vmatpush3.bf16.msra.mxu1 %v6306_v37  ;;  %v5342_v37 = vld [vmem:[%s8199_s9 + $0x68] sm:$0xff]  }
 0x400   : > { %5183 = vmatprep.subr.bf16.mxu0 %v6326_v5  ;;  %5231 = vmatprep.subr.bf16.mxu1 %v6326_v5 }
 0x402   : > { %5104 = vmatmul.mubr.bf16.gmra.mrb[28].mxu0 %v5330_v20  ;;  %5152 = vmatmul.mubr.bf16.gmra.mrb[36].mxu1 %v5331_v45  ;;  %v6528_v20 = vpop.permute.xlu1 %2320 }
 0x403   : > { %5184 = vmatpush3.bf16.msra.mxu0 %v6326_v5  ;;  %5232 = vmatpush3.bf16.msra.mxu1 %v6326_v5  ;;  %v6494_v5 = vpop.permute.xlu0 %2265 }
 0x404   : > { %5185 = vmatprep.subr.bf16.mxu0 %v6322_v29  ;;  %5233 = vmatprep.subr.bf16.mxu1 %v6322_v29 }
 0x405   : > { %5107 = vmatprep.mubr.bf16.mxu0 %v5332_v0  ;;  %5155 = vmatprep.mubr.bf16.mxu1 %v5333_v41  ;;  %v5362_v41 = vld [vmem:[%s8199_s9 + $0x138] sm:$0xff]  }
 0x406   : > { %v6532_v0 = vpop.permute.xlu1 %2330 }
 0x407   : > { %5186 = vmatpush3.bf16.msra.mxu0 %v6322_v29  ;;  %5234 = vmatpush3.bf16.msra.mxu1 %v6322_v29  ;;  %v5353_v29 = vld [vmem:[%s8199_s9 + $0x190] sm:$0xff]   ;;  %v6510_v17 = vpop.permute.xlu0 %2275 }
 0x40a   : > { %5108 = vmatmul.mubr.bf16.gmra.mrb[32].mxu0 %v5334_v50  ;;  %5156 = vmatmul.mubr.bf16.gmra.mrb[40].mxu1 %v5335_v58  ;;  %v5363_v50 = vld [vmem:[%s8199_s9 + $0x1b8] sm:$0xff]   ;;  %v5364_v58 = vld [vmem:[%s8199_s9 + $0x140] sm:$0xff]  }
 0x40b   : > { %5111 = vmatprep.mubr.bf16.mxu0 %v5336_v9  ;;  %5159 = vmatprep.mubr.bf16.mxu1 %v5337_v18  ;;  %v6526_v60 = vpop.permute.xlu0 %2285  ;;  %v5365_v9 = vld [vmem:[%s8199_s9 + $0x1c0] sm:$0xff]  }
 0x40f   : > { %v6530_v45 = vpop.permute.xlu0 %2295 }
 0x412   : > { %5112 = vmatmul.mubr.bf16.gmra.mrb[36].mxu0 %v5338_v55  ;;  %5160 = vmatmul.mubr.bf16.gmra.mrb[44].mxu1 %v5339_v62  ;;  %v6548_v55 = vpop.permute.xlu1 %2340  ;;  %v5366_v62 = vld [vmem:[%s8199_s9 + $0x148] sm:$0xff]  }
 0x413   : > { %5115 = vmatprep.mubr.bf16.mxu0 %v5340_v43  ;;  %5163 = vmatprep.mubr.bf16.mxu1 %v5341_v59  ;;  %v6546_v18 = vpop.permute.xlu0 %2305  ;;  %v5367_v43 = vld [vmem:[%s8199_s9 + $0x1c8] sm:$0xff]   ;;  %v5368_v59 = vld [vmem:[%s8199_s9 + $0x150] sm:$0xff]  }
 0x41a   : > { %5116 = vmatmul.mubr.bf16.gmra.mrb[40].mxu0 %v5342_v37  ;;  %5164 = vmatmul.mubr.bf16.gmra.mrb[48].mxu1 %v5343_v31  ;;  %v5369_v37 = vld [vmem:[%s8199_s9 + $0x1d0] sm:$0xff]   ;;  %v6562_v31 = vpop.permute.xlu0 %2315 }
 0x41b   : > { %5119 = vmatprep.mubr.bf16.mxu0 %v5344_v14  ;;  %5167 = vmatprep.mubr.bf16.mxu1 %v5345_v36  ;;  %v6564_v14 = vpop.permute.xlu1 %2350  ;;  %v5370_v36 = vld [vmem:[%s8199_s9 + $0x158] sm:$0xff]  }
 0x422   : > { %5120 = vmatmul.mubr.bf16.gmra.mrb[44].mxu0 %v5346_v26  ;;  %5168 = vmatmul.mubr.bf16.gmra.mrb[52].mxu1 %v5347_v15  ;;  %v5371_v26 = vld [vmem:[%s8199_s9 + $0x1d8] sm:$0xff]   ;;  %v5372_v15 = vld [vmem:[%s8199_s9 + $0x160] sm:$0xff]  }
 0x423   : > { %5187 = vmatprep.mubr.bf16.mxu0 %v5348_v11  ;;  %5235 = vmatprep.mubr.bf16.mxu1 %v5349_v4  ;;  %v5373_v11 = vld [vmem:[%s8199_s9 + $0x1e0] sm:$0xff]   ;;  %v6578_v4 = vpop.permute.xlu0 %2325 }
 0x42a   : > { %5188 = vmatmul.mubr.bf16.vlgmr.msra.gmra.mrb[48].mxu0 %v5350_v34  ;;  %5236 = vmatmul.mubr.bf16.vlgmr.msra.gmra.mrb[56].mxu1 %v5351_v1  ;;  %v6580_v34 = vpop.permute.xlu1 %2360  ;;  %v6582_v1 = vpop.permute.xlu0 %2335 }
 0x42b   : > { %5191 = vmatprep.mubr.bf16.mxu0 %v5352_v61  ;;  %5239 = vmatprep.mubr.bf16.mxu1 %v5353_v29  ;;  %v5374_v29 = vld [vmem:[%s8199_s9 + $0x168] sm:$0xff]  }
 0x42e   : > { %v6584_v61 = vpop.permute.xlu1 %2370 }
 0x42f   : > { %8218 = vst [vmem:[#allocation17_spill] sm:$0xff] %v6584_v61 }
 0x432   : > { %5192 = vmatmul.mubr.bf16.gmra.mrb[52].mxu0 %v5354_v42  ;;  %5240 = vmatmul.mubr.bf16.gmra.mrb[60].mxu1 %v5355_v32  ;;  %v5375_v42 = vld [vmem:[%s8199_s9 + $0x1e8] sm:$0xff]   ;;  %v5376_v32 = vld [vmem:[%s8199_s9 + $0x170] sm:$0xff]  }
 0x433   : > { %5195 = vmatprep.mubr.bf16.mxu0 %v5356_v27  ;;  %5243 = vmatprep.mubr.bf16.mxu1 %v5357_v54  ;;  %v5377_v27 = vld [vmem:[%s8199_s9 + $0x1f0] sm:$0xff]   ;;  %v6598_v54 = vpop.permute.xlu0 %2345 }
 0x43a   : > { %5196 = vmatmul.mubr.bf16.gmra.mrb[56].mxu0 %v5358_v47  ;;  %5244 = vmatmul.mubr.bf16.gmra.mrb[64].mxu1 %v5359_v53  ;;  %v6600_v47 = vpop.permute.xlu1 %2380  ;;  %v5378_v53 = vld [vmem:[%s8199_s9 + $0x178] sm:$0xff]  }
 0x43b   : > { %5199 = vmatprep.mubr.bf16.mxu0 %v5360_v38  ;;  %5247 = vmatprep.mubr.bf16.mxu1 %v5361_v48  ;;  %8219 = vst [vmem:[#allocation18_spill] sm:$0xff] %v6600_v47  ;;  %v5379_v38 = vld [vmem:[%s8199_s9 + $0x1f8] sm:$0xff]   ;;  %v6608_v48 = vpop.permute.xlu0 %2355 }
 0x442   : > { %5200 = vmatmul.mubr.bf16.gmra.mrb[60].mxu0 %v5362_v41  ;;  %5248 = vmatmul.mubr.bf16.gmra.mrb[68].mxu1 %v5363_v50  ;;  %v6610_v41 = vpop.permute.xlu1 %2390  ;;  %v6612_v50 = vpop.permute.xlu0 %2365 }
 0x443   : > { %5203 = vmatprep.mubr.bf16.mxu0 %v5364_v58  ;;  %5251 = vmatprep.mubr.bf16.mxu1 %v5365_v9  ;;  %8220 = vst [vmem:[#allocation19_spill] sm:$0xff] %v6610_v41 }
 0x446   : > { %v6614_v58 = vpop.permute.xlu1 %2400  ;;  %v6616_v9 = vpop.permute.xlu0 %2375 }
 0x447   : > { %8221 = vst [vmem:[#allocation20_spill] sm:$0xff] %v6614_v58 }
 0x44a   : > { %5204 = vmatmul.mubr.bf16.gmra.mrb[64].mxu0 %v5366_v62  ;;  %5252 = vmatmul.mubr.bf16.gmra.mrb[72].mxu1 %v5367_v43  ;;  %v6618_v62 = vpop.permute.xlu1 %2982  ;;  %v6620_v43 = vpop.permute.xlu0 %2385 }
 0x44b   : > { %5207 = vmatprep.mubr.bf16.mxu0 %v5368_v59  ;;  %5255 = vmatprep.mubr.bf16.mxu1 %v5369_v37  ;;  %8222 = vst [vmem:[#allocation21_spill] sm:$0xff] %v6618_v62  ;;  %8223 = vst [vmem:[#allocation22_spill] sm:$0xff] %v6620_v43 }
 0x44e   : > { %v6622_v59 = vpop.permute.xlu1 %2992  ;;  %v6624_v37 = vpop.permute.xlu0 %2395 }
 0x44f   : > { %8224 = vst [vmem:[#allocation23_spill] sm:$0xff] %v6622_v59  ;;  %8225 = vst [vmem:[#allocation24_spill] sm:$0xff] %v6624_v37 }
 0x452   : > { %5208 = vmatmul.mubr.bf16.gmra.mrb[68].mxu0 %v5370_v36  ;;  %5256 = vmatmul.mubr.bf16.gmra.mrb[76].mxu1 %v5371_v26  ;;  %v6626_v36 = vpop.permute.xlu1 %2997  ;;  %v6628_v26 = vpop.permute.xlu0 %2987 }
 0x453   : > { %5211 = vmatprep.mubr.bf16.mxu0 %v5372_v15  ;;  %5259 = vmatprep.mubr.bf16.mxu1 %v5373_v11  ;;  %8226 = vst [vmem:[#allocation25_spill] sm:$0xff] %v6626_v36  ;;  %8227 = vst [vmem:[#allocation26_spill] sm:$0xff] %v6628_v26 }
 0x456   : > { %v6630_v15 = vpop.permute.xlu1 %3007  ;;  %v6632_v11 = vpop.permute.xlu0 %3002 }
 0x457   : > { %8228 = vst [vmem:[#allocation27_spill] sm:$0xff] %v6630_v15  ;;  %8229 = vst [vmem:[#allocation28_spill] sm:$0xff] %v6632_v11 }
 0x45a   : > { %5212 = vmatmul.mubr.bf16.gmra.mrb[72].mxu0 %v5374_v29  ;;  %5260 = vmatmul.mubr.bf16.gmra.mrb[80].mxu1 %v5375_v42  ;;  %v6634_v29 = vpop.permute.xlu1 %3017  ;;  %v6636_v42 = vpop.permute.xlu0 %3012 }
 0x45b   : > { %5215 = vmatprep.mubr.bf16.mxu0 %v5376_v32  ;;  %5263 = vmatprep.mubr.bf16.mxu1 %v5377_v27  ;;  %8230 = vst [vmem:[#allocation29_spill] sm:$0xff] %v6634_v29  ;;  %8231 = vst [vmem:[#allocation30_spill] sm:$0xff] %v6636_v42 }
 0x45e   : > { %v6638_v32 = vpop.permute.xlu1 %3027  ;;  %v6640_v27 = vpop.permute.xlu0 %3022 }
 0x45f   : > { %8232 = vst [vmem:[#allocation31_spill] sm:$0xff] %v6638_v32  ;;  %8233 = vst [vmem:[#allocation32_spill] sm:$0xff] %v6640_v27 }
 0x462   : > { %5216 = vmatmul.mubr.bf16.gmra.mrb[76].mxu0 %v5378_v53  ;;  %5264 = vmatmul.mubr.bf16.gmra.mrb[84].mxu1 %v5379_v38  ;;  %v6642_v53 = vpop.permute.xlu1 %3037  ;;  %v6644_v38 = vpop.permute.xlu0 %3032 }
 0x463   : > { %8234 = vst [vmem:[#allocation33_spill] sm:$0xff] %v6642_v53  ;;  %8235 = vst [vmem:[#allocation34_spill] sm:$0xff] %v6644_v38 }
 0x466   : > { %v6646_v62 = vpop.permute.xlu1 %3047  ;;  %v6648_v36 = vpop.permute.xlu0 %3042 }
 0x467   : > { %8236 = vst [vmem:[#allocation35_spill] sm:$0xff] %v6646_v62  ;;  %8237 = vst [vmem:[#allocation36_spill] sm:$0xff] %v6648_v36 }
 0x46a   : > { %v6650_v59 = vpop.permute.xlu1 %3057  ;;  %v6652_v15 = vpop.permute.xlu0 %3052 }
 0x46b   : > { %8238 = vst [vmem:[#allocation37_spill] sm:$0xff] %v6650_v59  ;;  %8239 = vst [vmem:[#allocation38_spill] sm:$0xff] %v6652_v15 }
 0x46e   : > { %v6654_v11 = vpop.permute.xlu1 %3067  ;;  %v6656_v29 = vpop.permute.xlu0 %3062 }
 0x46f   : > { %8240 = vst [vmem:[#allocation39_spill] sm:$0xff] %v6654_v11  ;;  %8241 = vst [vmem:[#allocation40_spill] sm:$0xff] %v6656_v29 }
 0x472   : > { %v6658_v41 = vpop.permute.xlu1 %3077  ;;  %v6660_v32 = vpop.permute.xlu0 %3072 }
 0x473   : > { %8242 = vst [vmem:[#allocation41_spill] sm:$0xff] %v6658_v41  ;;  %8243 = vst [vmem:[#allocation42_spill] sm:$0xff] %v6660_v32 }
 0x476   : > { %v6662_v27 = vpop.permute.xlu1 %3087  ;;  %v6664_v53 = vpop.permute.xlu0 %3082 }
 0x477   : > { %8244 = vst [vmem:[#allocation43_spill] sm:$0xff] %v6662_v27  ;;  %8245 = vst [vmem:[#allocation44_spill] sm:$0xff] %v6664_v53 }
 0x47a   : > { %v6666_v38 = vpop.permute.xlu1 %3097  ;;  %v6668_v62 = vpop.permute.xlu0 %3092 }
 0x47b   : > { %8246 = vst [vmem:[#allocation45_spill] sm:$0xff] %v6666_v38  ;;  %8247 = vst [vmem:[#allocation46_spill] sm:$0xff] %v6668_v62 }
 0x47e   : > { %v6670_v36 = vpop.permute.xlu1 %3107  ;;  %v6681_v16 = vpop.permute.xlu0 %3102 }
 0x47f   : > { %8248 = vst [vmem:[#allocation47_spill] sm:$0xff] %v6670_v36  ;;  %8249 = vst [vmem:[#allocation48_spill] sm:$0xff] %v6681_v16 }
 0x482   : > { %v6683_v37 = vpop.permute.xlu1 %3117 }
 0x483   : > { %8250 = vst [vmem:[#allocation49_spill] sm:$0xff] %v6683_v37 }
 0x4bd   : > { %v5093_v59 = vpop.f32.mrb[16].mxu0  ;;  %v5141_v15 = vpop.f32.mrb[24].mxu1 }
 0x4be   : > { %v1804_v11 = vadd.f32 %v5093_v59, %v6019_v39  ;;  %v2542_v29 = vadd.f32 %v5141_v15, %v6178_v46  ;;  %v1795_v42 = vpop.f32.mrb[17].mxu0  ;;  %v2533_v41 = vpop.f32.mrb[25].mxu1 }
 0x4bf   : > { %v5094_v58 = vpop.f32.mrb[18].mxu0  ;;  %v5142_v32 = vpop.f32.mrb[26].mxu1  ;;  %v1796_v53 = vadd.f32 %v1795_v42, %v6005_v22  ;;  %v2534_v46 = vadd.f32 %v2533_v41, %v6173_v19 }
 0x4c0   : > { %v1924_v26 = vmul.f32 0.2, %v1804_v11  ;;  %v2662_v27 = vmul.f32 0.2, %v2542_v29  ;;  %v6676_v38 = vadd.f32 %v5142_v32, %v6444_v51  ;;  %v1798_v62 = vpop.f32.mrb[19].mxu0  ;;  %v2536_v43 = vpop.f32.mrb[27].mxu1 }
 0x4c1   : > { %v1799_v36 = vadd.f32 %v1798_v62, %v5974_v2  ;;  %v2537_v61 = vadd.f32 %v2536_v43, %v6478_v7  ;;  %v1922_v22 = vmul.f32 0.2, %v1796_v53  ;;  %v1807_v2 = vadd.f32 %v5094_v58, %v5984_v8  ;;  %v6698_v58 = vpop.permute.xlu0 %3112 }
 0x4c2   : > { %v1956_v39 = vmax.f32 %v1804_v11, %v1924_v26  ;;  %v2694_v47 = vmax.f32 %v2542_v29, %v2662_v27  ;;  %v2660_v41 = vmul.f32 0.2, %v2534_v46  ;;  %8251 = vst [vmem:[#allocation50_spill] sm:$0xff] %v6698_v58 }
 0x4c3   : > { %v1923_v59 = vmul.f32 0.2, %v1799_v36  ;;  %v2661_v15 = vmul.f32 0.2, %v2537_v61  ;;  %v1954_v27 = vmax.f32 %v1796_v53, %v1922_v22  ;;  %v6700_v53 = vpop.permute.xlu1 %3127 }
 0x4c4   : > { %v1992_v51 = vsel %vm942_vm4, %v1956_v39, -inf  ;;  %v2730_v8 = vsel %vm942_vm4, %v2694_v47, -inf  ;;  %8252 = vst [vmem:[#allocation51_spill] sm:$0xff] %v6700_v53 }
 0x4c5   : > { %v1955_v42 = vmax.f32 %v1799_v36, %v1923_v59  ;;  %v5145_v32 = vpop.f32.mrb[28].mxu1  ;;  %1993 = vmax.xlane.f32.xlu0 %v1992_v51  ;;  %v5097_v21 = vpop.f32.mrb[20].mxu0  ;;  %v2693_v43 = vmax.f32 %v2537_v61, %v2661_v15  ;;  %v2692_v15 = vmax.f32 %v2534_v46, %v2660_v41  ;;  %v2663_v41 = vmul.f32 0.2, %v6676_v38 }
 0x4c6   : > { %v1820_v7 = vadd.f32 %v5097_v21, %v6046_v56  ;;  %v1811_v62 = vpop.f32.mrb[21].mxu0  ;;  %v2549_v19 = vpop.f32.mrb[29].mxu1  ;;  %v2558_v26 = vadd.f32 %v5145_v32, %v6510_v17 }
 0x4c7   : > { %v5098_v11 = vpop.f32.mrb[22].mxu0  ;;  %v5146_v37 = vpop.f32.mrb[30].mxu1  ;;  %v1989_v29 = vsel %vm942_vm4, %v1955_v42, -inf  ;;  %v1812_v17 = vadd.f32 %v1811_v62, %v6036_v28  ;;  %v2727_v61 = vsel %vm942_vm4, %v2693_v43, -inf  ;;  %v2550_v47 = vadd.f32 %v2549_v19, %v6494_v5 }
 0x4c8   : > { %v1928_v39 = vmul.f32 0.2, %v1820_v7  ;;  %v6691_v36 = vadd.f32 %v5146_v37, %v6476_v6  ;;  %v1814_v59 = vpop.f32.mrb[23].mxu0  ;;  %v6693_v51 = vpop.f32.mrb[31].mxu1  ;;  %1990 = vmax.xlane.f32.xlu1 %v1989_v29  ;;  %v2666_v56 = vmul.f32 0.2, %v2558_v26 }
 0x4c9   : > { %2731 = vmax.xlane.f32.xlu0 %v2730_v8  ;;  %v1925_v6 = vmul.f32 0.2, %v1807_v2  ;;  %v1986_v37 = vsel %vm942_vm4, %v1954_v27, -inf  ;;  %v1926_v28 = vmul.f32 0.2, %v1812_v17  ;;  %v1823_v27 = vadd.f32 %v5098_v11, %v6021_v40 }
 0x4ca   : > { %v1960_v21 = vmax.f32 %v1820_v7, %v1928_v39  ;;  %v2698_v29 = vmax.f32 %v2558_v26, %v2666_v56  ;;  %v2724_v5 = vsel %vm942_vm4, %v2692_v15, -inf  ;;  %v2664_v19 = vmul.f32 0.2, %v2550_v47 }
 0x4cb   : > { %v1957_v46 = vmax.f32 %v1807_v2, %v1925_v6  ;;  %v1958_v26 = vmax.f32 %v1812_v17, %v1926_v28  ;;  %v6720_v2 = vpop.permute.xlu1 %3137  ;;  %v2695_v40 = vmax.f32 %v6676_v38, %v2663_v41  ;;  %v1929_v11 = vmul.f32 0.2, %v1823_v27 }
 0x4cc   : > { %2728 = vmax.xlane.f32.xlu1 %v2727_v61  ;;  %v2004_v39 = vsel %vm942_vm4, %v1960_v21, -inf  ;;  %v6718_v21 = vpop.permute.xlu0 %3122  ;;  %8254 = vst [vmem:[#allocation53_spill] sm:$0xff] %v6720_v2  ;;  %v2696_v15 = vmax.f32 %v2550_v47, %v2664_v19  ;;  %v1815_v47 = vadd.f32 %v1814_v59, %v6007_v23 }
 0x4cd   : > { %v5101_v22 = vpop.f32.mrb[24].mxu0  ;;  %v5149_v42 = vpop.f32.mrb[32].mxu1  ;;  %1987 = vmax.xlane.f32.xlu0 %v1986_v37  ;;  %v2742_v37 = vsel %vm942_vm4, %v2698_v29, -inf  ;;  %8253 = vst [vmem:[#allocation52_spill] sm:$0xff] %v6718_v21  ;;  %v1995_v6 = vsel %vm942_vm4, %v1957_v46, -inf  ;;  %v1998_v46 = vsel %vm942_vm4, %v1958_v26, -inf  ;;  %v1961_v41 = vmax.f32 %v1823_v27, %v1929_v11 }
 0x4ce   : > { %v1827_v32 = vpop.f32.mrb[25].mxu0  ;;  %v2565_v7 = vpop.f32.mrb[33].mxu1  ;;  %v1836_v56 = vadd.f32 %v5101_v22, %v6072_v12  ;;  %v2574_v29 = vadd.f32 %v5149_v42, %v6530_v45  ;;  %v2733_v45 = vsel %vm942_vm4, %v2695_v40, -inf  ;;  %v2736_v2 = vsel %vm942_vm4, %v2696_v15, -inf }
 0x4cf   : > { %v6704_v62 = vpop.f32.mrb[26].mxu0  ;;  %v6706_v43 = vpop.f32.mrb[34].mxu1  ;;  %v1927_v59 = vmul.f32 0.2, %v1815_v47  ;;  %v2553_v11 = vadd.f32 %v6693_v51, %v6460_v10  ;;  %v2007_v40 = vsel %vm942_vm4, %v1961_v41, -inf }
 0x4d0   : > { %v6711_v8 = vpop.f32.mrb[27].mxu0  ;;  %v6713_v61 = vpop.f32.mrb[35].mxu1  ;;  %2005 = vmax.xlane.f32.xlu1 %v2004_v39  ;;  %v1932_v22 = vmul.f32 0.2, %v1836_v56  ;;  %v2670_v42 = vmul.f32 0.2, %v2574_v29  ;;  %v1839_v41 = vadd.f32 %v6704_v62, %v6048_v57  ;;  %v2577_v62 = vadd.f32 %v6706_v43, %v6496_v44 }
 0x4d1   : > { %2725 = vmax.xlane.f32.xlu0 %v2724_v5  ;;  %v6746_v26 = vpop.permute.xlu0 %3132  ;;  %v6748_v27 = vpop.permute.xlu1 %3719  ;;  %v1959_v51 = vmax.f32 %v1815_v47, %v1927_v59  ;;  %v2569_v58 = vadd.f32 %v6713_v61, %v6480_v63 }
 0x4d2   : > { %8255 = vst [vmem:[#allocation54_spill] sm:$0xff] %v6746_v26  ;;  %v2702_v15 = vmax.f32 %v2574_v29, %v2670_v42  ;;  %v1933_v57 = vmul.f32 0.2, %v1839_v41 }
 0x4d4   : > { %2743 = vmax.xlane.f32.xlu1 %v2742_v37  ;;  %v2667_v37 = vmul.f32 0.2, %v6691_v36  ;;  %v2754_v26 = vsel %vm942_vm4, %v2702_v15, -inf }
 0x4d5   : > { %v5105_v39 = vpop.f32.mrb[28].mxu0  ;;  %v6724_v53 = vpop.f32.mrb[36].mxu1  ;;  %1996 = vmax.xlane.f32.xlu0 %v1995_v6 }
 0x4d6   : > { %v6726_v17 = vpop.f32.mrb[29].mxu0  ;;  %v2581_v12 = vpop.f32.mrb[37].mxu1  ;;  %v2699_v23 = vmax.f32 %v6691_v36, %v2667_v37  ;;  %v2566_v36 = vadd.f32 %v2565_v7, %v6526_v60  ;;  %v1852_v42 = vadd.f32 %v5105_v39, %v6098_v49 }
 0x4d7   : > { %v6730_v28 = vadd.f32 %v2581_v12, %v6546_v18  ;;  %v6732_v5 = vpop.f32.mrb[30].mxu0  ;;  %v6734_v38 = vpop.f32.mrb[38].mxu1  ;;  %v1964_v18 = vmax.f32 %v1836_v56, %v1932_v22  ;;  %v1828_v12 = vadd.f32 %v1827_v32, %v6062_v3 }
 0x4d8   : > { %v6739_v19 = vpop.f32.mrb[31].mxu0  ;;  %v6741_v6 = vpop.f32.mrb[39].mxu1  ;;  %1999 = vmax.xlane.f32.xlu1 %v1998_v46  ;;  %v2745_v29 = vsel %vm942_vm4, %v2699_v23, -inf  ;;  %v2668_v7 = vmul.f32 0.2, %v2566_v36 }
 0x4d9   : > { %2734 = vmax.xlane.f32.xlu0 %v2733_v45  ;;  %v1930_v22 = vmul.f32 0.2, %v1828_v12  ;;  %v2016_v10 = vsel %vm942_vm4, %v1964_v18, -inf  ;;  %v6777_v18 = vpop.permute.xlu0 %3724  ;;  %v6779_v47 = vpop.permute.xlu1 %3729 }
 0x4da   : > { %8256 = vst [vmem:[#allocation55_spill] sm:$0xff] %v6777_v18  ;;  %8257 = vst [vmem:[#allocation56_spill] sm:$0xff] %v6779_v47  ;;  %v2700_v15 = vmax.f32 %v2566_v36, %v2668_v7  ;;  %v1844_v7 = vadd.f32 %v6726_v17, %v6088_v30 }
 0x4db   : > { %v1962_v60 = vmax.f32 %v1828_v12, %v1930_v22  ;;  %v1936_v22 = vmul.f32 0.2, %v1852_v42 }
 0x4dc   : > { %2737 = vmax.xlane.f32.xlu1 %v2736_v2  ;;  %v2665_v2 = vmul.f32 0.2, %v2553_v11 }
 0x4dd   : > { %v6754_v46 = vpop.f32.mrb[32].mxu0  ;;  %v6756_v56 = vpop.f32.mrb[40].mxu1  ;;  %2008 = vmax.xlane.f32.xlu0 %v2007_v40  ;;  %v2010_v43 = vsel %vm942_vm4, %v1962_v60, -inf  ;;  %v2748_v60 = vsel %vm942_vm4, %v2700_v15, -inf }
 0x4de   : > { %v6758_v3 = vpop.f32.mrb[33].mxu0  ;;  %v6760_v32 = vpop.f32.mrb[41].mxu1  ;;  %v2697_v59 = vmax.f32 %v2553_v11, %v2665_v2  ;;  %v2590_v11 = vadd.f32 %v6724_v53, %v6562_v31  ;;  %v1968_v31 = vmax.f32 %v1852_v42, %v1936_v22  ;;  %v1934_v22 = vmul.f32 0.2, %v1844_v7 }
 0x4df   : > { %v6763_v37 = vpop.f32.mrb[34].mxu0  ;;  %v6765_v45 = vpop.f32.mrb[42].mxu1  ;;  %v1868_v47 = vadd.f32 %v6754_v46, %v6124_v24 }
 0x4e0   : > { %v6770_v40 = vpop.f32.mrb[35].mxu0  ;;  %v6772_v21 = vpop.f32.mrb[43].mxu1  ;;  %2017 = vmax.xlane.f32.xlu1 %v2016_v10  ;;  %v2001_v10 = vsel %vm942_vm4, %v1959_v51, -inf  ;;  %v2671_v51 = vmul.f32 0.2, %v2577_v62  ;;  %v2739_v36 = vsel %vm942_vm4, %v2697_v59, -inf }
 0x4e1   : > { %2746 = vmax.xlane.f32.xlu0 %v2745_v29  ;;  %v1831_v29 = vadd.f32 %v6711_v8, %v6038_v52  ;;  %v2674_v53 = vmul.f32 0.2, %v2590_v11  ;;  %v2028_v63 = vsel %vm942_vm4, %v1968_v31, -inf }
 0x4e2   : > { %v2703_v52 = vmax.f32 %v2577_v62, %v2671_v51  ;;  %v2669_v51 = vmul.f32 0.2, %v2569_v58 }
 0x4e3   : > { %v1931_v8 = vmul.f32 0.2, %v1831_v29  ;;  %v2706_v15 = vmax.f32 %v2590_v11, %v2674_v53  ;;  %v1966_v11 = vmax.f32 %v1844_v7, %v1934_v22  ;;  %v2672_v53 = vmul.f32 0.2, %v6730_v28 }
 0x4e4   : > { %2755 = vmax.xlane.f32.xlu1 %v2754_v26  ;;  %v1965_v26 = vmax.f32 %v1839_v41, %v1933_v57  ;;  %v6809_v41 = vpop.permute.xlu0 %3739  ;;  %v6811_v57 = vpop.permute.xlu1 %3734  ;;  %v1940_v22 = vmul.f32 0.2, %v1868_v47 }
 0x4e5   : > { %v6784_v23 = vpop.f32.mrb[36].mxu0  ;;  %v6786_v12 = vpop.f32.mrb[44].mxu1  ;;  %2002 = vmax.xlane.f32.xlu0 %v2001_v10  ;;  %8258 = vst [vmem:[#allocation57_spill] sm:$0xff] %v6809_v41  ;;  %v1963_v61 = vmax.f32 %v1831_v29, %v1931_v8  ;;  %v2757_v41 = vsel %vm942_vm4, %v2703_v52, -inf  ;;  %v2766_v29 = vsel %vm942_vm4, %v2706_v15, -inf  ;;  %v2704_v15 = vmax.f32 %v6730_v28, %v2672_v53 }
 0x4e6   : > { %v6788_v49 = vpop.f32.mrb[37].mxu0  ;;  %v6790_v39 = vpop.f32.mrb[45].mxu1  ;;  %v2019_v59 = vsel %vm942_vm4, %v1965_v26, -inf  ;;  %v1855_v26 = vadd.f32 %v6732_v5, %v6074_v13  ;;  %v2701_v13 = vmax.f32 %v2569_v58, %v2669_v51  ;;  %v2606_v58 = vadd.f32 %v6756_v56, %v6582_v1 }
 0x4e7   : > { %v6794_v2 = vpop.f32.mrb[38].mxu0  ;;  %v6796_v44 = vpop.f32.mrb[46].mxu1  ;;  %v2585_v1 = vadd.f32 %v6741_v6, %v6512_v25  ;;  %v1972_v56 = vmax.f32 %v1868_v47, %v1940_v22 }
 0x4e8   : > { %v6801_v10 = vpop.f32.mrb[39].mxu0  ;;  %v6803_v16 = vpop.f32.mrb[47].mxu1  ;;  %2011 = vmax.xlane.f32.xlu1 %v2010_v43  ;;  %v1937_v5 = vmul.f32 0.2, %v1855_v26  ;;  %v2751_v28 = vsel %vm942_vm4, %v2701_v13, -inf }
 0x4e9   : > { %2740 = vmax.xlane.f32.xlu0 %v2739_v36  ;;  %v6840_v31 = vpop.permute.xlu0 %3749  ;;  %v6842_v8 = vpop.permute.xlu1 %3744  ;;  %v2678_v53 = vmul.f32 0.2, %v2606_v58  ;;  %v2673_v6 = vmul.f32 0.2, %v2585_v1 }
 0x4ea   : > { %8259 = vst [vmem:[#allocation58_spill] sm:$0xff] %v6840_v31  ;;  %8260 = vst [vmem:[#allocation59_spill] sm:$0xff] %v6842_v8  ;;  %v8262_v8 = vld [vmem:[#allocation3_spill] sm:$0xff] }
 0x4eb   : > { %v2710_v22 = vmax.f32 %v2606_v58, %v2678_v53 }
 0x4ec   : > { %2749 = vmax.xlane.f32.xlu1 %v2748_v60 }
 0x4ed   : > { %v6816_v43 = vpop.f32.mrb[40].mxu0  ;;  %v6818_v42 = vpop.f32.mrb[48].mxu1  ;;  %2020 = vmax.xlane.f32.xlu0 %v2019_v59 }
 0x4ee   : > { %v6820_v30 = vpop.f32.mrb[41].mxu0  ;;  %v6822_v17 = vpop.f32.mrb[49].mxu1 }
 0x4ef   : > { %v6824_v36 = vpop.f32.mrb[42].mxu0  ;;  %v6826_v62 = vpop.f32.mrb[50].mxu1 }
 0x4f0   : > { %v6831_v60 = vpop.f32.mrb[43].mxu0  ;;  %v6833_v59 = vpop.f32.mrb[51].mxu1  ;;  %2029 = vmax.xlane.f32.xlu1 %v2028_v63  ;;  %v2593_v63 = vadd.f32 %v6734_v38, %v6528_v20  ;;  %v2022_v38 = vsel %vm942_vm4, %v1966_v11, -inf  ;;  %v2760_v11 = vsel %vm942_vm4, %v2704_v15, -inf }
 0x4f1   : > { %2758 = vmax.xlane.f32.xlu0 %v2757_v41  ;;  %v2013_v41 = vsel %vm942_vm4, %v1963_v61, -inf  ;;  %v1969_v61 = vmax.f32 %v1855_v26, %v1937_v5 }
 0x4f3   : > { %v2031_v13 = vsel %vm942_vm4, %v1969_v61, -inf }
 0x4f4   : > { %2767 = vmax.xlane.f32.xlu1 %v2766_v29  ;;  %v2675_v29 = vmul.f32 0.2, %v2593_v63 }
 0x4f5   : > { %v6847_v7 = vpop.f32.mrb[44].mxu0  ;;  %v6849_v52 = vpop.f32.mrb[52].mxu1  ;;  %2014 = vmax.xlane.f32.xlu0 %v2013_v41  ;;  %v1847_v41 = vadd.f32 %v6739_v19, %v8262_v8 }
 0x4f6   : > { %v6851_v24 = vpop.f32.mrb[45].mxu0  ;;  %v6853_v46 = vpop.f32.mrb[53].mxu1  ;;  %v2707_v5 = vmax.f32 %v2593_v63, %v2675_v29 }
 0x4f7   : > { %v6858_v51 = vpop.f32.mrb[46].mxu0  ;;  %v6860_v20 = vpop.f32.mrb[54].mxu1 }
 0x4f8   : > { %8261 = vst [vmem:[#allocation60_spill] sm:$0xff] %v6860_v20  ;;  %v6865_v31 = vpop.f32.mrb[47].mxu0  ;;  %v6867_v18 = vpop.f32.mrb[55].mxu1  ;;  %2023 = vmax.xlane.f32.xlu1 %v2022_v38  ;;  %v8263_v20 = vld [vmem:[#allocation6_spill] sm:$0xff]  ;;  %v1935_v38 = vmul.f32 0.2, %v1847_v41 }
 0x4f9   : > { %2752 = vmax.xlane.f32.xlu0 %v2751_v28  ;;  %v6874_v26 = vadd.f32 %v6758_v3, %v8263_v20  ;;  %v6877_v19 = vpop.permute.xlu0 %3759  ;;  %v6879_v8 = vpop.permute.xlu1 %3754  ;;  %v6888_v3 = vadd.f32 %v6760_v32, %v6578_v4 }
 0x4fa   : > { %8264 = vst [vmem:[#allocation3_spill] sm:$0xff] %v6877_v19  ;;  %v8266_v19 = vld [vmem:[#allocation5_spill] sm:$0xff] }
 0x4fb   : > { %v6893_v63 = vmul.f32 0.2, %v6874_v26  ;;  %v6903_v4 = vadd.f32 %v6763_v37, %v8266_v19  ;;  %v8268_v37 = vld [vmem:[#allocation11_spill] sm:$0xff] }
 0x4fc   : > { %2761 = vmax.xlane.f32.xlu1 %v2760_v11  ;;  %v2040_v11 = vsel %vm942_vm4, %v1972_v56, -inf  ;;  %v6920_v19 = vadd.f32 %v6784_v23, %v8268_v37  ;;  %v5406_v56 = vmov -inf  }
 0x4fd   : > { %v6882_v28 = vpop.f32.mrb[48].mxu0  ;;  %v6884_v25 = vpop.f32.mrb[56].mxu1  ;;  %2032 = vmax.xlane.f32.xlu0 %v2031_v13  ;;  %v1967_v13 = vmax.f32 %v1847_v41, %v1935_v38  ;;  %v6916_v41 = vmul.f32 0.2, %v6888_v3  ;;  %463 = vst.msk [vmem:[#allocation2 + $0x10] sm:$0xff] %vm460_vm5, %v5406_v56  ;;  %461 = vst.msk [vmem:[#allocation2] sm:$0xff] %vm460_vm5, %v5406_v56 }
 0x4fe   : > { %v6890_v47 = vpop.f32.mrb[49].mxu0  ;;  %v4007_v15 = vpop.f32.mrb[57].mxu1  ;;  %462 = vst.msk [vmem:[#allocation2 + $0x8] sm:$0xff] %vm460_vm5, %v5406_v56  ;;  %464 = vst.msk [vmem:[#allocation2 + $0x18] sm:$0xff] %vm460_vm5, %v5406_v56 }
 0x4ff   : > { %v6896_v20 = vadd.f32 %v4007_v15, %v6748_v27  ;;  %v6898_v61 = vpop.f32.mrb[50].mxu0  ;;  %v5238_v29 = vpop.f32.mrb[58].mxu1  ;;  %v2769_v27 = vsel %vm942_vm4, %v2707_v5, -inf  ;;  %v2705_v15 = vmax.f32 %v2585_v1, %v2673_v6  ;;  %v6928_v5 = vmul.f32 0.2, %v6903_v4  ;;  %465 = vst.msk [vmem:[#allocation2 + $0x20] sm:$0xff] %vm460_vm5, %v5406_v56 }
 0x500   : > { %8265 = vst [vmem:[#allocation6_spill] sm:$0xff] %v6898_v61  ;;  %v6906_v32 = vadd.f32 %v5238_v29, %v6811_v57  ;;  %v6908_v58 = vpop.f32.mrb[51].mxu0  ;;  %v6910_v53 = vpop.f32.mrb[59].mxu1  ;;  %2041 = vmax.xlane.f32.xlu1 %v2040_v11  ;;  %v2778_v57 = vsel %vm942_vm4, %v2710_v22, -inf  ;;  %v6932_v1 = vadd.f32 %v6765_v45, %v6548_v55  ;;  %v2025_v6 = vsel %vm942_vm4, %v1967_v13, -inf  ;;  %466 = vst.msk [vmem:[#allocation2 + $0x28] sm:$0xff] %vm460_vm5, %v5406_v56 }
 0x501   : > { %2770 = vmax.xlane.f32.xlu0 %v2769_v27  ;;  %v6923_v38 = vpop.permute.xlu0 %3769  ;;  %v6925_v29 = vpop.permute.xlu1 %3764  ;;  %v6944_v37 = vsel %vm942_vm4, %v2705_v15, -inf  ;;  %467 = vst.msk [vmem:[#allocation2 + $0x30] sm:$0xff] %vm460_vm5, %v5406_v56  ;;  %468 = vst.msk [vmem:[#allocation2 + $0x38] sm:$0xff] %vm460_vm5, %v5406_v56  ;;  %v2708_v55 = vmax.f32 %v6888_v3, %v6916_v41  ;;  %v1944_v45 = vmul.f32 0.2, %v6920_v19  ;;  %v2622_v13 = vadd.f32 %v6786_v12, %v6608_v48  ;;  %v8272_v61 = vld [vmem:[#allocation4_spill] sm:$0xff] }
 0x502   : > { %8267 = vst [vmem:[#allocation5_spill] sm:$0xff] %v6906_v32  ;;  %8269 = vst [vmem:[#allocation11_spill] sm:$0xff] %v6925_v29  ;;  %v1973_v32 = vmax.f32 %v6903_v4, %v6928_v5  ;;  %v1863_v3 = vadd.f32 %v6770_v40, %v8272_v61 }
 0x503   : > { %469 = vst.msk [vmem:[#allocation2 + $0x40] sm:$0xff] %vm460_vm5, %v5406_v56  ;;  %470 = vst.msk [vmem:[#allocation2 + $0x48] sm:$0xff] %vm460_vm5, %v5406_v56  ;;  %v2772_v5 = vsel %vm942_vm4, %v2708_v55, -inf }
 0x504   : > { %2779 = vmax.xlane.f32.xlu1 %v2778_v57  ;;  %471 = vst.msk [vmem:[#allocation2 + $0x50] sm:$0xff] %vm460_vm5, %v5406_v56  ;;  %472 = vst.msk [vmem:[#allocation2 + $0x58] sm:$0xff] %vm460_vm5, %v5406_v56  ;;  %v1939_v61 = vmul.f32 0.2, %v1863_v3 }
 0x505   : > { %v6935_v11 = vpop.f32.mrb[52].mxu0  ;;  %v6937_v23 = vpop.f32.mrb[60].mxu1  ;;  %2026 = vmax.xlane.f32.xlu0 %v2025_v6  ;;  %473 = vst.msk [vmem:[#allocation2 + $0x60] sm:$0xff] %vm460_vm5, %v5406_v56  ;;  %474 = vst.msk [vmem:[#allocation2 + $0x68] sm:$0xff] %vm460_vm5, %v5406_v56  ;;  %v8271_v6 = vmax.f32 %v6874_v26, %v6893_v63  ;;  %v1976_v26 = vmax.f32 %v6920_v19, %v1944_v45  ;;  %v2682_v63 = vmul.f32 0.2, %v2622_v13 }
 0x506   : > { %v6939_v22 = vpop.f32.mrb[53].mxu0  ;;  %v6941_v27 = vpop.f32.mrb[61].mxu1  ;;  %475 = vst.msk [vmem:[#allocation2 + $0x70] sm:$0xff] %vm460_vm5, %v5406_v56  ;;  %476 = vst.msk [vmem:[#allocation2 + $0x78] sm:$0xff] %vm460_vm5, %v5406_v56 }
 0x507   : > { %477 = vst.msk [vmem:[#allocation2 + $0x80] sm:$0xff] %vm460_vm5, %v5406_v56  ;;  %478 = vst.msk [vmem:[#allocation2 + $0x88] sm:$0xff] %vm460_vm5, %v5406_v56  ;;  %v7207_v15 = vpop.f32.mrb[54].mxu0  ;;  %v5242_v57 = vpop.f32.mrb[62].mxu1  ;;  %v2034_v29 = vsel %vm942_vm4, %v8271_v6, -inf  ;;  %v8274_v6 = vld [vmem:[#allocation9_spill] sm:$0xff] }
 0x508   : > { %479 = vst.msk [vmem:[#allocation2 + $0x90] sm:$0xff] %vm460_vm5, %v5406_v56  ;;  %480 = vst.msk [vmem:[#allocation2 + $0x98] sm:$0xff] %vm460_vm5, %v5406_v56  ;;  %v7219_v41 = vadd.f32 %v5242_v57, %v6879_v8  ;;  %v7221_v48 = vpop.f32.mrb[55].mxu0  ;;  %v7223_v12 = vpop.f32.mrb[63].mxu1  ;;  %2035 = vmax.xlane.f32.xlu1 %v2034_v29  ;;  %v1876_v4 = vadd.f32 %v6788_v49, %v8274_v6  ;;  %v2601_v57 = vadd.f32 %v6772_v21, %v6532_v0 }
 0x509   : > { %481 = vst.msk [vmem:[#allocation2 + $0xa0] sm:$0xff] %vm460_vm5, %v5406_v56  ;;  %482 = vst.msk [vmem:[#allocation2 + $0xa8] sm:$0xff] %vm460_vm5, %v5406_v56  ;;  %2764 = vmax.xlane.f32.xlu0 %v6944_v37  ;;  %v7230_v40 = vpop.permute.xlu1 %3774  ;;  %v2043_v29 = vsel %vm942_vm4, %v1973_v32, -inf  ;;  %v2614_v49 = vadd.f32 %v6790_v39, %v6598_v54  ;;  %v2052_v21 = vsel %vm942_vm4, %v1976_v26, -inf  ;;  %v1971_v32 = vmax.f32 %v1863_v3, %v1939_v61 }
 0x50a   : > { %483 = vst.msk [vmem:[#allocation2 + $0xb0] sm:$0xff] %vm460_vm5, %v5406_v56  ;;  %484 = vst.msk [vmem:[#allocation2 + $0xb8] sm:$0xff] %vm460_vm5, %v5406_v56 }
 0x50b   : > { %485 = vst.msk [vmem:[#allocation2 + $0xc0] sm:$0xff] %vm460_vm5, %v5406_v56  ;;  %486 = vst.msk [vmem:[#allocation2 + $0xc8] sm:$0xff] %vm460_vm5, %v5406_v56 }
 0x50c   : > { %487 = vst.msk [vmem:[#allocation2 + $0xd0] sm:$0xff] %vm460_vm5, %v5406_v56  ;;  %488 = vst.msk [vmem:[#allocation2 + $0xd8] sm:$0xff] %vm460_vm5, %v5406_v56  ;;  %2773 = vmax.xlane.f32.xlu1 %v2772_v5  ;;  %v2677_v5 = vmul.f32 0.2, %v2601_v57 }
 0x50d   : > { %489 = vst.msk [vmem:[#allocation2 + $0xe0] sm:$0xff] %vm460_vm5, %v5406_v56  ;;  %490 = vst.msk [vmem:[#allocation2 + $0xe8] sm:$0xff] %vm460_vm5, %v5406_v56  ;;  %v7236_v37 = vpop.f32.mrb[56].mxu0  ;;  %v7238_v19 = vpop.f32.mrb[64].mxu1  ;;  %2044 = vmax.xlane.f32.xlu0 %v2043_v29 }
 0x50e   : > { %491 = vst.msk [vmem:[#allocation2 + $0xf0] sm:$0xff] %vm460_vm5, %v5406_v56  ;;  %492 = vst.msk [vmem:[#allocation2 + $0xf8] sm:$0xff] %vm460_vm5, %v5406_v56  ;;  %v7242_v55 = vpop.f32.mrb[57].mxu0  ;;  %v7244_v45 = vpop.f32.mrb[65].mxu1 }
 0x50f   : > { %493 = vst.msk [vmem:[#allocation2 + $0x100] sm:$0xff] %vm460_vm5, %v5406_v56  ;;  %494 = vst.msk [vmem:[#allocation2 + $0x108] sm:$0xff] %vm460_vm5, %v5406_v56  ;;  %v7246_v6 = vpop.f32.mrb[58].mxu0  ;;  %v7248_v0 = vpop.f32.mrb[66].mxu1 }
 0x510   : > { %495 = vst.msk [vmem:[#allocation2 + $0x110] sm:$0xff] %vm460_vm5, %v5406_v56  ;;  %496 = vst.msk [vmem:[#allocation2 + $0x118] sm:$0xff] %vm460_vm5, %v5406_v56  ;;  %v7255_v54 = vpop.f32.mrb[67].mxu1  ;;  %2053 = vmax.xlane.f32.xlu1 %v2052_v21  ;;  %v7263_v61 = vpop.permute.xlu1 %3784 }
 0x511   : > { %497 = vst.msk [vmem:[#allocation2 + $0x120] sm:$0xff] %vm460_vm5, %v5406_v56  ;;  %498 = vst.msk [vmem:[#allocation2 + $0x128] sm:$0xff] %vm460_vm5, %v5406_v56 }
 0x512   : > { %499 = vst.msk [vmem:[#allocation2 + $0x130] sm:$0xff] %vm460_vm5, %v5406_v56  ;;  %500 = vst.msk [vmem:[#allocation2 + $0x138] sm:$0xff] %vm460_vm5, %v5406_v56 }
 0x513   : > { %501 = vst.msk [vmem:[#allocation2 + $0x140] sm:$0xff] %vm460_vm5, %v5406_v56  ;;  %502 = vst.msk [vmem:[#allocation2 + $0x148] sm:$0xff] %vm460_vm5, %v5406_v56 }
 0x514   : > { %503 = vst.msk [vmem:[#allocation2 + $0x150] sm:$0xff] %vm460_vm5, %v5406_v56  ;;  %504 = vst.msk [vmem:[#allocation2 + $0x158] sm:$0xff] %vm460_vm5, %v5406_v56 }
 0x515   : > { %505 = vst.msk [vmem:[#allocation2 + $0x160] sm:$0xff] %vm460_vm5, %v5406_v56  ;;  %506 = vst.msk [vmem:[#allocation2 + $0x168] sm:$0xff] %vm460_vm5, %v5406_v56 }
 0x516   : > { %507 = vst.msk [vmem:[#allocation2 + $0x170] sm:$0xff] %vm460_vm5, %v5406_v56  ;;  %508 = vst.msk [vmem:[#allocation2 + $0x178] sm:$0xff] %vm460_vm5, %v5406_v56 }
 0x517   : > { %509 = vst.msk [vmem:[#allocation2 + $0x180] sm:$0xff] %vm460_vm5, %v5406_v56  ;;  %510 = vst.msk [vmem:[#allocation2 + $0x188] sm:$0xff] %vm460_vm5, %v5406_v56 }
 0x518   : > { %511 = vst.msk [vmem:[#allocation2 + $0x190] sm:$0xff] %vm460_vm5, %v5406_v56  ;;  %512 = vst.msk [vmem:[#allocation2 + $0x198] sm:$0xff] %vm460_vm5, %v5406_v56 }
 0x519   : > { %513 = vst.msk [vmem:[#allocation2 + $0x1a0] sm:$0xff] %vm460_vm5, %v5406_v56  ;;  %514 = vst.msk [vmem:[#allocation2 + $0x1a8] sm:$0xff] %vm460_vm5, %v5406_v56 }
 0x51a   : > { %515 = vst.msk [vmem:[#allocation2 + $0x1b0] sm:$0xff] %vm460_vm5, %v5406_v56  ;;  %516 = vst.msk [vmem:[#allocation2 + $0x1b8] sm:$0xff] %vm460_vm5, %v5406_v56 }
 0x51b   : > { %517 = vst.msk [vmem:[#allocation2 + $0x1c0] sm:$0xff] %vm460_vm5, %v5406_v56  ;;  %518 = vst.msk [vmem:[#allocation2 + $0x1c8] sm:$0xff] %vm460_vm5, %v5406_v56 }
 0x51c   : > { %519 = vst.msk [vmem:[#allocation2 + $0x1d0] sm:$0xff] %vm460_vm5, %v5406_v56  ;;  %520 = vst.msk [vmem:[#allocation2 + $0x1d8] sm:$0xff] %vm460_vm5, %v5406_v56 }
 0x51d   : > { %521 = vst.msk [vmem:[#allocation2 + $0x1e0] sm:$0xff] %vm460_vm5, %v5406_v56  ;;  %522 = vst.msk [vmem:[#allocation2 + $0x1e8] sm:$0xff] %vm460_vm5, %v5406_v56 }
 0x51e   : > { %523 = vst.msk [vmem:[#allocation2 + $0x1f0] sm:$0xff] %vm460_vm5, %v5406_v56  ;;  %524 = vst.msk [vmem:[#allocation2 + $0x1f8] sm:$0xff] %vm460_vm5, %v5406_v56 }
 0x51f   : > { %525 = vst.msk [vmem:[#allocation2 + $0x200] sm:$0xff] %vm460_vm5, %v5406_v56  ;;  %526 = vst.msk [vmem:[#allocation2 + $0x208] sm:$0xff] %vm460_vm5, %v5406_v56 }
 0x520   : > { %527 = vst.msk [vmem:[#allocation2 + $0x210] sm:$0xff] %vm460_vm5, %v5406_v56  ;;  %528 = vst.msk [vmem:[#allocation2 + $0x218] sm:$0xff] %vm460_vm5, %v5406_v56 }
 0x521   : > { %529 = vst.msk [vmem:[#allocation2 + $0x220] sm:$0xff] %vm460_vm5, %v5406_v56  ;;  %530 = vst.msk [vmem:[#allocation2 + $0x228] sm:$0xff] %vm460_vm5, %v5406_v56 }
 0x522   : > { %531 = vst.msk [vmem:[#allocation2 + $0x230] sm:$0xff] %vm460_vm5, %v5406_v56  ;;  %532 = vst.msk [vmem:[#allocation2 + $0x238] sm:$0xff] %vm460_vm5, %v5406_v56 }
 0x523   : > { %533 = vst.msk [vmem:[#allocation2 + $0x240] sm:$0xff] %vm460_vm5, %v5406_v56  ;;  %534 = vst.msk [vmem:[#allocation2 + $0x248] sm:$0xff] %vm460_vm5, %v5406_v56 }
 0x524   : > { %535 = vst.msk [vmem:[#allocation2 + $0x250] sm:$0xff] %vm460_vm5, %v5406_v56  ;;  %536 = vst.msk [vmem:[#allocation2 + $0x258] sm:$0xff] %vm460_vm5, %v5406_v56 }
 0x525   : > { %537 = vst.msk [vmem:[#allocation2 + $0x260] sm:$0xff] %vm460_vm5, %v5406_v56  ;;  %538 = vst.msk [vmem:[#allocation2 + $0x268] sm:$0xff] %vm460_vm5, %v5406_v56 }
 0x526   : > { %539 = vst.msk [vmem:[#allocation2 + $0x270] sm:$0xff] %vm460_vm5, %v5406_v56  ;;  %540 = vst.msk [vmem:[#allocation2 + $0x278] sm:$0xff] %vm460_vm5, %v5406_v56 }
 0x527   : > { %541 = vst.msk [vmem:[#allocation2 + $0x280] sm:$0xff] %vm460_vm5, %v5406_v56  ;;  %542 = vst.msk [vmem:[#allocation2 + $0x288] sm:$0xff] %vm460_vm5, %v5406_v56 }
 0x528   : > { %543 = vst.msk [vmem:[#allocation2 + $0x290] sm:$0xff] %vm460_vm5, %v5406_v56  ;;  %544 = vst.msk [vmem:[#allocation2 + $0x298] sm:$0xff] %vm460_vm5, %v5406_v56 }
 0x529   : > { %545 = vst.msk [vmem:[#allocation2 + $0x2a0] sm:$0xff] %vm460_vm5, %v5406_v56  ;;  %546 = vst.msk [vmem:[#allocation2 + $0x2a8] sm:$0xff] %vm460_vm5, %v5406_v56 }
 0x52a   : > { %547 = vst.msk [vmem:[#allocation2 + $0x2b0] sm:$0xff] %vm460_vm5, %v5406_v56  ;;  %548 = vst.msk [vmem:[#allocation2 + $0x2b8] sm:$0xff] %vm460_vm5, %v5406_v56 }
 0x52b   : > { %549 = vst.msk [vmem:[#allocation2 + $0x2c0] sm:$0xff] %vm460_vm5, %v5406_v56  ;;  %550 = vst.msk [vmem:[#allocation2 + $0x2c8] sm:$0xff] %vm460_vm5, %v5406_v56 }
 0x52c   : > { %551 = vst.msk [vmem:[#allocation2 + $0x2d0] sm:$0xff] %vm460_vm5, %v5406_v56  ;;  %552 = vst.msk [vmem:[#allocation2 + $0x2d8] sm:$0xff] %vm460_vm5, %v5406_v56 }
 0x52d   : > { %553 = vst.msk [vmem:[#allocation2 + $0x2e0] sm:$0xff] %vm460_vm5, %v5406_v56  ;;  %554 = vst.msk [vmem:[#allocation2 + $0x2e8] sm:$0xff] %vm460_vm5, %v5406_v56 }
 0x52e   : > { %555 = vst.msk [vmem:[#allocation2 + $0x2f0] sm:$0xff] %vm460_vm5, %v5406_v56  ;;  %556 = vst.msk [vmem:[#allocation2 + $0x2f8] sm:$0xff] %vm460_vm5, %v5406_v56 }
 0x52f   : > { %557 = vst.msk [vmem:[#allocation2 + $0x300] sm:$0xff] %vm460_vm5, %v5406_v56  ;;  %558 = vst.msk [vmem:[#allocation2 + $0x308] sm:$0xff] %vm460_vm5, %v5406_v56 }
 0x530   : > { %559 = vst.msk [vmem:[#allocation2 + $0x310] sm:$0xff] %vm460_vm5, %v5406_v56  ;;  %560 = vst.msk [vmem:[#allocation2 + $0x318] sm:$0xff] %vm460_vm5, %v5406_v56 }
 0x531   : > { %561 = vst.msk [vmem:[#allocation2 + $0x320] sm:$0xff] %vm460_vm5, %v5406_v56  ;;  %562 = vst.msk [vmem:[#allocation2 + $0x328] sm:$0xff] %vm460_vm5, %v5406_v56 }
 0x532   : > { %563 = vst.msk [vmem:[#allocation2 + $0x330] sm:$0xff] %vm460_vm5, %v5406_v56  ;;  %564 = vst.msk [vmem:[#allocation2 + $0x338] sm:$0xff] %vm460_vm5, %v5406_v56 }
 0x533   : > { %565 = vst.msk [vmem:[#allocation2 + $0x340] sm:$0xff] %vm460_vm5, %v5406_v56  ;;  %566 = vst.msk [vmem:[#allocation2 + $0x348] sm:$0xff] %vm460_vm5, %v5406_v56 }
 0x534   : > { %567 = vst.msk [vmem:[#allocation2 + $0x350] sm:$0xff] %vm460_vm5, %v5406_v56  ;;  %568 = vst.msk [vmem:[#allocation2 + $0x358] sm:$0xff] %vm460_vm5, %v5406_v56 }
 0x535   : > { %569 = vst.msk [vmem:[#allocation2 + $0x360] sm:$0xff] %vm460_vm5, %v5406_v56  ;;  %570 = vst.msk [vmem:[#allocation2 + $0x368] sm:$0xff] %vm460_vm5, %v5406_v56 }
 0x536   : > { %571 = vst.msk [vmem:[#allocation2 + $0x370] sm:$0xff] %vm460_vm5, %v5406_v56  ;;  %572 = vst.msk [vmem:[#allocation2 + $0x378] sm:$0xff] %vm460_vm5, %v5406_v56 }
 0x537   : > { %573 = vst.msk [vmem:[#allocation2 + $0x380] sm:$0xff] %vm460_vm5, %v5406_v56  ;;  %574 = vst.msk [vmem:[#allocation2 + $0x388] sm:$0xff] %vm460_vm5, %v5406_v56 }
 0x538   : > { %575 = vst.msk [vmem:[#allocation2 + $0x390] sm:$0xff] %vm460_vm5, %v5406_v56  ;;  %576 = vst.msk [vmem:[#allocation2 + $0x398] sm:$0xff] %vm460_vm5, %v5406_v56 }
 0x539   : > { %577 = vst.msk [vmem:[#allocation2 + $0x3a0] sm:$0xff] %vm460_vm5, %v5406_v56  ;;  %578 = vst.msk [vmem:[#allocation2 + $0x3a8] sm:$0xff] %vm460_vm5, %v5406_v56 }
 0x53a   : > { %579 = vst.msk [vmem:[#allocation2 + $0x3b0] sm:$0xff] %vm460_vm5, %v5406_v56  ;;  %580 = vst.msk [vmem:[#allocation2 + $0x3b8] sm:$0xff] %vm460_vm5, %v5406_v56 }
 0x53b   : > { %581 = vst.msk [vmem:[#allocation2 + $0x3c0] sm:$0xff] %vm460_vm5, %v5406_v56  ;;  %582 = vst.msk [vmem:[#allocation2 + $0x3c8] sm:$0xff] %vm460_vm5, %v5406_v56 }
 0x53c   : > { %583 = vst.msk [vmem:[#allocation2 + $0x3d0] sm:$0xff] %vm460_vm5, %v5406_v56  ;;  %584 = vst.msk [vmem:[#allocation2 + $0x3d8] sm:$0xff] %vm460_vm5, %v5406_v56 }
 0x53d   : > { %585 = vst.msk [vmem:[#allocation2 + $0x3e0] sm:$0xff] %vm460_vm5, %v5406_v56  ;;  %586 = vst.msk [vmem:[#allocation2 + $0x3e8] sm:$0xff] %vm460_vm5, %v5406_v56 }
 0x53e   : > { %587 = vst.msk [vmem:[#allocation2 + $0x3f0] sm:$0xff] %vm460_vm5, %v5406_v56  ;;  %588 = vst.msk [vmem:[#allocation2 + $0x3f8] sm:$0xff] %vm460_vm5, %v5406_v56  ;;  %v2679_v56 = vmul.f32 0.2, %v6932_v1 }
 0x53f   : > { %8270 = vst [vmem:[#allocation61_spill] sm:$0xff] %v7207_v15  ;;  %8273 = vst [vmem:[#allocation4_spill] sm:$0xff] %v7223_v12  ;;  %v3780_v15 = vpop.permute.xlu0 %3779  ;;  %v7253_v12 = vpop.f32.mrb[59].mxu0 }
 0x540   : > { %8275 = vst [vmem:[#allocation9_spill] sm:$0xff] %v7230_v40  ;;  %v2711_v8 = vmax.f32 %v6932_v1, %v2679_v56  ;;  %v2714_v1 = vmax.f32 %v2622_v13, %v2682_v63  ;;  %v1942_v56 = vmul.f32 0.2, %v1876_v4  ;;  %8276 = vst [vmem:[#allocation62_spill] sm:$0xff] %v7248_v0  ;;  %v8277_v40 = vld [vmem:[#allocation8_spill] sm:$0xff]  ;;  %v1900_v0 = vadd.f32 %v6816_v43, %v6442_v35  ;;  %v7268_v21 = vpop.f32.mrb[60].mxu0 }
 0x541   : > { %v1887_v29 = vadd.f32 %v6794_v2, %v8277_v40  ;;  %8278 = vst [vmem:[#allocation8_spill] sm:$0xff] %v7255_v54  ;;  %v2680_v13 = vmul.f32 0.2, %v2614_v49  ;;  %8279 = vst [vmem:[#allocation63_spill] sm:$0xff] %v7263_v61  ;;  %v2709_v2 = vmax.f32 %v2601_v57, %v2677_v5  ;;  %v2625_v54 = vadd.f32 %v6796_v44, %v6580_v34  ;;  %v7272_v43 = vpop.f32.mrb[61].mxu0  ;;  %v8281_v61 = vld [vmem:[#allocation7_spill] sm:$0xff] }
 0x542   : > { %v2781_v39 = vsel %vm942_vm4, %v2711_v8, -inf  ;;  %v1974_v63 = vmax.f32 %v1876_v4, %v1942_v56  ;;  %v2790_v26 = vsel %vm942_vm4, %v2714_v1, -inf  ;;  %v2037_v8 = vsel %vm942_vm4, %v1971_v32, -inf  ;;  %v7270_v4 = vpop.f32.mrb[68].mxu1 }
 0x543   : > { %2782 = vmax.xlane.f32.xlu0 %v2781_v39  ;;  %v7261_v3 = vpop.permute.xlu0 %3789  ;;  %v1945_v40 = vmul.f32 0.2, %v1887_v29  ;;  %2791 = vmax.xlane.f32.xlu1 %v2790_v26  ;;  %v2712_v35 = vmax.f32 %v2614_v49, %v2680_v13  ;;  %v4055_v1 = vpop.f32.mrb[69].mxu1  ;;  %v1948_v56 = vmul.f32 0.2, %v1900_v0  ;;  %v2638_v57 = vadd.f32 %v6818_v42, %v6616_v9 }
 0x544   : > { %v7276_v5 = vadd.f32 %v4055_v1, %v3780_v15  ;;  %v7278_v39 = vpop.f32.mrb[62].mxu0  ;;  %v7280_v34 = vpop.f32.mrb[70].mxu1  ;;  %v2046_v44 = vsel %vm942_vm4, %v1974_v63, -inf  ;;  %v2683_v26 = vmul.f32 0.2, %v2625_v54  ;;  %v1879_v49 = vadd.f32 %v6801_v10, %v8281_v61 }
 0x545   : > { %8280 = vst [vmem:[#allocation64_spill] sm:$0xff] %v7280_v34  ;;  %v1977_v32 = vmax.f32 %v1887_v29, %v1945_v40  ;;  %v7285_v13 = vpop.f32.mrb[63].mxu0  ;;  %v2775_v9 = vsel %vm942_vm4, %v2709_v2, -inf  ;;  %v1980_v42 = vmax.f32 %v1900_v0, %v1948_v56  ;;  %v2686_v15 = vmul.f32 0.2, %v2638_v57  ;;  %v7295_v40 = vpop.permute.xlu1 %3794 }
 0x546   : > { %8282 = vst [vmem:[#allocation7_spill] sm:$0xff] %v7285_v13  ;;  %v1892_v1 = vadd.f32 %v6820_v30, %v6428_v33  ;;  %v2784_v63 = vsel %vm942_vm4, %v2712_v35, -inf  ;;  %v2715_v10 = vmax.f32 %v2625_v54, %v2683_v26  ;;  %v1943_v61 = vmul.f32 0.2, %v1879_v49 }
 0x547   : > { %2038 = vmax.xlane.f32.xlu0 %v2037_v8  ;;  %v7287_v8 = vpop.f32.mrb[71].mxu1  ;;  %2047 = vmax.xlane.f32.xlu1 %v2046_v44  ;;  %v7293_v29 = vpop.permute.xlu0 %3799  ;;  %v2055_v2 = vsel %vm942_vm4, %v1977_v32, -inf  ;;  %v2718_v35 = vmax.f32 %v2638_v57, %v2686_v15  ;;  %v2630_v54 = vadd.f32 %v6822_v17, %v6612_v50  ;;  %v8289_v15 = vld [vmem:[#allocation16_spill] sm:$0xff] }
 0x548   : > { %8283 = vst [vmem:[#allocation65_spill] sm:$0xff] %v7287_v8  ;;  %v2617_v8 = vadd.f32 %v6803_v16, %v6564_v14  ;;  %v7300_v44 = vpop.f32.mrb[64].mxu0  ;;  %v7302_v0 = vpop.f32.mrb[72].mxu1  ;;  %v1946_v56 = vmul.f32 0.2, %v1892_v1  ;;  %v2064_v14 = vsel %vm942_vm4, %v1980_v42, -inf  ;;  %v1975_v32 = vmax.f32 %v1879_v49, %v1943_v61 }
 0x549   : > { %v7304_v33 = vpop.f32.mrb[65].mxu0  ;;  %v7306_v30 = vpop.f32.mrb[73].mxu1  ;;  %v2793_v57 = vsel %vm942_vm4, %v2715_v10, -inf  ;;  %v2684_v17 = vmul.f32 0.2, %v2630_v54  ;;  %v2802_v42 = vsel %vm942_vm4, %v2718_v35, -inf }
 0x54a   : > { %v7310_v26 = vpop.f32.mrb[66].mxu0  ;;  %v7312_v16 = vpop.f32.mrb[74].mxu1  ;;  %v1978_v50 = vmax.f32 %v1892_v1, %v1946_v56  ;;  %v2049_v10 = vsel %vm942_vm4, %v1975_v32, -inf }
 0x54b   : > { %2776 = vmax.xlane.f32.xlu0 %v2775_v9  ;;  %2785 = vmax.xlane.f32.xlu1 %v2784_v63  ;;  %8284 = vst [vmem:[#allocation66_spill] sm:$0xff] %v7310_v26  ;;  %8285 = vst [vmem:[#allocation67_spill] sm:$0xff] %v7312_v16  ;;  %v2681_v9 = vmul.f32 0.2, %v2617_v8  ;;  %v8286_v63 = vld [vmem:[#allocation12_spill] sm:$0xff]  ;;  %v7317_v13 = vpop.f32.mrb[67].mxu0  ;;  %v1916_v16 = vadd.f32 %v6847_v7, %v8289_v15  ;;  %v7325_v49 = vpop.permute.xlu0 %3809  ;;  %v2716_v56 = vmax.f32 %v2630_v54, %v2684_v17 }
 0x54c   : > { %8287 = vst [vmem:[#allocation12_spill] sm:$0xff] %v7317_v13  ;;  %v7319_v34 = vpop.f32.mrb[75].mxu1  ;;  %v7327_v61 = vpop.permute.xlu1 %3804  ;;  %v8291_v13 = vld [vmem:[#allocation18_spill] sm:$0xff]  ;;  %v8293_v15 = vld [vmem:[#allocation24_spill] sm:$0xff] }
 0x54d   : > { %8288 = vst [vmem:[#allocation68_spill] sm:$0xff] %v7319_v34  ;;  %8290 = vst [vmem:[#allocation16_spill] sm:$0xff] %v7327_v61  ;;  %v2641_v34 = vadd.f32 %v6826_v62, %v8291_v13  ;;  %v7334_v1 = vpop.f32.mrb[76].mxu1  ;;  %v2058_v13 = vsel %vm942_vm4, %v1978_v50, -inf  ;;  %v8296_v61 = vld [vmem:[#allocation10_spill] sm:$0xff]  ;;  %v2796_v50 = vsel %vm942_vm4, %v2716_v56, -inf }
 0x54e   : > { %v7338_v35 = vpop.f32.mrb[77].mxu1 }
 0x54f   : > { %2056 = vmax.xlane.f32.xlu0 %v2055_v2  ;;  %v1903_v2 = vadd.f32 %v6824_v36, %v8286_v63  ;;  %2065 = vmax.xlane.f32.xlu1 %v2064_v14  ;;  %v2713_v36 = vmax.f32 %v2617_v8, %v2681_v9  ;;  %v7332_v14 = vpop.f32.mrb[68].mxu0  ;;  %v2654_v8 = vadd.f32 %v6849_v52, %v8293_v15  ;;  %v7344_v62 = vpop.f32.mrb[78].mxu1  ;;  %v8299_v15 = vld [vmem:[#allocation15_spill] sm:$0xff] }
 0x550   : > { %v7336_v7 = vpop.f32.mrb[69].mxu0  ;;  %8295 = vst [vmem:[#allocation69_spill] sm:$0xff] %v7344_v62  ;;  %v1908_v62 = vadd.f32 %v6851_v24, %v8299_v15  ;;  %v8303_v15 = vld [vmem:[#allocation22_spill] sm:$0xff] }
 0x551   : > { %v1949_v63 = vmul.f32 0.2, %v1903_v2  ;;  %8292 = vst [vmem:[#allocation18_spill] sm:$0xff] %v7336_v7  ;;  %v7342_v9 = vpop.f32.mrb[70].mxu0  ;;  %v7351_v7 = vpop.f32.mrb[79].mxu1  ;;  %v2787_v54 = vsel %vm942_vm4, %v2713_v36, -inf }
 0x552   : > { %8294 = vst [vmem:[#allocation24_spill] sm:$0xff] %v7342_v9  ;;  %v7349_v26 = vpop.f32.mrb[71].mxu0  ;;  %8298 = vst [vmem:[#allocation70_spill] sm:$0xff] %v7351_v7  ;;  %v2690_v17 = vmul.f32 0.2, %v2654_v8  ;;  %v8306_v9 = vld [vmem:[#allocation14_spill] sm:$0xff] }
 0x553   : > { %2794 = vmax.xlane.f32.xlu0 %v2793_v57  ;;  %2803 = vmax.xlane.f32.xlu1 %v2802_v42  ;;  %v1952_v57 = vmul.f32 0.2, %v1916_v16  ;;  %v1981_v32 = vmax.f32 %v1903_v2, %v1949_v63  ;;  %v2687_v42 = vmul.f32 0.2, %v2641_v34  ;;  %8297 = vst [vmem:[#allocation10_spill] sm:$0xff] %v7349_v26  ;;  %v7357_v2 = vpop.permute.xlu0 %3819  ;;  %v7359_v63 = vpop.permute.xlu1 %3814  ;;  %v8300_v26 = vld [vmem:[#allocation17_spill] sm:$0xff] }
 0x554   : > { %v2633_v7 = vadd.f32 %v6833_v59, %v8300_v26 }
 0x555   : > { %v1984_v52 = vmax.f32 %v1916_v16, %v1952_v57  ;;  %v2067_v36 = vsel %vm942_vm4, %v1981_v32, -inf  ;;  %v7366_v16 = vpop.f32.mrb[80].mxu1  ;;  %v2722_v57 = vmax.f32 %v2654_v8, %v2690_v17 }
 0x556   : > { %8301 = vst [vmem:[#allocation15_spill] sm:$0xff] %v7366_v16  ;;  %v7370_v56 = vpop.f32.mrb[81].mxu1 }
 0x557   : > { %2050 = vmax.xlane.f32.xlu0 %v2049_v10  ;;  %v1895_v10 = vadd.f32 %v6831_v60, %v8296_v61  ;;  %2059 = vmax.xlane.f32.xlu1 %v2058_v13  ;;  %v2719_v60 = vmax.f32 %v2641_v34, %v2687_v42  ;;  %v7364_v13 = vpop.f32.mrb[72].mxu0  ;;  %v2646_v34 = vadd.f32 %v6853_v46, %v8303_v15  ;;  %v7376_v59 = vpop.f32.mrb[82].mxu1  ;;  %v2076_v26 = vsel %vm942_vm4, %v1984_v52, -inf }
 0x558   : > { %v7368_v24 = vpop.f32.mrb[73].mxu0  ;;  %8305 = vst [vmem:[#allocation71_spill] sm:$0xff] %v7376_v59  ;;  %v7386_v46 = vpop.permute.xlu1 %3824  ;;  %v8310_v59 = vld [vmem:[#allocation26_spill] sm:$0xff] }
 0x559   : > { %v1947_v61 = vmul.f32 0.2, %v1895_v10  ;;  %8302 = vst [vmem:[#allocation17_spill] sm:$0xff] %v7368_v24  ;;  %v7374_v42 = vpop.f32.mrb[74].mxu0  ;;  %v7383_v24 = vpop.f32.mrb[83].mxu1  ;;  %v2805_v8 = vsel %vm942_vm4, %v2719_v60, -inf  ;;  %v3274_v52 = vadd.f32 %v6908_v58, %v8310_v59 }
 0x55a   : > { %8304 = vst [vmem:[#allocation22_spill] sm:$0xff] %v7374_v42  ;;  %v7381_v16 = vpop.f32.mrb[75].mxu0  ;;  %8308 = vst [vmem:[#allocation72_spill] sm:$0xff] %v7383_v24  ;;  %v2688_v15 = vmul.f32 0.2, %v2646_v34  ;;  %v8312_v42 = vld [vmem:[#allocation60_spill] sm:$0xff] }
 0x55b   : > { %2788 = vmax.xlane.f32.xlu0 %v2787_v54  ;;  %2797 = vmax.xlane.f32.xlu1 %v2796_v50  ;;  %v1950_v54 = vmul.f32 0.2, %v1908_v62  ;;  %v1979_v32 = vmax.f32 %v1895_v10, %v1947_v61  ;;  %v2685_v50 = vmul.f32 0.2, %v2633_v7  ;;  %8307 = vst [vmem:[#allocation14_spill] sm:$0xff] %v7381_v16  ;;  %8309 = vst [vmem:[#allocation73_spill] sm:$0xff] %v7386_v46  ;;  %v7391_v61 = vpop.permute.xlu0 %3829 }
 0x55c   : > { %v2814_v10 = vsel %vm942_vm4, %v2722_v57, -inf  ;;  %v8311_v16 = vld [vmem:[#allocation20_spill] sm:$0xff]  ;;  %v2720_v57 = vmax.f32 %v2646_v34, %v2688_v15  ;;  %v8315_v59 = vld [vmem:[#allocation55_spill] sm:$0xff]  ;;  %v8318_v46 = vld [vmem:[#allocation13_spill] sm:$0xff]  ;;  %v7418_v15 = vpop.permute.xlu1 %3834 }
 0x55d   : > { %v1982_v17 = vmax.f32 %v1908_v62, %v1950_v54  ;;  %v2657_v24 = vadd.f32 %v8312_v42, %v8311_v16  ;;  %v2061_v60 = vsel %vm942_vm4, %v1979_v32, -inf  ;;  %v3398_v54 = vmul.f32 0.2, %v3274_v52 }
 0x55f   : > { %2068 = vmax.xlane.f32.xlu0 %v2067_v36  ;;  %v1919_v36 = vadd.f32 %v6858_v51, %v8306_v9  ;;  %2077 = vmax.xlane.f32.xlu1 %v2076_v26  ;;  %v2717_v51 = vmax.f32 %v2633_v7, %v2685_v50  ;;  %v7396_v26 = vpop.f32.mrb[76].mxu0  ;;  %v4011_v7 = vadd.f32 %v6910_v53, %v8315_v59  ;;  %v2070_v42 = vsel %vm942_vm4, %v1982_v17, -inf }
 0x560   : > { %v7400_v62 = vpop.f32.mrb[77].mxu0  ;;  %v3430_v53 = vmax.f32 %v3274_v52, %v3398_v54 }
 0x561   : > { %v1953_v9 = vmul.f32 0.2, %v1919_v36  ;;  %8314 = vst [vmem:[#allocation20_spill] sm:$0xff] %v7400_v62  ;;  %v7406_v50 = vpop.f32.mrb[78].mxu0  ;;  %v2799_v34 = vsel %vm942_vm4, %v2717_v51, -inf }
 0x562   : > { %8316 = vst [vmem:[#allocation60_spill] sm:$0xff] %v7406_v50  ;;  %v4135_v59 = vmul.f32 0.2, %v4011_v7 }
 0x563   : > { %2806 = vmax.xlane.f32.xlu0 %v2805_v8  ;;  %2815 = vmax.xlane.f32.xlu1 %v2814_v10  ;;  %v7398_v8 = vpop.f32.mrb[84].mxu1  ;;  %v1985_v32 = vmax.f32 %v1919_v36, %v1953_v9  ;;  %v2691_v10 = vmul.f32 0.2, %v2657_v24  ;;  %v2808_v36 = vsel %vm942_vm4, %v2720_v57, -inf  ;;  %v7423_v9 = vpop.permute.xlu0 %3839  ;;  %v3464_v57 = vsel %vm942_vm4, %v3430_v53, -inf }
 0x564   : > { %8313 = vst [vmem:[#allocation26_spill] sm:$0xff] %v7398_v8  ;;  %v7402_v58 = vpop.f32.mrb[85].mxu1  ;;  %v7413_v8 = vpop.f32.mrb[79].mxu0  ;;  %v4167_v52 = vmax.f32 %v4011_v7, %v4135_v59  ;;  %v8325_v7 = vld [vmem:[#allocation28_spill] sm:$0xff] }
 0x565   : > { %v7408_v16 = vpop.f32.mrb[86].mxu1  ;;  %8319 = vst [vmem:[#allocation13_spill] sm:$0xff] %v7413_v8  ;;  %v8322_v8 = vld [vmem:[#allocation19_spill] sm:$0xff]  ;;  %v2079_v51 = vsel %vm942_vm4, %v1985_v32, -inf  ;;  %v3287_v59 = vadd.f32 %v6939_v22, %v8325_v7 }
 0x566   : > { %8317 = vst [vmem:[#allocation55_spill] sm:$0xff] %v7408_v16  ;;  %v7415_v62 = vpop.f32.mrb[87].mxu1  ;;  %v8321_v16 = vld [vmem:[#allocation30_spill] sm:$0xff] }
 0x567   : > { %2062 = vmax.xlane.f32.xlu0 %v2061_v60  ;;  %v1911_v60 = vadd.f32 %v6865_v31, %v8318_v46  ;;  %8320 = vst [vmem:[#allocation74_spill] sm:$0xff] %v7415_v62  ;;  %2071 = vmax.xlane.f32.xlu1 %v2070_v42  ;;  %v3295_v17 = vadd.f32 %v6935_v11, %v8321_v16  ;;  %v7428_v42 = vpop.permute.xlu1 %3844 }
 0x568   : > { %v2723_v31 = vmax.f32 %v2657_v24, %v2691_v10  ;;  %v2649_v62 = vadd.f32 %v6867_v18, %v8322_v8  ;;  %v8324_v24 = vld [vmem:[#allocation23_spill] sm:$0xff]  ;;  %v7436_v8 = vpop.permute.xlu0 %3849 }
 0x569   : > { %v1951_v46 = vmul.f32 0.2, %v1911_v60  ;;  %v3403_v54 = vmul.f32 0.2, %v3295_v17  ;;  %v3279_v10 = vadd.f32 %v6882_v28, %v8324_v24 }
 0x56a   : > { %v2689_v50 = vmul.f32 0.2, %v2649_v62  ;;  %v2817_v18 = vsel %vm942_vm4, %v2723_v31, -inf  ;;  %v8327_v31 = vld [vmem:[#allocation57_spill] sm:$0xff] }
 0x56b   : > { %2800 = vmax.xlane.f32.xlu0 %v2799_v34  ;;  %2809 = vmax.xlane.f32.xlu1 %v2808_v36  ;;  %v8323_v34 = vld [vmem:[#allocation58_spill] sm:$0xff]  ;;  %v1983_v16 = vmax.f32 %v1911_v60, %v1951_v46  ;;  %v3435_v32 = vmax.f32 %v3295_v17, %v3403_v54  ;;  %v3399_v53 = vmul.f32 0.2, %v3279_v10  ;;  %v8326_v60 = vld [vmem:[#allocation56_spill] sm:$0xff]  ;;  %v4024_v17 = vadd.f32 %v6941_v27, %v8327_v31 }
 0x56c   : > { %v4032_v11 = vadd.f32 %v6937_v23, %v8323_v34  ;;  %v4201_v23 = vsel %vm942_vm4, %v4167_v52, -inf  ;;  %v4016_v46 = vadd.f32 %v6884_v25, %v8326_v60  ;;  %v7444_v34 = vpop.permute.xlu1 %3854  ;;  %v7449_v24 = vpop.permute.xlu0 %3859  ;;  %v8328_v52 = vld [vmem:[#allocation21_spill] sm:$0xff]  ;;  %v8329_v27 = vld [vmem:[#allocation34_spill] sm:$0xff] }
 0x56d   : > { %v2073_v28 = vsel %vm942_vm4, %v1983_v16, -inf  ;;  %v3479_v22 = vsel %vm942_vm4, %v3435_v32, -inf  ;;  %v3271_v25 = vadd.f32 %v6890_v47, %v8328_v52 }
 0x56e   : > { %v4140_v36 = vmul.f32 0.2, %v4032_v11 }
 0x56f   : > { %2080 = vmax.xlane.f32.xlu0 %v2079_v51  ;;  %3465 = vmax.xlane.f32.xlu1 %v3464_v57  ;;  %v2721_v51 = vmax.f32 %v2649_v62, %v2689_v50  ;;  %v3401_v57 = vmul.f32 0.2, %v3287_v59  ;;  %v3431_v62 = vmax.f32 %v3279_v10, %v3399_v53  ;;  %v4136_v50 = vmul.f32 0.2, %v4016_v46 }
 0x570   : > { %v4172_v54 = vmax.f32 %v4032_v11, %v4140_v36  ;;  %v7454_v7 = vpop.permute.xlu1 %3864  ;;  %v3311_v11 = vadd.f32 %v7236_v37, %v8329_v27  ;;  %v3397_v60 = vmul.f32 0.2, %v3271_v25  ;;  %v7460_v47 = vpop.permute.xlu0 %3869  ;;  %v4134_v37 = vmul.f32 0.2, %v6896_v20 }
 0x571   : > { %v2811_v16 = vsel %vm942_vm4, %v2721_v51, -inf  ;;  %v4168_v36 = vmax.f32 %v4016_v46, %v4136_v50  ;;  %v3467_v10 = vsel %vm942_vm4, %v3431_v62, -inf  ;;  %v2084_v62 = vld [vmem:[#allocation2 + $0x10] sm:$0xff] }
 0x572   : > { %v4216_v32 = vsel %vm942_vm4, %v4172_v54, -inf  ;;  %v3407_v51 = vmul.f32 0.2, %v3311_v11  ;;  %v3429_v31 = vmax.f32 %v3271_v25, %v3397_v60  ;;  %v8331_v54 = vld [vmem:[#allocation6_spill] sm:$0xff]  ;;  %v4166_v27 = vmax.f32 %v6896_v20, %v4134_v37  ;;  %v2822_v60 = vld [vmem:[#allocation2 + $0x110] sm:$0xff]  ;;  %v2821_v37 = vld [vmem:[#allocation2 + $0x108] sm:$0xff] }
 0x573   : > { %2818 = vmax.xlane.f32.xlu0 %v2817_v18  ;;  %4202 = vmax.xlane.f32.xlu1 %v4201_v23  ;;  %v4138_v18 = vmul.f32 0.2, %v4024_v17  ;;  %v3433_v23 = vmax.f32 %v3287_v59, %v3401_v57  ;;  %v8330_v57 = vld [vmem:[#allocation25_spill] sm:$0xff] }
 0x574   : > { %v3282_v46 = vadd.f32 %v8331_v54, %v8330_v57  ;;  %v7469_v50 = vpop.permute.xlu1 %3874 }
 0x575   : > { %v4170_v53 = vmax.f32 %v4024_v17, %v4138_v18  ;;  %v3473_v59 = vsel %vm942_vm4, %v3433_v23, -inf  ;;  %v1994_v17 = vpop.xlane.xlu0 %1993  ;;  %v2083_v23 = vld [vmem:[#allocation2 + $0x8] sm:$0xff] }
 0x576   : > { %v2116_v18 = vmax.f32 %v2084_v62, %v1994_v17  ;;  %v8335_v17 = vld [vmem:[#allocation29_spill] sm:$0xff] }
 0x577   : > { %2074 = vmax.xlane.f32.xlu0 %v2073_v28  ;;  %3480 = vmax.xlane.f32.xlu1 %v3479_v22  ;;  %v4048_v28 = vadd.f32 %v7238_v19, %v6923_v38  ;;  %v4204_v22 = vsel %vm942_vm4, %v4168_v36, -inf  ;;  %v4210_v52 = vsel %vm942_vm4, %v4170_v53, -inf  ;;  %v8332_v19 = vld [vmem:[#allocation32_spill] sm:$0xff]  ;;  %v3461_v36 = vsel %vm942_vm4, %v3429_v31, -inf  ;;  %v8333_v53 = vld [vmem:[#allocation3_spill] sm:$0xff]  ;;  %v8334_v31 = vld [vmem:[#allocation5_spill] sm:$0xff] }
 0x578   : > { %v3303_v25 = vadd.f32 %v7242_v55, %v8332_v19  ;;  %2149 = vst.msk [vmem:[#allocation2 + $0x10] sm:$0xff] %vm460_vm5, %v2116_v18  ;;  %v4137_v62 = vmul.f32 0.2, %v8334_v31  ;;  %v2082_v18 = vld [vmem:[#allocation2] sm:$0xff] }
 0x579   : > { %v4144_v38 = vmul.f32 0.2, %v4048_v28 }
 0x57a   : > { %v3405_v57 = vmul.f32 0.2, %v3303_v25 }
 0x57b   : > { %2812 = vmax.xlane.f32.xlu0 %v2811_v16  ;;  %4217 = vmax.xlane.f32.xlu1 %v4216_v32  ;;  %v3439_v16 = vmax.f32 %v3311_v11, %v3407_v51  ;;  %v3400_v32 = vmul.f32 0.2, %v3282_v46  ;;  %v7479_v11 = vadd.f32 %v7244_v45, %v8333_v53  ;;  %v4176_v55 = vmax.f32 %v4048_v28, %v4144_v38 }
 0x57c   : > { %v4198_v45 = vsel %vm942_vm4, %v4166_v27, -inf  ;;  %v4169_v53 = vmax.f32 %v8334_v31, %v4137_v62  ;;  %v7513_v31 = vadd.f32 %v7270_v4, %v7261_v3  ;;  %v2085_v4 = vld [vmem:[#allocation2 + $0x18] sm:$0xff] }
 0x57d   : > { %v3491_v20 = vsel %vm942_vm4, %v3439_v16, -inf }
 0x57e   : > { %v4207_v3 = vsel %vm942_vm4, %v4169_v53, -inf }
 0x57f   : > { %3468 = vmax.xlane.f32.xlu0 %v3467_v10  ;;  %3474 = vmax.xlane.f32.xlu1 %v3473_v59  ;;  %v1991_v10 = vpop.xlane.xlu1 %1990  ;;  %v2732_v59 = vpop.xlane.xlu0 %2731 }
 0x580   : > { %v2115_v51 = vmax.f32 %v2083_v23, %v1991_v10  ;;  %v2854_v54 = vmax.f32 %v2822_v60, %v2732_v59  ;;  %v3437_v23 = vmax.f32 %v3303_v25, %v3405_v57  ;;  %v4228_v60 = vsel %vm942_vm4, %v4176_v55, -inf  ;;  %v2088_v10 = vld [vmem:[#allocation2 + $0x30] sm:$0xff] }
 0x581   : > { %v4395_v59 = vld [vmem:[#allocation2 + $0x10] sm:$0xff] }
 0x582   : > { %2148 = vst.msk [vmem:[#allocation2 + $0x8] sm:$0xff] %vm460_vm5, %v2115_v51  ;;  %2886 = vst.msk [vmem:[#allocation2 + $0x110] sm:$0xff] %vm460_vm5, %v2854_v54 }
 0x583   : > { %4205 = vmax.xlane.f32.xlu0 %v4204_v22  ;;  %4211 = vmax.xlane.f32.xlu1 %v4210_v52  ;;  %v3432_v22 = vmax.f32 %v3282_v46, %v3400_v32  ;;  %v8336_v52 = vld [vmem:[#allocation61_spill] sm:$0xff]  ;;  %v2729_v28 = vpop.xlane.xlu1 %2728  ;;  %v4142_v46 = vmul.f32 0.2, %v7479_v11  ;;  %v1988_v38 = vpop.xlane.xlu0 %1987  ;;  %v8337_v32 = vld [vmem:[#allocation38_spill] sm:$0xff]  ;;  %4523 = vst.msk [vmem:[%s7494_s17 + $0x10] sm:$0xff] %vm460_vm5, %v4395_v59 }
 0x584   : > { %v7486_v19 = vadd.f32 %v8336_v52, %v8335_v17  ;;  %v2853_v16 = vmax.f32 %v2821_v37, %v2729_v28  ;;  %v2114_v27 = vmax.f32 %v2082_v18, %v1988_v38  ;;  %v3485_v17 = vsel %vm942_vm4, %v3437_v23, -inf  ;;  %v2826_v52 = vld [vmem:[#allocation2 + $0x130] sm:$0xff]  ;;  %v8338_v28 = vld [vmem:[#allocation27_spill] sm:$0xff] }
 0x585   : > { %v3470_v54 = vsel %vm942_vm4, %v3432_v22, -inf  ;;  %v4174_v25 = vmax.f32 %v7479_v11, %v4142_v46  ;;  %v4141_v18 = vmul.f32 0.2, %v7219_v41  ;;  %v7520_v11 = vadd.f32 %v7221_v48, %v8338_v28 }
 0x586   : > { %v3404_v51 = vmul.f32 0.2, %v7486_v19  ;;  %2885 = vst.msk [vmem:[#allocation2 + $0x108] sm:$0xff] %vm460_vm5, %v2853_v16  ;;  %2147 = vst.msk [vmem:[#allocation2] sm:$0xff] %vm460_vm5, %v2114_v27  ;;  %v8339_v27 = vld [vmem:[#allocation36_spill] sm:$0xff] }
 0x587   : > { %3462 = vmax.xlane.f32.xlu0 %v3461_v36  ;;  %3492 = vmax.xlane.f32.xlu1 %v3491_v20  ;;  %v7499_v36 = vadd.f32 %v7268_v21, %v8337_v32  ;;  %v2820_v20 = vld [vmem:[#allocation2 + $0x100] sm:$0xff]  ;;  %v2006_v21 = vpop.xlane.xlu1 %2005  ;;  %v2726_v57 = vpop.xlane.xlu0 %2725  ;;  %v4222_v48 = vsel %vm942_vm4, %v4174_v25, -inf  ;;  %v4148_v32 = vmul.f32 0.2, %v7513_v31  ;;  %v4173_v59 = vmax.f32 %v7219_v41, %v4141_v18  ;;  %v2823_v25 = vld [vmem:[#allocation2 + $0x118] sm:$0xff] }
 0x588   : > { %v2120_v55 = vmax.f32 %v2088_v10, %v2006_v21  ;;  %v2852_v62 = vmax.f32 %v2820_v20, %v2726_v57  ;;  %v8340_v20 = vld [vmem:[#allocation59_spill] sm:$0xff]  ;;  %v8341_v21 = vld [vmem:[#allocation4_spill] sm:$0xff] }
 0x589   : > { %v3411_v37 = vmul.f32 0.2, %v7499_v36  ;;  %v4394_v22 = vld [vmem:[#allocation2 + $0x8] sm:$0xff]  ;;  %v4427_v46 = vld [vmem:[#allocation2 + $0x110] sm:$0xff] }
 0x58a   : > { %4522 = vst.msk [vmem:[%s7494_s17 + $0x8] sm:$0xff] %vm460_vm5, %v4394_v22  ;;  %2153 = vst.msk [vmem:[#allocation2 + $0x30] sm:$0xff] %vm460_vm5, %v2120_v55  ;;  %v7540_v55 = vadd.f32 %v8341_v21, %v8340_v20  ;;  %v4180_v22 = vmax.f32 %v7513_v31, %v4148_v32  ;;  %v4219_v31 = vsel %vm942_vm4, %v4173_v59, -inf  ;;  %v8343_v32 = vld [vmem:[#allocation42_spill] sm:$0xff]  ;;  %v2092_v59 = vld [vmem:[#allocation2 + $0x50] sm:$0xff] }
 0x58b   : > { %4199 = vmax.xlane.f32.xlu0 %v4198_v45  ;;  %4229 = vmax.xlane.f32.xlu1 %v4228_v60  ;;  %v3436_v45 = vmax.f32 %v7486_v19, %v3404_v51  ;;  %4555 = vst.msk [vmem:[%s7494_s17 + $0x110] sm:$0xff] %vm460_vm5, %v4427_v46  ;;  %2884 = vst.msk [vmem:[#allocation2 + $0x100] sm:$0xff] %vm460_vm5, %v2852_v62  ;;  %v2744_v19 = vpop.xlane.xlu1 %2743  ;;  %v1997_v38 = vpop.xlane.xlu0 %1996  ;;  %v3443_v23 = vmax.f32 %v7499_v36, %v3411_v37  ;;  %v2086_v51 = vld [vmem:[#allocation2 + $0x20] sm:$0xff]  ;;  %v8344_v21 = vld [vmem:[#allocation9_spill] sm:$0xff] }
 0x58c   : > { %v2858_v16 = vmax.f32 %v2826_v52, %v2744_v19  ;;  %v7534_v60 = vadd.f32 %v7272_v43, %v8339_v27  ;;  %v2117_v53 = vmax.f32 %v2085_v4, %v1997_v38  ;;  %v4139_v46 = vmul.f32 0.2, %v7540_v55 }
 0x58d   : > { %v4426_v10 = vld [vmem:[#allocation2 + $0x108] sm:$0xff]  ;;  %v4393_v36 = vld [vmem:[#allocation2] sm:$0xff]  ;;  %v3482_v43 = vsel %vm942_vm4, %v3436_v45, -inf  ;;  %v3503_v18 = vsel %vm942_vm4, %v3443_v23, -inf  ;;  %v4146_v38 = vmul.f32 0.2, %v7276_v5  ;;  %v7569_v27 = vadd.f32 %v7300_v44, %v8343_v32 }
 0x58e   : > { %4554 = vst.msk [vmem:[%s7494_s17 + $0x108] sm:$0xff] %vm460_vm5, %v4426_v10  ;;  %2890 = vst.msk [vmem:[#allocation2 + $0x130] sm:$0xff] %vm460_vm5, %v2858_v16  ;;  %v3409_v62 = vmul.f32 0.2, %v7534_v60  ;;  %v2824_v45 = vld [vmem:[#allocation2 + $0x120] sm:$0xff]  ;;  %v2089_v16 = vld [vmem:[#allocation2 + $0x38] sm:$0xff] }
 0x58f   : > { %3471 = vmax.xlane.f32.xlu0 %v3470_v54  ;;  %3486 = vmax.xlane.f32.xlu1 %v3485_v17  ;;  %v3402_v54 = vmul.f32 0.2, %v7520_v11  ;;  %4521 = vst.msk [vmem:[%s7494_s17] sm:$0xff] %vm460_vm5, %v4393_v36  ;;  %2150 = vst.msk [vmem:[#allocation2 + $0x18] sm:$0xff] %vm460_vm5, %v2117_v53  ;;  %v2000_v41 = vpop.xlane.xlu1 %1999  ;;  %v2735_v37 = vpop.xlane.xlu0 %2734  ;;  %v8345_v36 = vld [vmem:[#allocation62_spill] sm:$0xff] }
 0x590   : > { %v2118_v57 = vmax.f32 %v2086_v51, %v2000_v41  ;;  %v2855_v52 = vmax.f32 %v2823_v25, %v2735_v37  ;;  %v3441_v23 = vmax.f32 %v7534_v60, %v3409_v62  ;;  %v4240_v51 = vsel %vm942_vm4, %v4180_v22, -inf  ;;  %v2827_v25 = vld [vmem:[#allocation2 + $0x138] sm:$0xff] }
 0x591   : > { %v4399_v17 = vld [vmem:[#allocation2 + $0x30] sm:$0xff]  ;;  %v3434_v28 = vmax.f32 %v7520_v11, %v3402_v54  ;;  %v4171_v54 = vmax.f32 %v7540_v55, %v4139_v46  ;;  %v4178_v41 = vmax.f32 %v7276_v5, %v4146_v38  ;;  %v3415_v22 = vmul.f32 0.2, %v7569_v27 }
 0x592   : > { %4527 = vst.msk [vmem:[%s7494_s17 + $0x30] sm:$0xff] %vm460_vm5, %v4399_v17  ;;  %v4425_v19 = vld [vmem:[#allocation2 + $0x100] sm:$0xff]  ;;  %2151 = vst.msk [vmem:[#allocation2 + $0x20] sm:$0xff] %vm460_vm5, %v2118_v57  ;;  %v7589_v62 = vadd.f32 %v7302_v0, %v7325_v49  ;;  %v2087_v49 = vld [vmem:[#allocation2 + $0x28] sm:$0xff] }
 0x593   : > { %4208 = vmax.xlane.f32.xlu0 %v4207_v3  ;;  %4223 = vmax.xlane.f32.xlu1 %v4222_v48  ;;  %v8342_v3 = vld [vmem:[#allocation33_spill] sm:$0xff]  ;;  %4553 = vst.msk [vmem:[%s7494_s17 + $0x100] sm:$0xff] %vm460_vm5, %v4425_v19  ;;  %2887 = vst.msk [vmem:[#allocation2 + $0x118] sm:$0xff] %vm460_vm5, %v2855_v52  ;;  %v2738_v11 = vpop.xlane.xlu1 %2737  ;;  %v2009_v48 = vpop.xlane.xlu0 %2008  ;;  %v3476_v44 = vsel %vm942_vm4, %v3434_v28, -inf  ;;  %v4213_v0 = vsel %vm942_vm4, %v4171_v54, -inf  ;;  %v8349_v54 = vld [vmem:[#allocation8_spill] sm:$0xff] }
 0x594   : > { %v7556_v4 = vadd.f32 %v7246_v6, %v8342_v3  ;;  %v2856_v6 = vmax.f32 %v2824_v45, %v2738_v11  ;;  %v2121_v53 = vmax.f32 %v2089_v16, %v2009_v48  ;;  %v2830_v45 = vld [vmem:[#allocation2 + $0x150] sm:$0xff]  ;;  %v8346_v3 = vld [vmem:[#allocation31_spill] sm:$0xff]  ;;  %v3447_v11 = vmax.f32 %v7569_v27, %v3415_v22 }
 0x595   : > { %v4431_v10 = vld [vmem:[#allocation2 + $0x130] sm:$0xff]  ;;  %v7596_v5 = vadd.f32 %v7253_v12, %v8346_v3  ;;  %v4234_v12 = vsel %vm942_vm4, %v4178_v41, -inf  ;;  %v4152_v38 = vmul.f32 0.2, %v7589_v62  ;;  %v2828_v22 = vld [vmem:[#allocation2 + $0x140] sm:$0xff] }
 0x596   : > { %v3408_v20 = vmul.f32 0.2, %v7556_v4  ;;  %4559 = vst.msk [vmem:[%s7494_s17 + $0x130] sm:$0xff] %vm460_vm5, %v4431_v10  ;;  %v4396_v60 = vld [vmem:[#allocation2 + $0x18] sm:$0xff]  ;;  %2888 = vst.msk [vmem:[#allocation2 + $0x120] sm:$0xff] %vm460_vm5, %v2856_v6  ;;  %v8347_v6 = vld [vmem:[#allocation40_spill] sm:$0xff] }
 0x597   : > { %3483 = vmax.xlane.f32.xlu0 %v3482_v43  ;;  %3504 = vmax.xlane.f32.xlu1 %v3503_v18  ;;  %v7576_v43 = vadd.f32 %v8345_v36, %v8344_v21  ;;  %4524 = vst.msk [vmem:[%s7494_s17 + $0x18] sm:$0xff] %vm460_vm5, %v4396_v60  ;;  %2154 = vst.msk [vmem:[#allocation2 + $0x38] sm:$0xff] %vm460_vm5, %v2121_v53  ;;  %v2018_v55 = vpop.xlane.xlu1 %2017  ;;  %v2747_v37 = vpop.xlane.xlu0 %2746  ;;  %v3497_v18 = vsel %vm942_vm4, %v3441_v23, -inf  ;;  %v7610_v48 = vadd.f32 %v7304_v33, %v8347_v6  ;;  %v2090_v10 = vld [vmem:[#allocation2 + $0x40] sm:$0xff]  ;;  %v2825_v21 = vld [vmem:[#allocation2 + $0x128] sm:$0xff] }
 0x598   : > { %v2124_v57 = vmax.f32 %v2092_v59, %v2018_v55  ;;  %v2859_v52 = vmax.f32 %v2827_v25, %v2747_v37  ;;  %v3440_v28 = vmax.f32 %v7556_v4, %v3408_v20  ;;  %v8348_v59 = vld [vmem:[#allocation11_spill] sm:$0xff]  ;;  %v4184_v25 = vmax.f32 %v7589_v62, %v4152_v38  ;;  %v8352_v38 = vld [vmem:[#allocation64_spill] sm:$0xff] }
 0x599   : > { %v4397_v17 = vld [vmem:[#allocation2 + $0x20] sm:$0xff]  ;;  %v4145_v46 = vmul.f32 0.2, %v7576_v43  ;;  %v7616_v20 = vadd.f32 %v8349_v54, %v8348_v59  ;;  %v3413_v55 = vmul.f32 0.2, %v7610_v48  ;;  %v3515_v37 = vsel %vm942_vm4, %v3447_v11, -inf }
 0x59a   : > { %4525 = vst.msk [vmem:[%s7494_s17 + $0x20] sm:$0xff] %vm460_vm5, %v4397_v17  ;;  %v4428_v19 = vld [vmem:[#allocation2 + $0x118] sm:$0xff]  ;;  %2157 = vst.msk [vmem:[#allocation2 + $0x50] sm:$0xff] %vm460_vm5, %v2124_v57  ;;  %v3494_v33 = vsel %vm942_vm4, %v3440_v28, -inf  ;;  %v7656_v6 = vadd.f32 %v8352_v38, %v7295_v40  ;;  %v7669_v59 = vadd.f32 %v7334_v1, %v7391_v61  ;;  %v2091_v61 = vld [vmem:[#allocation2 + $0x48] sm:$0xff] }
 0x59b   : > { %4220 = vmax.xlane.f32.xlu0 %v4219_v31  ;;  %4241 = vmax.xlane.f32.xlu1 %v4240_v51  ;;  %4556 = vst.msk [vmem:[%s7494_s17 + $0x118] sm:$0xff] %vm460_vm5, %v4428_v19  ;;  %2891 = vst.msk [vmem:[#allocation2 + $0x138] sm:$0xff] %vm460_vm5, %v2859_v52  ;;  %v2756_v4 = vpop.xlane.xlu1 %2755  ;;  %v2003_v16 = vpop.xlane.xlu0 %2002  ;;  %v4177_v53 = vmax.f32 %v7576_v43, %v4145_v46  ;;  %v3406_v51 = vmul.f32 0.2, %v7596_v5  ;;  %v7627_v43 = vadd.f32 %v7306_v30, %v7293_v29  ;;  %v8351_v19 = vld [vmem:[#allocation46_spill] sm:$0xff] }
 0x59c   : > { %v2862_v31 = vmax.f32 %v2830_v45, %v2756_v4  ;;  %v2119_v32 = vmax.f32 %v2087_v49, %v2003_v16  ;;  %v4143_v52 = vmul.f32 0.2, %v7616_v20  ;;  %v2093_v45 = vld [vmem:[#allocation2 + $0x58] sm:$0xff]  ;;  %v2096_v16 = vld [vmem:[#allocation2 + $0x70] sm:$0xff] }
 0x59d   : > { %v4429_v23 = vld [vmem:[#allocation2 + $0x120] sm:$0xff]  ;;  %v3438_v17 = vmax.f32 %v7596_v5, %v3406_v51  ;;  %v4231_v62 = vsel %vm942_vm4, %v4177_v53, -inf  ;;  %v4150_v46 = vmul.f32 0.2, %v7627_v43  ;;  %v3445_v5 = vmax.f32 %v7610_v48, %v3413_v55 }
 0x59e   : > { %4557 = vst.msk [vmem:[%s7494_s17 + $0x120] sm:$0xff] %vm460_vm5, %v4429_v23  ;;  %v4400_v27 = vld [vmem:[#allocation2 + $0x38] sm:$0xff]  ;;  %2894 = vst.msk [vmem:[#allocation2 + $0x150] sm:$0xff] %vm460_vm5, %v2862_v31  ;;  %v4252_v31 = vsel %vm942_vm4, %v4184_v25, -inf }
 0x59f   : > { %3477 = vmax.xlane.f32.xlu0 %v3476_v44  ;;  %3498 = vmax.xlane.f32.xlu1 %v3497_v18  ;;  %4528 = vst.msk [vmem:[%s7494_s17 + $0x38] sm:$0xff] %vm460_vm5, %v4400_v27  ;;  %2152 = vst.msk [vmem:[#allocation2 + $0x28] sm:$0xff] %vm460_vm5, %v2119_v32  ;;  %v2012_v36 = vpop.xlane.xlu1 %2011  ;;  %v2741_v44 = vpop.xlane.xlu0 %2740  ;;  %v8350_v18 = vld [vmem:[#allocation37_spill] sm:$0xff]  ;;  %v2831_v23 = vld [vmem:[#allocation2 + $0x158] sm:$0xff]  ;;  %v3509_v27 = vsel %vm942_vm4, %v3445_v5, -inf }
 0x5a0   : > { %v2122_v60 = vmax.f32 %v2090_v10, %v2012_v36  ;;  %v2857_v57 = vmax.f32 %v2825_v21, %v2741_v44  ;;  %v7636_v29 = vadd.f32 %v7278_v39, %v8350_v18  ;;  %v4182_v10 = vmax.f32 %v7627_v43, %v4150_v46  ;;  %v8354_v43 = vld [vmem:[#allocation7_spill] sm:$0xff]  ;;  %v8356_v18 = vld [vmem:[#allocation18_spill] sm:$0xff] }
 0x5a1   : > { %v4403_v41 = vld [vmem:[#allocation2 + $0x50] sm:$0xff]  ;;  %v4149_v36 = vmul.f32 0.2, %v7656_v6 }
 0x5a2   : > { %4531 = vst.msk [vmem:[%s7494_s17 + $0x50] sm:$0xff] %vm460_vm5, %v4403_v41  ;;  %v4432_v30 = vld [vmem:[#allocation2 + $0x138] sm:$0xff]  ;;  %2155 = vst.msk [vmem:[#allocation2 + $0x40] sm:$0xff] %vm460_vm5, %v2122_v60  ;;  %v3412_v11 = vmul.f32 0.2, %v7636_v29  ;;  %v8353_v60 = vld [vmem:[#allocation35_spill] sm:$0xff] }
 0x5a3   : > { %4214 = vmax.xlane.f32.xlu0 %v4213_v0  ;;  %4235 = vmax.xlane.f32.xlu1 %v4234_v12  ;;  %4560 = vst.msk [vmem:[%s7494_s17 + $0x138] sm:$0xff] %vm460_vm5, %v4432_v30  ;;  %2889 = vst.msk [vmem:[#allocation2 + $0x128] sm:$0xff] %vm460_vm5, %v2857_v57  ;;  %v2750_v28 = vpop.xlane.xlu1 %2749  ;;  %v2021_v3 = vpop.xlane.xlu0 %2020  ;;  %v7649_v0 = vadd.f32 %v7332_v14, %v8351_v19  ;;  %v4175_v12 = vmax.f32 %v7616_v20, %v4143_v52  ;;  %v3488_v14 = vsel %vm942_vm4, %v3438_v17, -inf  ;;  %v8355_v52 = vld [vmem:[#allocation44_spill] sm:$0xff] }
 0x5a4   : > { %v2860_v39 = vmax.f32 %v2828_v22, %v2750_v28  ;;  %v2125_v4 = vmax.f32 %v2093_v45, %v2021_v3  ;;  %v3444_v21 = vmax.f32 %v7636_v29, %v3412_v11  ;;  %v7676_v44 = vadd.f32 %v8354_v43, %v8353_v60  ;;  %v2094_v45 = vld [vmem:[#allocation2 + $0x60] sm:$0xff]  ;;  %v8358_v3 = vld [vmem:[#allocation65_spill] sm:$0xff] }
 0x5a5   : > { %v4435_v49 = vld [vmem:[#allocation2 + $0x150] sm:$0xff]  ;;  %v3419_v51 = vmul.f32 0.2, %v7649_v0  ;;  %v4225_v1 = vsel %vm942_vm4, %v4175_v12, -inf  ;;  %v4156_v17 = vmul.f32 0.2, %v7669_v59  ;;  %v7690_v29 = vadd.f32 %v8356_v18, %v8355_v52 }
 0x5a6   : > { %4563 = vst.msk [vmem:[%s7494_s17 + $0x150] sm:$0xff] %vm460_vm5, %v4435_v49  ;;  %v4398_v48 = vld [vmem:[#allocation2 + $0x28] sm:$0xff]  ;;  %2892 = vst.msk [vmem:[#allocation2 + $0x140] sm:$0xff] %vm460_vm5, %v2860_v39  ;;  %v4181_v28 = vmax.f32 %v7656_v6, %v4149_v36  ;;  %v3410_v46 = vmul.f32 0.2, %v7676_v44  ;;  %v8357_v39 = vld [vmem:[#allocation63_spill] sm:$0xff] }
 0x5a7   : > { %3495 = vmax.xlane.f32.xlu0 %v3494_v33  ;;  %3516 = vmax.xlane.f32.xlu1 %v3515_v37  ;;  %4526 = vst.msk [vmem:[%s7494_s17 + $0x28] sm:$0xff] %vm460_vm5, %v4398_v48  ;;  %2158 = vst.msk [vmem:[#allocation2 + $0x58] sm:$0xff] %vm460_vm5, %v2125_v4  ;;  %v2030_v32 = vpop.xlane.xlu1 %2029  ;;  %v2759_v53 = vpop.xlane.xlu0 %2758  ;;  %v2834_v33 = vld [vmem:[#allocation2 + $0x170] sm:$0xff]  ;;  %v4246_v37 = vsel %vm942_vm4, %v4182_v10, -inf  ;;  %v3451_v22 = vmax.f32 %v7649_v0, %v3419_v51  ;;  %v7696_v5 = vadd.f32 %v8358_v3, %v8357_v39  ;;  %v2829_v49 = vld [vmem:[#allocation2 + $0x148] sm:$0xff] }
 0x5a8   : > { %v2128_v40 = vmax.f32 %v2096_v16, %v2030_v32  ;;  %v2863_v20 = vmax.f32 %v2831_v23, %v2759_v53  ;;  %v3506_v0 = vsel %vm942_vm4, %v3444_v21, -inf  ;;  %v4188_v11 = vmax.f32 %v7669_v59, %v4156_v17  ;;  %v2832_v23 = vld [vmem:[#allocation2 + $0x160] sm:$0xff]  ;;  %v8360_v53 = vld [vmem:[#allocation66_spill] sm:$0xff]  ;;  %v2838_v39 = vld [vmem:[#allocation2 + $0x190] sm:$0xff] }
 0x5a9   : > { %v4401_v54 = vld [vmem:[#allocation2 + $0x40] sm:$0xff]  ;;  %v3417_v38 = vmul.f32 0.2, %v7690_v29  ;;  %v3442_v32 = vmax.f32 %v7676_v44, %v3410_v46  ;;  %v4147_v10 = vmul.f32 0.2, %v7696_v5  ;;  %v4243_v51 = vsel %vm942_vm4, %v4181_v28, -inf }
 0x5aa   : > { %4529 = vst.msk [vmem:[%s7494_s17 + $0x40] sm:$0xff] %vm460_vm5, %v4401_v54  ;;  %v4430_v25 = vld [vmem:[#allocation2 + $0x128] sm:$0xff]  ;;  %2161 = vst.msk [vmem:[#allocation2 + $0x70] sm:$0xff] %vm460_vm5, %v2128_v40  ;;  %v8359_v40 = vld [vmem:[#allocation41_spill] sm:$0xff] }
 0x5ab   : > { %4232 = vmax.xlane.f32.xlu0 %v4231_v62  ;;  %4253 = vmax.xlane.f32.xlu1 %v4252_v31  ;;  %4558 = vst.msk [vmem:[%s7494_s17 + $0x128] sm:$0xff] %vm460_vm5, %v4430_v25  ;;  %2895 = vst.msk [vmem:[#allocation2 + $0x158] sm:$0xff] %vm460_vm5, %v2863_v20  ;;  %v2768_v55 = vpop.xlane.xlu1 %2767  ;;  %v2015_v57 = vpop.xlane.xlu0 %2014  ;;  %v7707_v31 = vadd.f32 %v7338_v35, %v7357_v2  ;;  %v7716_v35 = vadd.f32 %v8360_v53, %v8359_v40  ;;  %v2097_v59 = vld [vmem:[#allocation2 + $0x78] sm:$0xff]  ;;  %v4264_v25 = vsel %vm942_vm4, %v4188_v11, -inf  ;;  %v2098_v53 = vld [vmem:[#allocation2 + $0x80] sm:$0xff] }
 0x5ac   : > { %v2866_v41 = vmax.f32 %v2834_v33, %v2768_v55  ;;  %v2123_v62 = vmax.f32 %v2091_v61, %v2015_v57  ;;  %v3449_v21 = vmax.f32 %v7690_v29, %v3417_v38  ;;  %v8361_v36 = vld [vmem:[#allocation50_spill] sm:$0xff]  ;;  %v4179_v61 = vmax.f32 %v7696_v5, %v4147_v10 }
 0x5ad   : > { %v4433_v30 = vld [vmem:[#allocation2 + $0x140] sm:$0xff]  ;;  %v4154_v20 = vmul.f32 0.2, %v7707_v31  ;;  %v7729_v60 = vadd.f32 %v7364_v13, %v8361_v36  ;;  %v3416_v55 = vmul.f32 0.2, %v7716_v35  ;;  %v3500_v13 = vsel %vm942_vm4, %v3442_v32, -inf }
 0x5ae   : > { %4561 = vst.msk [vmem:[%s7494_s17 + $0x140] sm:$0xff] %vm460_vm5, %v4433_v30  ;;  %v4404_v19 = vld [vmem:[#allocation2 + $0x58] sm:$0xff]  ;;  %2898 = vst.msk [vmem:[#allocation2 + $0x170] sm:$0xff] %vm460_vm5, %v2866_v41  ;;  %v8362_v41 = vld [vmem:[#allocation67_spill] sm:$0xff]  ;;  %v3521_v46 = vsel %vm942_vm4, %v3449_v21, -inf  ;;  %v7787_v36 = vadd.f32 %v7370_v56, %v7423_v9 }
 0x5af   : > { %3489 = vmax.xlane.f32.xlu0 %v3488_v14  ;;  %3510 = vmax.xlane.f32.xlu1 %v3509_v27  ;;  %4532 = vst.msk [vmem:[%s7494_s17 + $0x58] sm:$0xff] %vm460_vm5, %v4404_v19  ;;  %2156 = vst.msk [vmem:[#allocation2 + $0x48] sm:$0xff] %vm460_vm5, %v2123_v62  ;;  %v2024_v4 = vpop.xlane.xlu1 %2023  ;;  %v2753_v12 = vpop.xlane.xlu0 %2752  ;;  %v3527_v14 = vsel %vm942_vm4, %v3451_v22, -inf  ;;  %v7736_v57 = vadd.f32 %v8362_v41, %v7359_v63  ;;  %v2835_v22 = vld [vmem:[#allocation2 + $0x178] sm:$0xff]  ;;  %v4186_v52 = vmax.f32 %v7707_v31, %v4154_v20  ;;  %v8363_v30 = vld [vmem:[#allocation15_spill] sm:$0xff] }
 0x5b0   : > { %v2126_v16 = vmax.f32 %v2094_v45, %v2024_v4  ;;  %v2861_v48 = vmax.f32 %v2829_v49, %v2753_v12  ;;  %v3423_v29 = vmul.f32 0.2, %v7729_v60  ;;  %v7749_v62 = vadd.f32 %v8363_v30, %v7436_v8  ;;  %v8364_v19 = vld [vmem:[#allocation39_spill] sm:$0xff]  ;;  %v2095_v31 = vld [vmem:[#allocation2 + $0x68] sm:$0xff] }
 0x5b1   : > { %v4407_v6 = vld [vmem:[#allocation2 + $0x70] sm:$0xff]  ;;  %v3448_v3 = vmax.f32 %v7716_v35, %v3416_v55  ;;  %v4153_v5 = vmul.f32 0.2, %v7736_v57  ;;  %v4237_v8 = vsel %vm942_vm4, %v4179_v61, -inf  ;;  %v4258_v38 = vsel %vm942_vm4, %v4186_v52, -inf  ;;  %v2836_v41 = vld [vmem:[#allocation2 + $0x180] sm:$0xff] }
 0x5b2   : > { %4535 = vst.msk [vmem:[%s7494_s17 + $0x70] sm:$0xff] %vm460_vm5, %v4407_v6  ;;  %v4436_v2 = vld [vmem:[#allocation2 + $0x158] sm:$0xff]  ;;  %2159 = vst.msk [vmem:[#allocation2 + $0x60] sm:$0xff] %vm460_vm5, %v2126_v16  ;;  %v3455_v6 = vmax.f32 %v7729_v60, %v3423_v29 }
 0x5b3   : > { %4226 = vmax.xlane.f32.xlu0 %v4225_v1  ;;  %4247 = vmax.xlane.f32.xlu1 %v4246_v37  ;;  %4564 = vst.msk [vmem:[%s7494_s17 + $0x158] sm:$0xff] %vm460_vm5, %v4436_v2  ;;  %2893 = vst.msk [vmem:[#allocation2 + $0x148] sm:$0xff] %vm460_vm5, %v2861_v48  ;;  %v2762_v54 = vpop.xlane.xlu1 %2761  ;;  %v2033_v33 = vpop.xlane.xlu0 %2032  ;;  %v2100_v1 = vld [vmem:[#allocation2 + $0x90] sm:$0xff]  ;;  %v4160_v48 = vmul.f32 0.2, %v7749_v62  ;;  %v4185_v35 = vmax.f32 %v7736_v57, %v4153_v5  ;;  %v2101_v52 = vld [vmem:[#allocation2 + $0x98] sm:$0xff] }
 0x5b4   : > { %v2864_v27 = vmax.f32 %v2832_v23, %v2762_v54  ;;  %v2129_v44 = vmax.f32 %v2097_v59, %v2033_v33  ;;  %v8367_v23 = vld [vmem:[#allocation17_spill] sm:$0xff]  ;;  %v8369_v59 = vld [vmem:[#allocation68_spill] sm:$0xff]  ;;  %v3539_v55 = vsel %vm942_vm4, %v3455_v6, -inf }
 0x5b5   : > { %v4439_v43 = vld [vmem:[#allocation2 + $0x170] sm:$0xff]  ;;  %v2833_v33 = vld [vmem:[#allocation2 + $0x168] sm:$0xff] }
 0x5b6   : > { %4567 = vst.msk [vmem:[%s7494_s17 + $0x170] sm:$0xff] %vm460_vm5, %v4439_v43  ;;  %v4402_v37 = vld [vmem:[#allocation2 + $0x48] sm:$0xff]  ;;  %2896 = vst.msk [vmem:[#allocation2 + $0x160] sm:$0xff] %vm460_vm5, %v2864_v27  ;;  %v3518_v27 = vsel %vm942_vm4, %v3448_v3, -inf  ;;  %v2104_v5 = vld [vmem:[#allocation2 + $0xb0] sm:$0xff] }
 0x5b7   : > { %3507 = vmax.xlane.f32.xlu0 %v3506_v0  ;;  %3528 = vmax.xlane.f32.xlu1 %v3527_v14  ;;  %4530 = vst.msk [vmem:[%s7494_s17 + $0x48] sm:$0xff] %vm460_vm5, %v4402_v37  ;;  %2162 = vst.msk [vmem:[#allocation2 + $0x78] sm:$0xff] %vm460_vm5, %v2129_v44  ;;  %v2042_v17 = vpop.xlane.xlu1 %2041  ;;  %v2771_v18 = vpop.xlane.xlu0 %2770  ;;  %v8365_v0 = vld [vmem:[#allocation12_spill] sm:$0xff]  ;;  %v4192_v44 = vmax.f32 %v7749_v62, %v4160_v48 }
 0x5b8   : > { %v2132_v63 = vmax.f32 %v2100_v1, %v2042_v17  ;;  %v2867_v28 = vmax.f32 %v2835_v22, %v2771_v18  ;;  %v7756_v49 = vadd.f32 %v8365_v0, %v8364_v19  ;;  %v8366_v14 = vld [vmem:[#allocation48_spill] sm:$0xff]  ;;  %v4255_v17 = vsel %vm942_vm4, %v4185_v35, -inf }
 0x5b9   : > { %v4405_v45 = vld [vmem:[#allocation2 + $0x60] sm:$0xff]  ;;  %v7770_v32 = vadd.f32 %v8367_v23, %v8366_v14  ;;  %v8371_v22 = vld [vmem:[#allocation24_spill] sm:$0xff]  ;;  %v4158_v18 = vmul.f32 0.2, %v7787_v36  ;;  %v4276_v3 = vsel %vm942_vm4, %v4192_v44, -inf }
 0x5ba   : > { %4533 = vst.msk [vmem:[%s7494_s17 + $0x60] sm:$0xff] %vm460_vm5, %v4405_v45  ;;  %v4434_v4 = vld [vmem:[#allocation2 + $0x148] sm:$0xff]  ;;  %2165 = vst.msk [vmem:[#allocation2 + $0x90] sm:$0xff] %vm460_vm5, %v2132_v63  ;;  %v3414_v2 = vmul.f32 0.2, %v7756_v49  ;;  %v8372_v45 = vld [vmem:[#allocation54_spill] sm:$0xff] }
 0x5bb   : > { %4244 = vmax.xlane.f32.xlu0 %v4243_v51  ;;  %4265 = vmax.xlane.f32.xlu1 %v4264_v25  ;;  %4562 = vst.msk [vmem:[%s7494_s17 + $0x148] sm:$0xff] %vm460_vm5, %v4434_v4  ;;  %2899 = vst.msk [vmem:[#allocation2 + $0x178] sm:$0xff] %vm460_vm5, %v2867_v28  ;;  %v2780_v16 = vpop.xlane.xlu1 %2779  ;;  %v2027_v11 = vpop.xlane.xlu0 %2026  ;;  %v8368_v51 = vld [vmem:[#allocation16_spill] sm:$0xff]  ;;  %v3421_v25 = vmul.f32 0.2, %v7770_v32  ;;  %v7809_v28 = vadd.f32 %v7396_v26, %v8372_v45 }
 0x5bc   : > { %v2870_v12 = vmax.f32 %v2838_v39, %v2780_v16  ;;  %v2127_v40 = vmax.f32 %v2095_v31, %v2027_v11  ;;  %v7776_v54 = vadd.f32 %v8369_v59, %v8368_v51  ;;  %v3446_v57 = vmax.f32 %v7756_v49, %v3414_v2  ;;  %v8373_v49 = vld [vmem:[#allocation69_spill] sm:$0xff]  ;;  %v2839_v31 = vld [vmem:[#allocation2 + $0x198] sm:$0xff]  ;;  %v8374_v6 = vld [vmem:[#allocation52_spill] sm:$0xff] }
 0x5bd   : > { %v4437_v10 = vld [vmem:[#allocation2 + $0x160] sm:$0xff]  ;;  %v3453_v62 = vmax.f32 %v7770_v32, %v3421_v25  ;;  %v7816_v4 = vadd.f32 %v8373_v49, %v7418_v15  ;;  %v8375_v48 = vld [vmem:[#allocation20_spill] sm:$0xff]  ;;  %v8377_v51 = vld [vmem:[#allocation10_spill] sm:$0xff]  ;;  %v7850_v25 = vadd.f32 %v7402_v58, %v7449_v24 }
 0x5be   : > { %4565 = vst.msk [vmem:[%s7494_s17 + $0x160] sm:$0xff] %vm460_vm5, %v4437_v10  ;;  %v4408_v20 = vld [vmem:[#allocation2 + $0x78] sm:$0xff]  ;;  %2902 = vst.msk [vmem:[#allocation2 + $0x190] sm:$0xff] %vm460_vm5, %v2870_v12  ;;  %v4151_v37 = vmul.f32 0.2, %v7776_v54  ;;  %v3512_v26 = vsel %vm942_vm4, %v3446_v57, -inf  ;;  %v4190_v12 = vmax.f32 %v7787_v36, %v4158_v18  ;;  %v7829_v14 = vadd.f32 %v8375_v48, %v8374_v6 }
 0x5bf   : > { %3501 = vmax.xlane.f32.xlu0 %v3500_v13  ;;  %3522 = vmax.xlane.f32.xlu1 %v3521_v46  ;;  %4536 = vst.msk [vmem:[%s7494_s17 + $0x78] sm:$0xff] %vm460_vm5, %v4408_v20  ;;  %2160 = vst.msk [vmem:[#allocation2 + $0x68] sm:$0xff] %vm460_vm5, %v2127_v40  ;;  %v2036_v21 = vpop.xlane.xlu1 %2035  ;;  %v2765_v43 = vpop.xlane.xlu0 %2764  ;;  %v8370_v13 = vld [vmem:[#allocation45_spill] sm:$0xff]  ;;  %v3533_v10 = vsel %vm942_vm4, %v3453_v62, -inf  ;;  %v4157_v35 = vmul.f32 0.2, %v7816_v4 }
 0x5c0   : > { %v2130_v60 = vmax.f32 %v2098_v53, %v2036_v21  ;;  %v2865_v61 = vmax.f32 %v2833_v33, %v2765_v43  ;;  %v7796_v56 = vadd.f32 %v8371_v22, %v8370_v13  ;;  %v4183_v19 = vmax.f32 %v7776_v54, %v4151_v37  ;;  %v2842_v40 = vld [vmem:[#allocation2 + $0x1b0] sm:$0xff]  ;;  %v8376_v2 = vld [vmem:[#allocation43_spill] sm:$0xff]  ;;  %v8379_v13 = vld [vmem:[#allocation70_spill] sm:$0xff] }
 0x5c1   : > { %v4411_v1 = vld [vmem:[#allocation2 + $0x90] sm:$0xff]  ;;  %v7836_v59 = vadd.f32 %v8377_v51, %v8376_v2  ;;  %v3425_v44 = vmul.f32 0.2, %v7829_v14  ;;  %v2837_v24 = vld [vmem:[#allocation2 + $0x188] sm:$0xff] }
 0x5c2   : > { %4539 = vst.msk [vmem:[%s7494_s17 + $0x90] sm:$0xff] %vm460_vm5, %v4411_v1  ;;  %v4440_v9 = vld [vmem:[#allocation2 + $0x178] sm:$0xff]  ;;  %2163 = vst.msk [vmem:[#allocation2 + $0x80] sm:$0xff] %vm460_vm5, %v2130_v60  ;;  %v3420_v0 = vmul.f32 0.2, %v7796_v56  ;;  %v4249_v20 = vsel %vm942_vm4, %v4183_v19, -inf }
 0x5c3   : > { %4238 = vmax.xlane.f32.xlu0 %v4237_v8  ;;  %4259 = vmax.xlane.f32.xlu1 %v4258_v38  ;;  %4568 = vst.msk [vmem:[%s7494_s17 + $0x178] sm:$0xff] %vm460_vm5, %v4440_v9  ;;  %2897 = vst.msk [vmem:[#allocation2 + $0x168] sm:$0xff] %vm460_vm5, %v2865_v61  ;;  %v2774_v63 = vpop.xlane.xlu1 %2773  ;;  %v2045_v30 = vpop.xlane.xlu0 %2044  ;;  %v3427_v38 = vmul.f32 0.2, %v7809_v28  ;;  %v4270_v60 = vsel %vm942_vm4, %v4190_v12, -inf  ;;  %v8378_v37 = vld [vmem:[#allocation73_spill] sm:$0xff] }
 0x5c4   : > { %v2868_v29 = vmax.f32 %v2836_v41, %v2774_v63  ;;  %v2133_v39 = vmax.f32 %v2101_v52, %v2045_v30  ;;  %v3452_v53 = vmax.f32 %v7796_v56, %v3420_v0  ;;  %v4189_v41 = vmax.f32 %v7816_v4, %v4157_v35  ;;  %v8382_v19 = vld [vmem:[#allocation22_spill] sm:$0xff]  ;;  %v2108_v6 = vld [vmem:[#allocation2 + $0xd0] sm:$0xff] }
 0x5c5   : > { %v4443_v46 = vld [vmem:[#allocation2 + $0x190] sm:$0xff]  ;;  %v3459_v43 = vmax.f32 %v7809_v28, %v3427_v38  ;;  %v3418_v57 = vmul.f32 0.2, %v7836_v59  ;;  %v7856_v22 = vadd.f32 %v8379_v13, %v8378_v37  ;;  %v4162_v30 = vmul.f32 0.2, %v7850_v25  ;;  %v2105_v4 = vld [vmem:[#allocation2 + $0xb8] sm:$0xff] }
 0x5c6   : > { %4571 = vst.msk [vmem:[%s7494_s17 + $0x190] sm:$0xff] %vm460_vm5, %v4443_v46  ;;  %v4406_v8 = vld [vmem:[#allocation2 + $0x68] sm:$0xff]  ;;  %2900 = vst.msk [vmem:[#allocation2 + $0x180] sm:$0xff] %vm460_vm5, %v2868_v29  ;;  %v3530_v58 = vsel %vm942_vm4, %v3452_v53, -inf  ;;  %v3457_v29 = vmax.f32 %v7829_v14, %v3425_v44  ;;  %v2840_v46 = vld [vmem:[#allocation2 + $0x1a0] sm:$0xff]  ;;  %v4267_v49 = vsel %vm942_vm4, %v4189_v41, -inf }
 0x5c7   : > { %3519 = vmax.xlane.f32.xlu0 %v3518_v27  ;;  %3540 = vmax.xlane.f32.xlu1 %v3539_v55  ;;  %4534 = vst.msk [vmem:[%s7494_s17 + $0x68] sm:$0xff] %vm460_vm5, %v4406_v8  ;;  %2166 = vst.msk [vmem:[#allocation2 + $0x98] sm:$0xff] %vm460_vm5, %v2133_v39  ;;  %v2054_v16 = vpop.xlane.xlu1 %2053  ;;  %v2099_v27 = vld [vmem:[#allocation2 + $0x88] sm:$0xff]  ;;  %v2102_v55 = vld [vmem:[#allocation2 + $0xa0] sm:$0xff]  ;;  %v3551_v28 = vsel %vm942_vm4, %v3459_v43, -inf  ;;  %v3450_v39 = vmax.f32 %v7836_v59, %v3418_v57  ;;  %v4194_v12 = vmax.f32 %v7850_v25, %v4162_v30 }
 0x5c8   : > { %v2136_v15 = vmax.f32 %v2104_v5, %v2054_v16  ;;  %v8381_v5 = vld [vmem:[#allocation49_spill] sm:$0xff]  ;;  %v3545_v38 = vsel %vm942_vm4, %v3457_v29, -inf  ;;  %v2843_v53 = vld [vmem:[#allocation2 + $0x1b8] sm:$0xff] }
 0x5c9   : > { %v4409_v23 = vld [vmem:[#allocation2 + $0x80] sm:$0xff] }
 0x5ca   : > { %4537 = vst.msk [vmem:[%s7494_s17 + $0x80] sm:$0xff] %vm460_vm5, %v4409_v23  ;;  %v4438_v54 = vld [vmem:[#allocation2 + $0x168] sm:$0xff]  ;;  %2169 = vst.msk [vmem:[#allocation2 + $0xb0] sm:$0xff] %vm460_vm5, %v2136_v15  ;;  %v8383_v23 = vld [vmem:[#allocation71_spill] sm:$0xff] }
 0x5cb   : > { %4256 = vmax.xlane.f32.xlu0 %v4255_v17  ;;  %4277 = vmax.xlane.f32.xlu1 %v4276_v3  ;;  %4566 = vst.msk [vmem:[%s7494_s17 + $0x168] sm:$0xff] %vm460_vm5, %v4438_v54  ;;  %v8380_v17 = vld [vmem:[#allocation26_spill] sm:$0xff]  ;;  %v4155_v3 = vmul.f32 0.2, %v7856_v22 }
 0x5cc   : > { %v7867_v52 = vadd.f32 %v8380_v17, %v7460_v47  ;;  %v7876_v47 = vadd.f32 %v8382_v19, %v8381_v5 }
 0x5cd   : > { %v4441_v1 = vld [vmem:[#allocation2 + $0x180] sm:$0xff]  ;;  %v4187_v48 = vmax.f32 %v7856_v22, %v4155_v3  ;;  %v8388_v3 = vld [vmem:[#allocation60_spill] sm:$0xff] }
 0x5ce   : > { %4569 = vst.msk [vmem:[%s7494_s17 + $0x180] sm:$0xff] %vm460_vm5, %v4441_v1  ;;  %v4412_v56 = vld [vmem:[#allocation2 + $0x98] sm:$0xff]  ;;  %v4164_v16 = vmul.f32 0.2, %v7867_v52  ;;  %v3424_v14 = vmul.f32 0.2, %v7876_v47 }
 0x5cf   : > { %3513 = vmax.xlane.f32.xlu0 %v3512_v26  ;;  %3534 = vmax.xlane.f32.xlu1 %v3533_v10  ;;  %4540 = vst.msk [vmem:[%s7494_s17 + $0x98] sm:$0xff] %vm460_vm5, %v4412_v56  ;;  %v4261_v25 = vsel %vm942_vm4, %v4187_v48, -inf  ;;  %v2103_v1 = vld [vmem:[#allocation2 + $0xa8] sm:$0xff]  ;;  %v2106_v22 = vld [vmem:[#allocation2 + $0xc0] sm:$0xff] }
 0x5d0   : > { %v2783_v11 = vpop.xlane.xlu0 %2782  ;;  %v2792_v33 = vpop.xlane.xlu1 %2791 }
 0x5d1   : > { %v2871_v32 = vmax.f32 %v2839_v31, %v2783_v11  ;;  %v2874_v21 = vmax.f32 %v2842_v40, %v2792_v33  ;;  %v4415_v62 = vld [vmem:[#allocation2 + $0xb0] sm:$0xff]  ;;  %v3524_v40 = vsel %vm942_vm4, %v3450_v39, -inf  ;;  %v3456_v33 = vmax.f32 %v7876_v47, %v3424_v14 }
 0x5d2   : > { %4543 = vst.msk [vmem:[%s7494_s17 + $0xb0] sm:$0xff] %vm460_vm5, %v4415_v62  ;;  %v8387_v39 = vld [vmem:[#allocation53_spill] sm:$0xff] }
 0x5d3   : > { %2903 = vst.msk [vmem:[#allocation2 + $0x198] sm:$0xff] %vm460_vm5, %v2871_v32  ;;  %4250 = vmax.xlane.f32.xlu0 %v4249_v20  ;;  %2906 = vst.msk [vmem:[#allocation2 + $0x1b0] sm:$0xff] %vm460_vm5, %v2874_v21  ;;  %4271 = vmax.xlane.f32.xlu1 %v4270_v60  ;;  %v4115_v32 = vadd.f32 %v8383_v23, %v7444_v34  ;;  %v4196_v34 = vmax.f32 %v7867_v52, %v4164_v16  ;;  %v4282_v20 = vsel %vm942_vm4, %v4194_v12, -inf  ;;  %v8385_v60 = vld [vmem:[#allocation14_spill] sm:$0xff]  ;;  %v2112_v16 = vld [vmem:[#allocation2 + $0xf0] sm:$0xff] }
 0x5d4   : > { %v2039_v36 = vpop.xlane.xlu0 %2038  ;;  %v2048_v9 = vpop.xlane.xlu1 %2047  ;;  %v3542_v52 = vsel %vm942_vm4, %v3456_v33, -inf  ;;  %v3394_v5 = vadd.f32 %v8388_v3, %v8387_v39  ;;  %v2847_v23 = vld [vmem:[#allocation2 + $0x1d8] sm:$0xff]  ;;  %v2107_v33 = vld [vmem:[#allocation2 + $0xc8] sm:$0xff] }
 0x5d5   : > { %v2131_v61 = vmax.f32 %v2099_v27, %v2039_v36  ;;  %v2134_v63 = vmax.f32 %v2102_v55, %v2048_v9  ;;  %v2846_v27 = vld [vmem:[#allocation2 + $0x1d0] sm:$0xff]  ;;  %v4161_v21 = vmul.f32 0.2, %v4115_v32  ;;  %v8384_v36 = vld [vmem:[#allocation47_spill] sm:$0xff]  ;;  %v4288_v13 = vsel %vm942_vm4, %v4196_v34, -inf }
 0x5d6   : > { %v3370_v43 = vadd.f32 %v8385_v60, %v8384_v36 }
 0x5d7   : > { %2164 = vst.msk [vmem:[#allocation2 + $0x88] sm:$0xff] %vm460_vm5, %v2131_v61  ;;  %3531 = vmax.xlane.f32.xlu0 %v3530_v58  ;;  %2167 = vst.msk [vmem:[#allocation2 + $0xa0] sm:$0xff] %vm460_vm5, %v2134_v63  ;;  %3552 = vmax.xlane.f32.xlu1 %v3551_v28  ;;  %v4193_v56 = vmax.f32 %v4115_v32, %v4161_v21  ;;  %v2841_v63 = vld [vmem:[#allocation2 + $0x1a8] sm:$0xff] }
 0x5d8   : > { %v2777_v18 = vpop.xlane.xlu0 %2776  ;;  %v2786_v8 = vpop.xlane.xlu1 %2785  ;;  %v3422_v58 = vmul.f32 0.2, %v3370_v43 }
 0x5d9   : > { %v2869_v45 = vmax.f32 %v2837_v24, %v2777_v18  ;;  %v2872_v26 = vmax.f32 %v2840_v46, %v2786_v8  ;;  %v8386_v24 = vld [vmem:[#allocation72_spill] sm:$0xff]  ;;  %v4279_v47 = vsel %vm942_vm4, %v4193_v56, -inf }
 0x5da   : > { %v4444_v0 = vld [vmem:[#allocation2 + $0x198] sm:$0xff]  ;;  %v4447_v15 = vld [vmem:[#allocation2 + $0x1b0] sm:$0xff]  ;;  %v4107_v9 = vadd.f32 %v8386_v24, %v7428_v42  ;;  %v3454_v28 = vmax.f32 %v3370_v43, %v3422_v58  ;;  %v2848_v24 = vld [vmem:[#allocation2 + $0x1e0] sm:$0xff] }
 0x5db   : > { %4572 = vst.msk [vmem:[%s7494_s17 + $0x198] sm:$0xff] %vm460_vm5, %v4444_v0  ;;  %2901 = vst.msk [vmem:[#allocation2 + $0x188] sm:$0xff] %vm460_vm5, %v2869_v45  ;;  %4268 = vmax.xlane.f32.xlu0 %v4267_v49  ;;  %3546 = vmax.xlane.f32.xlu1 %v3545_v38  ;;  %v2844_v45 = vld [vmem:[#allocation2 + $0x1c0] sm:$0xff]  ;;  %v2109_v0 = vld [vmem:[#allocation2 + $0xd8] sm:$0xff] }
 0x5dc   : > { %v2057_v31 = vpop.xlane.xlu0 %2056  ;;  %4575 = vst.msk [vmem:[%s7494_s17 + $0x1b0] sm:$0xff] %vm460_vm5, %v4447_v15  ;;  %2904 = vst.msk [vmem:[#allocation2 + $0x1a0] sm:$0xff] %vm460_vm5, %v2872_v26  ;;  %v2066_v35 = vpop.xlane.xlu1 %2065  ;;  %v4159_v46 = vmul.f32 0.2, %v4107_v9  ;;  %v3428_v15 = vmul.f32 0.2, %v3394_v5 }
 0x5dd   : > { %v2137_v11 = vmax.f32 %v2105_v4, %v2057_v31  ;;  %v2140_v2 = vmax.f32 %v2108_v6, %v2066_v35  ;;  %v8390_v38 = vld [vmem:[#allocation13_spill] sm:$0xff]  ;;  %v3536_v14 = vsel %vm942_vm4, %v3454_v28, -inf  ;;  %v3558_v28 = vld [vmem:[#allocation2 + $0x208] sm:$0xff] }
 0x5de   : > { %v4410_v10 = vld [vmem:[#allocation2 + $0x88] sm:$0xff]  ;;  %v4413_v59 = vld [vmem:[#allocation2 + $0xa0] sm:$0xff]  ;;  %v4191_v12 = vmax.f32 %v4107_v9, %v4159_v46 }
 0x5df   : > { %4538 = vst.msk [vmem:[%s7494_s17 + $0x88] sm:$0xff] %vm460_vm5, %v4410_v10  ;;  %2170 = vst.msk [vmem:[#allocation2 + $0xb8] sm:$0xff] %vm460_vm5, %v2137_v11  ;;  %3525 = vmax.xlane.f32.xlu0 %v3524_v40  ;;  %4283 = vmax.xlane.f32.xlu1 %v4282_v20  ;;  %v8389_v11 = vld [vmem:[#allocation51_spill] sm:$0xff] }
 0x5e0   : > { %v2795_v51 = vpop.xlane.xlu0 %2794  ;;  %4541 = vst.msk [vmem:[%s7494_s17 + $0xa0] sm:$0xff] %vm460_vm5, %v4413_v59  ;;  %2173 = vst.msk [vmem:[#allocation2 + $0xd0] sm:$0xff] %vm460_vm5, %v2140_v2  ;;  %v2804_v61 = vpop.xlane.xlu1 %2803  ;;  %v3386_v6 = vadd.f32 %v8390_v38, %v8389_v11  ;;  %v2850_v2 = vld [vmem:[#allocation2 + $0x1f0] sm:$0xff]  ;;  %v8391_v59 = vld [vmem:[#allocation74_spill] sm:$0xff] }
 0x5e1   : > { %v2875_v54 = vmax.f32 %v2843_v53, %v2795_v51  ;;  %v2878_v55 = vmax.f32 %v2846_v27, %v2804_v61  ;;  %v3460_v51 = vmax.f32 %v3394_v5, %v3428_v15  ;;  %v4273_v27 = vsel %vm942_vm4, %v4191_v12, -inf  ;;  %v2851_v5 = vld [vmem:[#allocation2 + $0x1f8] sm:$0xff] }
 0x5e2   : > { %v4442_v44 = vld [vmem:[#allocation2 + $0x188] sm:$0xff]  ;;  %v3426_v34 = vmul.f32 0.2, %v3386_v6 }
 0x5e3   : > { %4570 = vst.msk [vmem:[%s7494_s17 + $0x188] sm:$0xff] %vm460_vm5, %v4442_v44  ;;  %2907 = vst.msk [vmem:[#allocation2 + $0x1b8] sm:$0xff] %vm460_vm5, %v2875_v54  ;;  %4262 = vmax.xlane.f32.xlu0 %v4261_v25  ;;  %v4445_v57 = vld [vmem:[#allocation2 + $0x1a0] sm:$0xff]  ;;  %4289 = vmax.xlane.f32.xlu1 %v4288_v13  ;;  %v4123_v54 = vadd.f32 %v8391_v59, %v7454_v7 }
 0x5e4   : > { %v2051_v41 = vpop.xlane.xlu0 %2050  ;;  %4573 = vst.msk [vmem:[%s7494_s17 + $0x1a0] sm:$0xff] %vm460_vm5, %v4445_v57  ;;  %2910 = vst.msk [vmem:[#allocation2 + $0x1d0] sm:$0xff] %vm460_vm5, %v2878_v55  ;;  %v2060_v18 = vpop.xlane.xlu1 %2059  ;;  %v2110_v44 = vld [vmem:[#allocation2 + $0xe0] sm:$0xff]  ;;  %v3458_v61 = vmax.f32 %v3386_v6, %v3426_v34  ;;  %v3554_v57 = vsel %vm942_vm4, %v3460_v51, -inf  ;;  %v3559_v34 = vld [vmem:[#allocation2 + $0x210] sm:$0xff] }
 0x5e5   : > { %v2135_v37 = vmax.f32 %v2103_v1, %v2051_v41  ;;  %v2138_v29 = vmax.f32 %v2106_v22, %v2060_v18  ;;  %v8392_v25 = vld [vmem:[#allocation55_spill] sm:$0xff]  ;;  %v4163_v55 = vmul.f32 0.2, %v4123_v54  ;;  %v2113_v18 = vld [vmem:[#allocation2 + $0xf8] sm:$0xff] }
 0x5e6   : > { %v4416_v17 = vld [vmem:[#allocation2 + $0xb8] sm:$0xff]  ;;  %v4131_v1 = vadd.f32 %v8392_v25, %v7469_v50 }
 0x5e7   : > { %4544 = vst.msk [vmem:[%s7494_s17 + $0xb8] sm:$0xff] %vm460_vm5, %v4416_v17  ;;  %2168 = vst.msk [vmem:[#allocation2 + $0xa8] sm:$0xff] %vm460_vm5, %v2135_v37  ;;  %3543 = vmax.xlane.f32.xlu0 %v3542_v52  ;;  %v4419_v42 = vld [vmem:[#allocation2 + $0xd0] sm:$0xff]  ;;  %v2845_v37 = vld [vmem:[#allocation2 + $0x1c8] sm:$0xff]  ;;  %v4195_v17 = vmax.f32 %v4123_v54, %v4163_v55 }
 0x5e8   : > { %v2789_v30 = vpop.xlane.xlu0 %2788  ;;  %4547 = vst.msk [vmem:[%s7494_s17 + $0xd0] sm:$0xff] %vm460_vm5, %v4419_v42  ;;  %2171 = vst.msk [vmem:[#allocation2 + $0xc0] sm:$0xff] %vm460_vm5, %v2138_v29  ;;  %v2798_v49 = vpop.xlane.xlu1 %2797  ;;  %v4165_v9 = vmul.f32 0.2, %v4131_v1 }
 0x5e9   : > { %v2873_v62 = vmax.f32 %v2841_v63, %v2789_v30  ;;  %v2876_v4 = vmax.f32 %v2844_v45, %v2798_v49  ;;  %v3548_v63 = vsel %vm942_vm4, %v3458_v61, -inf  ;;  %v4285_v3 = vsel %vm942_vm4, %v4195_v17, -inf  ;;  %v4298_v61 = vld [vmem:[#allocation2 + $0x320] sm:$0xff] }
 0x5ea   : > { %v4448_v19 = vld [vmem:[#allocation2 + $0x1b8] sm:$0xff]  ;;  %v4197_v46 = vmax.f32 %v4131_v1, %v4165_v9 }
 0x5eb   : > { %4576 = vst.msk [vmem:[%s7494_s17 + $0x1b8] sm:$0xff] %vm460_vm5, %v4448_v19  ;;  %2905 = vst.msk [vmem:[#allocation2 + $0x1a8] sm:$0xff] %vm460_vm5, %v2873_v62  ;;  %4280 = vmax.xlane.f32.xlu0 %v4279_v47  ;;  %v4451_v26 = vld [vmem:[#allocation2 + $0x1d0] sm:$0xff] }
 0x5ec   : > { %v2069_v8 = vpop.xlane.xlu0 %2068  ;;  %4579 = vst.msk [vmem:[%s7494_s17 + $0x1d0] sm:$0xff] %vm460_vm5, %v4451_v26  ;;  %2908 = vst.msk [vmem:[#allocation2 + $0x1c0] sm:$0xff] %vm460_vm5, %v2876_v4  ;;  %v2078_v32 = vpop.xlane.xlu1 %2077 }
 0x5ed   : > { %v2141_v31 = vmax.f32 %v2109_v0, %v2069_v8  ;;  %v2144_v10 = vmax.f32 %v2112_v16, %v2078_v32  ;;  %v4295_v8 = vld [vmem:[#allocation2 + $0x308] sm:$0xff] }
 0x5ee   : > { %v4414_v48 = vld [vmem:[#allocation2 + $0xa8] sm:$0xff] }
 0x5ef   : > { %4542 = vst.msk [vmem:[%s7494_s17 + $0xa8] sm:$0xff] %vm460_vm5, %v4414_v48  ;;  %2174 = vst.msk [vmem:[#allocation2 + $0xd8] sm:$0xff] %vm460_vm5, %v2141_v31  ;;  %3537 = vmax.xlane.f32.xlu0 %v3536_v14  ;;  %v4417_v53 = vld [vmem:[#allocation2 + $0xc0] sm:$0xff]  ;;  %v4291_v31 = vsel %vm942_vm4, %v4197_v46, -inf  ;;  %v2111_v16 = vld [vmem:[#allocation2 + $0xe8] sm:$0xff] }
 0x5f0   : > { %v2807_v40 = vpop.xlane.xlu0 %2806  ;;  %4545 = vst.msk [vmem:[%s7494_s17 + $0xc0] sm:$0xff] %vm460_vm5, %v4417_v53  ;;  %2177 = vst.msk [vmem:[#allocation2 + $0xf0] sm:$0xff] %vm460_vm5, %v2144_v10  ;;  %v2816_v21 = vpop.xlane.xlu1 %2815  ;;  %v3563_v48 = vld [vmem:[#allocation2 + $0x230] sm:$0xff] }
 0x5f1   : > { %v2879_v35 = vmax.f32 %v2847_v23, %v2807_v40  ;;  %v2882_v36 = vmax.f32 %v2850_v2, %v2816_v21  ;;  %v2849_v23 = vld [vmem:[#allocation2 + $0x1e8] sm:$0xff]  ;;  %v4300_v2 = vld [vmem:[#allocation2 + $0x330] sm:$0xff]  ;;  %v3561_v21 = vld [vmem:[#allocation2 + $0x220] sm:$0xff] }
 0x5f2   : > { %v4446_v20 = vld [vmem:[#allocation2 + $0x1a8] sm:$0xff] }
 0x5f3   : > { %4574 = vst.msk [vmem:[%s7494_s17 + $0x1a8] sm:$0xff] %vm460_vm5, %v4446_v20  ;;  %2911 = vst.msk [vmem:[#allocation2 + $0x1d8] sm:$0xff] %vm460_vm5, %v2879_v35  ;;  %4274 = vmax.xlane.f32.xlu0 %v4273_v27  ;;  %v4449_v43 = vld [vmem:[#allocation2 + $0x1c0] sm:$0xff] }
 0x5f4   : > { %v2063_v60 = vpop.xlane.xlu0 %2062  ;;  %4577 = vst.msk [vmem:[%s7494_s17 + $0x1c0] sm:$0xff] %vm460_vm5, %v4449_v43  ;;  %2914 = vst.msk [vmem:[#allocation2 + $0x1f0] sm:$0xff] %vm460_vm5, %v2882_v36  ;;  %v2072_v13 = vpop.xlane.xlu1 %2071 }
 0x5f5   : > { %v2139_v7 = vmax.f32 %v2107_v33, %v2063_v60  ;;  %v2142_v22 = vmax.f32 %v2110_v44, %v2072_v13  ;;  %v4296_v60 = vld [vmem:[#allocation2 + $0x310] sm:$0xff] }
 0x5f6   : > { %v4420_v41 = vld [vmem:[#allocation2 + $0xd8] sm:$0xff] }
 0x5f7   : > { %4548 = vst.msk [vmem:[%s7494_s17 + $0xd8] sm:$0xff] %vm460_vm5, %v4420_v41  ;;  %2172 = vst.msk [vmem:[#allocation2 + $0xc8] sm:$0xff] %vm460_vm5, %v2139_v7  ;;  %3555 = vmax.xlane.f32.xlu0 %v3554_v57  ;;  %v4423_v56 = vld [vmem:[#allocation2 + $0xf0] sm:$0xff]  ;;  %v3557_v41 = vld [vmem:[#allocation2 + $0x200] sm:$0xff] }
 0x5f8   : > { %v2801_v50 = vpop.xlane.xlu0 %2800  ;;  %4551 = vst.msk [vmem:[%s7494_s17 + $0xf0] sm:$0xff] %vm460_vm5, %v4423_v56  ;;  %2175 = vst.msk [vmem:[#allocation2 + $0xe0] sm:$0xff] %vm460_vm5, %v2142_v22  ;;  %v2810_v29 = vpop.xlane.xlu1 %2809  ;;  %v3567_v56 = vld [vmem:[#allocation2 + $0x250] sm:$0xff] }
 0x5f9   : > { %v2877_v58 = vmax.f32 %v2845_v37, %v2801_v50  ;;  %v2880_v30 = vmax.f32 %v2848_v24, %v2810_v29  ;;  %v4294_v24 = vld [vmem:[#allocation2 + $0x300] sm:$0xff]  ;;  %v4304_v29 = vld [vmem:[#allocation2 + $0x350] sm:$0xff] }
 0x5fa   : > { %v4452_v52 = vld [vmem:[#allocation2 + $0x1d8] sm:$0xff] }
 0x5fb   : > { %4580 = vst.msk [vmem:[%s7494_s17 + $0x1d8] sm:$0xff] %vm460_vm5, %v4452_v52  ;;  %2909 = vst.msk [vmem:[#allocation2 + $0x1c8] sm:$0xff] %vm460_vm5, %v2877_v58  ;;  %3549 = vmax.xlane.f32.xlu0 %v3548_v63  ;;  %v4455_v62 = vld [vmem:[#allocation2 + $0x1f0] sm:$0xff] }
 0x5fc   : > { %v2081_v42 = vpop.xlane.xlu0 %2080  ;;  %4583 = vst.msk [vmem:[%s7494_s17 + $0x1f0] sm:$0xff] %vm460_vm5, %v4455_v62  ;;  %2912 = vst.msk [vmem:[#allocation2 + $0x1e0] sm:$0xff] %vm460_vm5, %v2880_v30  ;;  %v3466_v19 = vpop.xlane.xlu1 %3465 }
 0x5fd   : > { %v2145_v45 = vmax.f32 %v2113_v18, %v2081_v42  ;;  %v3590_v47 = vmax.f32 %v3558_v28, %v3466_v19  ;;  %v3560_v42 = vld [vmem:[#allocation2 + $0x218] sm:$0xff] }
 0x5fe   : > { %v4418_v39 = vld [vmem:[#allocation2 + $0xc8] sm:$0xff]  ;;  %v4297_v19 = vld [vmem:[#allocation2 + $0x318] sm:$0xff] }
 0x5ff   : > { %4546 = vst.msk [vmem:[%s7494_s17 + $0xc8] sm:$0xff] %vm460_vm5, %v4418_v39  ;;  %2178 = vst.msk [vmem:[#allocation2 + $0xf8] sm:$0xff] %vm460_vm5, %v2145_v45  ;;  %4286 = vmax.xlane.f32.xlu0 %v4285_v3  ;;  %v4421_v49 = vld [vmem:[#allocation2 + $0xe0] sm:$0xff] }
 0x600   : > { %v2819_v0 = vpop.xlane.xlu0 %2818  ;;  %4549 = vst.msk [vmem:[%s7494_s17 + $0xe0] sm:$0xff] %vm460_vm5, %v4421_v49  ;;  %3622 = vst.msk [vmem:[#allocation2 + $0x208] sm:$0xff] %vm460_vm5, %v3590_v47  ;;  %v4203_v12 = vpop.xlane.xlu1 %4202  ;;  %v3565_v3 = vld [vmem:[#allocation2 + $0x240] sm:$0xff] }
 0x601   : > { %v2883_v4 = vmax.f32 %v2851_v5, %v2819_v0  ;;  %v4327_v15 = vmax.f32 %v4295_v8, %v4203_v12 }
 0x602   : > { %v4450_v26 = vld [vmem:[#allocation2 + $0x1c8] sm:$0xff] }
 0x603   : > { %4578 = vst.msk [vmem:[%s7494_s17 + $0x1c8] sm:$0xff] %vm460_vm5, %v4450_v26  ;;  %2915 = vst.msk [vmem:[#allocation2 + $0x1f8] sm:$0xff] %vm460_vm5, %v2883_v4  ;;  %4292 = vmax.xlane.f32.xlu0 %v4291_v31  ;;  %v4453_v38 = vld [vmem:[#allocation2 + $0x1e0] sm:$0xff] }
 0x604   : > { %v2075_v11 = vpop.xlane.xlu0 %2074  ;;  %4581 = vst.msk [vmem:[%s7494_s17 + $0x1e0] sm:$0xff] %vm460_vm5, %v4453_v38  ;;  %4359 = vst.msk [vmem:[#allocation2 + $0x308] sm:$0xff] %vm460_vm5, %v4327_v15  ;;  %v3481_v32 = vpop.xlane.xlu1 %3480  ;;  %v4302_v26 = vld [vmem:[#allocation2 + $0x340] sm:$0xff] }
 0x605   : > { %v2143_v6 = vmax.f32 %v2111_v16, %v2075_v11  ;;  %v3595_v10 = vmax.f32 %v3563_v48, %v3481_v32  ;;  %v3564_v16 = vld [vmem:[#allocation2 + $0x238] sm:$0xff]  ;;  %v3571_v48 = vld [vmem:[#allocation2 + $0x270] sm:$0xff] }
 0x606   : > { %v4424_v14 = vld [vmem:[#allocation2 + $0xf8] sm:$0xff] }
 0x607   : > { %4552 = vst.msk [vmem:[%s7494_s17 + $0xf8] sm:$0xff] %vm460_vm5, %v4424_v14  ;;  %2176 = vst.msk [vmem:[#allocation2 + $0xe8] sm:$0xff] %vm460_vm5, %v2143_v6  ;;  %v4458_v53 = vld [vmem:[#allocation2 + $0x208] sm:$0xff] }
 0x608   : > { %v2813_v40 = vpop.xlane.xlu0 %2812  ;;  %4586 = vst.msk [vmem:[%s7494_s17 + $0x208] sm:$0xff] %vm460_vm5, %v4458_v53  ;;  %3627 = vst.msk [vmem:[#allocation2 + $0x230] sm:$0xff] %vm460_vm5, %v3595_v10  ;;  %v4218_v59 = vpop.xlane.xlu1 %4217 }
 0x609   : > { %v2881_v35 = vmax.f32 %v2849_v23, %v2813_v40  ;;  %v4332_v54 = vmax.f32 %v4300_v2, %v4218_v59  ;;  %v4301_v23 = vld [vmem:[#allocation2 + $0x338] sm:$0xff]  ;;  %v4308_v2 = vld [vmem:[#allocation2 + $0x370] sm:$0xff] }
 0x60a   : > { %v4456_v51 = vld [vmem:[#allocation2 + $0x1f8] sm:$0xff] }
 0x60b   : > { %4584 = vst.msk [vmem:[%s7494_s17 + $0x1f8] sm:$0xff] %vm460_vm5, %v4456_v51  ;;  %2913 = vst.msk [vmem:[#allocation2 + $0x1e8] sm:$0xff] %vm460_vm5, %v2881_v35  ;;  %v4490_v27 = vld [vmem:[#allocation2 + $0x308] sm:$0xff] }
 0x60c   : > { %v3469_v20 = vpop.xlane.xlu0 %3468  ;;  %4618 = vst.msk [vmem:[%s7494_s17 + $0x308] sm:$0xff] %vm460_vm5, %v4490_v27  ;;  %4364 = vst.msk [vmem:[#allocation2 + $0x330] sm:$0xff] %vm460_vm5, %v4332_v54  ;;  %v3475_v43 = vpop.xlane.xlu1 %3474 }
 0x60d   : > { %v3591_v33 = vmax.f32 %v3559_v34, %v3469_v20  ;;  %v3593_v7 = vmax.f32 %v3561_v21, %v3475_v43  ;;  %v3562_v34 = vld [vmem:[#allocation2 + $0x228] sm:$0xff]  ;;  %v3569_v21 = vld [vmem:[#allocation2 + $0x260] sm:$0xff] }
 0x60e   : > { %v4422_v36 = vld [vmem:[#allocation2 + $0xe8] sm:$0xff] }
 0x60f   : > { %4550 = vst.msk [vmem:[%s7494_s17 + $0xe8] sm:$0xff] %vm460_vm5, %v4422_v36  ;;  %3623 = vst.msk [vmem:[#allocation2 + $0x210] sm:$0xff] %vm460_vm5, %v3591_v33  ;;  %v4463_v25 = vld [vmem:[#allocation2 + $0x230] sm:$0xff] }
 0x610   : > { %v4206_v44 = vpop.xlane.xlu0 %4205  ;;  %4591 = vst.msk [vmem:[%s7494_s17 + $0x230] sm:$0xff] %vm460_vm5, %v4463_v25  ;;  %3625 = vst.msk [vmem:[#allocation2 + $0x220] sm:$0xff] %vm460_vm5, %v3593_v7  ;;  %v4212_v57 = vpop.xlane.xlu1 %4211 }
 0x611   : > { %v4328_v1 = vmax.f32 %v4296_v60, %v4206_v44  ;;  %v4330_v37 = vmax.f32 %v4298_v61, %v4212_v57  ;;  %v4299_v60 = vld [vmem:[#allocation2 + $0x328] sm:$0xff]  ;;  %v4306_v61 = vld [vmem:[#allocation2 + $0x360] sm:$0xff] }
 0x612   : > { %v4454_v55 = vld [vmem:[#allocation2 + $0x1e8] sm:$0xff] }
 0x613   : > { %4582 = vst.msk [vmem:[%s7494_s17 + $0x1e8] sm:$0xff] %vm460_vm5, %v4454_v55  ;;  %4360 = vst.msk [vmem:[#allocation2 + $0x310] sm:$0xff] %vm460_vm5, %v4328_v1  ;;  %v4495_v22 = vld [vmem:[#allocation2 + $0x330] sm:$0xff] }
 0x614   : > { %v3463_v13 = vpop.xlane.xlu0 %3462  ;;  %4623 = vst.msk [vmem:[%s7494_s17 + $0x330] sm:$0xff] %vm460_vm5, %v4495_v22  ;;  %4362 = vst.msk [vmem:[#allocation2 + $0x320] sm:$0xff] %vm460_vm5, %v4330_v37  ;;  %v3493_v9 = vpop.xlane.xlu1 %3492 }
 0x615   : > { %v3589_v50 = vmax.f32 %v3557_v41, %v3463_v13  ;;  %v3599_v17 = vmax.f32 %v3567_v56, %v3493_v9  ;;  %v3568_v41 = vld [vmem:[#allocation2 + $0x258] sm:$0xff]  ;;  %v3575_v56 = vld [vmem:[#allocation2 + $0x290] sm:$0xff] }
 0x616   : > { %v4459_v58 = vld [vmem:[#allocation2 + $0x210] sm:$0xff] }
 0x617   : > { %4587 = vst.msk [vmem:[%s7494_s17 + $0x210] sm:$0xff] %vm460_vm5, %v4459_v58  ;;  %3621 = vst.msk [vmem:[#allocation2 + $0x200] sm:$0xff] %vm460_vm5, %v3589_v50  ;;  %v4461_v63 = vld [vmem:[#allocation2 + $0x220] sm:$0xff] }
 0x618   : > { %v4200_v52 = vpop.xlane.xlu0 %4199  ;;  %4589 = vst.msk [vmem:[%s7494_s17 + $0x220] sm:$0xff] %vm460_vm5, %v4461_v63  ;;  %3631 = vst.msk [vmem:[#allocation2 + $0x250] sm:$0xff] %vm460_vm5, %v3599_v17  ;;  %v4230_v62 = vpop.xlane.xlu1 %4229 }
 0x619   : > { %v4326_v18 = vmax.f32 %v4294_v24, %v4200_v52  ;;  %v4336_v45 = vmax.f32 %v4304_v29, %v4230_v62  ;;  %v4305_v24 = vld [vmem:[#allocation2 + $0x358] sm:$0xff]  ;;  %v4312_v29 = vld [vmem:[#allocation2 + $0x390] sm:$0xff] }
 0x61a   : > { %v4491_v30 = vld [vmem:[#allocation2 + $0x310] sm:$0xff] }
 0x61b   : > { %4619 = vst.msk [vmem:[%s7494_s17 + $0x310] sm:$0xff] %vm460_vm5, %v4491_v30  ;;  %4358 = vst.msk [vmem:[#allocation2 + $0x300] sm:$0xff] %vm460_vm5, %v4326_v18  ;;  %v4493_v46 = vld [vmem:[#allocation2 + $0x320] sm:$0xff] }
 0x61c   : > { %v3472_v28 = vpop.xlane.xlu0 %3471  ;;  %4621 = vst.msk [vmem:[%s7494_s17 + $0x320] sm:$0xff] %vm460_vm5, %v4493_v46  ;;  %4368 = vst.msk [vmem:[#allocation2 + $0x350] sm:$0xff] %vm460_vm5, %v4336_v45  ;;  %v3487_v47 = vpop.xlane.xlu1 %3486 }
 0x61d   : > { %v3592_v39 = vmax.f32 %v3560_v42, %v3472_v28  ;;  %v3597_v0 = vmax.f32 %v3565_v3, %v3487_v47  ;;  %v3566_v42 = vld [vmem:[#allocation2 + $0x248] sm:$0xff]  ;;  %v3573_v3 = vld [vmem:[#allocation2 + $0x280] sm:$0xff] }
 0x61e   : > { %v4457_v5 = vld [vmem:[#allocation2 + $0x200] sm:$0xff] }
 0x61f   : > { %4585 = vst.msk [vmem:[%s7494_s17 + $0x200] sm:$0xff] %vm460_vm5, %v4457_v5  ;;  %3624 = vst.msk [vmem:[#allocation2 + $0x218] sm:$0xff] %vm460_vm5, %v3592_v39  ;;  %v4467_v4 = vld [vmem:[#allocation2 + $0x250] sm:$0xff] }
 0x620   : > { %v4209_v49 = vpop.xlane.xlu0 %4208  ;;  %4595 = vst.msk [vmem:[%s7494_s17 + $0x250] sm:$0xff] %vm460_vm5, %v4467_v4  ;;  %3629 = vst.msk [vmem:[#allocation2 + $0x240] sm:$0xff] %vm460_vm5, %v3597_v0  ;;  %v4224_v12 = vpop.xlane.xlu1 %4223 }
 0x621   : > { %v4329_v8 = vmax.f32 %v4297_v19, %v4209_v49  ;;  %v4334_v15 = vmax.f32 %v4302_v26, %v4224_v12  ;;  %v4303_v19 = vld [vmem:[#allocation2 + $0x348] sm:$0xff]  ;;  %v4310_v26 = vld [vmem:[#allocation2 + $0x380] sm:$0xff] }
 0x622   : > { %v4489_v31 = vld [vmem:[#allocation2 + $0x300] sm:$0xff] }
 0x623   : > { %4617 = vst.msk [vmem:[%s7494_s17 + $0x300] sm:$0xff] %vm460_vm5, %v4489_v31  ;;  %4361 = vst.msk [vmem:[#allocation2 + $0x318] sm:$0xff] %vm460_vm5, %v4329_v8  ;;  %v4499_v38 = vld [vmem:[#allocation2 + $0x350] sm:$0xff] }
 0x624   : > { %v3484_v11 = vpop.xlane.xlu0 %3483  ;;  %4627 = vst.msk [vmem:[%s7494_s17 + $0x350] sm:$0xff] %vm460_vm5, %v4499_v38  ;;  %4366 = vst.msk [vmem:[#allocation2 + $0x340] sm:$0xff] %vm460_vm5, %v4334_v15  ;;  %v3505_v32 = vpop.xlane.xlu1 %3504 }
 0x625   : > { %v3596_v6 = vmax.f32 %v3564_v16, %v3484_v11  ;;  %v3603_v10 = vmax.f32 %v3571_v48, %v3505_v32  ;;  %v3572_v16 = vld [vmem:[#allocation2 + $0x278] sm:$0xff]  ;;  %v3579_v48 = vld [vmem:[#allocation2 + $0x2b0] sm:$0xff] }
 0x626   : > { %v4460_v14 = vld [vmem:[#allocation2 + $0x218] sm:$0xff] }
 0x627   : > { %4588 = vst.msk [vmem:[%s7494_s17 + $0x218] sm:$0xff] %vm460_vm5, %v4460_v14  ;;  %3628 = vst.msk [vmem:[#allocation2 + $0x238] sm:$0xff] %vm460_vm5, %v3596_v6  ;;  %v4465_v53 = vld [vmem:[#allocation2 + $0x240] sm:$0xff] }
 0x628   : > { %v4221_v40 = vpop.xlane.xlu0 %4220  ;;  %4593 = vst.msk [vmem:[%s7494_s17 + $0x240] sm:$0xff] %vm460_vm5, %v4465_v53  ;;  %3635 = vst.msk [vmem:[#allocation2 + $0x270] sm:$0xff] %vm460_vm5, %v3603_v10  ;;  %v4242_v59 = vpop.xlane.xlu1 %4241 }
 0x629   : > { %v4333_v35 = vmax.f32 %v4301_v23, %v4221_v40  ;;  %v4340_v54 = vmax.f32 %v4308_v2, %v4242_v59  ;;  %v4309_v23 = vld [vmem:[#allocation2 + $0x378] sm:$0xff]  ;;  %v4316_v2 = vld [vmem:[#allocation2 + $0x3b0] sm:$0xff] }
 0x62a   : > { %v4492_v51 = vld [vmem:[#allocation2 + $0x318] sm:$0xff] }
 0x62b   : > { %4620 = vst.msk [vmem:[%s7494_s17 + $0x318] sm:$0xff] %vm460_vm5, %v4492_v51  ;;  %4365 = vst.msk [vmem:[#allocation2 + $0x338] sm:$0xff] %vm460_vm5, %v4333_v35  ;;  %v4497_v27 = vld [vmem:[#allocation2 + $0x340] sm:$0xff] }
 0x62c   : > { %v3478_v20 = vpop.xlane.xlu0 %3477  ;;  %4625 = vst.msk [vmem:[%s7494_s17 + $0x340] sm:$0xff] %vm460_vm5, %v4497_v27  ;;  %4372 = vst.msk [vmem:[#allocation2 + $0x370] sm:$0xff] %vm460_vm5, %v4340_v54  ;;  %v3499_v43 = vpop.xlane.xlu1 %3498 }
 0x62d   : > { %v3594_v33 = vmax.f32 %v3562_v34, %v3478_v20  ;;  %v3601_v7 = vmax.f32 %v3569_v21, %v3499_v43  ;;  %v3570_v34 = vld [vmem:[#allocation2 + $0x268] sm:$0xff]  ;;  %v3577_v21 = vld [vmem:[#allocation2 + $0x2a0] sm:$0xff] }
 0x62e   : > { %v4464_v36 = vld [vmem:[#allocation2 + $0x238] sm:$0xff] }
 0x62f   : > { %4592 = vst.msk [vmem:[%s7494_s17 + $0x238] sm:$0xff] %vm460_vm5, %v4464_v36  ;;  %3626 = vst.msk [vmem:[#allocation2 + $0x228] sm:$0xff] %vm460_vm5, %v3594_v33  ;;  %v4471_v25 = vld [vmem:[#allocation2 + $0x270] sm:$0xff] }
 0x630   : > { %v4215_v44 = vpop.xlane.xlu0 %4214  ;;  %4599 = vst.msk [vmem:[%s7494_s17 + $0x270] sm:$0xff] %vm460_vm5, %v4471_v25  ;;  %3633 = vst.msk [vmem:[#allocation2 + $0x260] sm:$0xff] %vm460_vm5, %v3601_v7  ;;  %v4236_v57 = vpop.xlane.xlu1 %4235 }
 0x631   : > { %v4331_v1 = vmax.f32 %v4299_v60, %v4215_v44  ;;  %v4338_v37 = vmax.f32 %v4306_v61, %v4236_v57  ;;  %v4307_v60 = vld [vmem:[#allocation2 + $0x368] sm:$0xff]  ;;  %v4314_v61 = vld [vmem:[#allocation2 + $0x3a0] sm:$0xff] }
 0x632   : > { %v4496_v55 = vld [vmem:[#allocation2 + $0x338] sm:$0xff] }
 0x633   : > { %4624 = vst.msk [vmem:[%s7494_s17 + $0x338] sm:$0xff] %vm460_vm5, %v4496_v55  ;;  %4363 = vst.msk [vmem:[#allocation2 + $0x328] sm:$0xff] %vm460_vm5, %v4331_v1  ;;  %v4503_v22 = vld [vmem:[#allocation2 + $0x370] sm:$0xff] }
 0x634   : > { %v3496_v13 = vpop.xlane.xlu0 %3495  ;;  %4631 = vst.msk [vmem:[%s7494_s17 + $0x370] sm:$0xff] %vm460_vm5, %v4503_v22  ;;  %4370 = vst.msk [vmem:[#allocation2 + $0x360] sm:$0xff] %vm460_vm5, %v4338_v37  ;;  %v3517_v9 = vpop.xlane.xlu1 %3516 }
 0x635   : > { %v3600_v50 = vmax.f32 %v3568_v41, %v3496_v13  ;;  %v3607_v17 = vmax.f32 %v3575_v56, %v3517_v9  ;;  %v3576_v41 = vld [vmem:[#allocation2 + $0x298] sm:$0xff]  ;;  %v3583_v56 = vld [vmem:[#allocation2 + $0x2d0] sm:$0xff] }
 0x636   : > { %v4462_v58 = vld [vmem:[#allocation2 + $0x228] sm:$0xff] }
 0x637   : > { %4590 = vst.msk [vmem:[%s7494_s17 + $0x228] sm:$0xff] %vm460_vm5, %v4462_v58  ;;  %3632 = vst.msk [vmem:[#allocation2 + $0x258] sm:$0xff] %vm460_vm5, %v3600_v50  ;;  %v4469_v63 = vld [vmem:[#allocation2 + $0x260] sm:$0xff] }
 0x638   : > { %v4233_v52 = vpop.xlane.xlu0 %4232  ;;  %4597 = vst.msk [vmem:[%s7494_s17 + $0x260] sm:$0xff] %vm460_vm5, %v4469_v63  ;;  %3639 = vst.msk [vmem:[#allocation2 + $0x290] sm:$0xff] %vm460_vm5, %v3607_v17  ;;  %v4254_v62 = vpop.xlane.xlu1 %4253 }
 0x639   : > { %v4337_v18 = vmax.f32 %v4305_v24, %v4233_v52  ;;  %v4344_v45 = vmax.f32 %v4312_v29, %v4254_v62  ;;  %v4313_v24 = vld [vmem:[#allocation2 + $0x398] sm:$0xff]  ;;  %v4320_v29 = vld [vmem:[#allocation2 + $0x3d0] sm:$0xff] }
 0x63a   : > { %v4494_v30 = vld [vmem:[#allocation2 + $0x328] sm:$0xff] }
 0x63b   : > { %4622 = vst.msk [vmem:[%s7494_s17 + $0x328] sm:$0xff] %vm460_vm5, %v4494_v30  ;;  %4369 = vst.msk [vmem:[#allocation2 + $0x358] sm:$0xff] %vm460_vm5, %v4337_v18  ;;  %v4501_v46 = vld [vmem:[#allocation2 + $0x360] sm:$0xff] }
 0x63c   : > { %v3490_v28 = vpop.xlane.xlu0 %3489  ;;  %4629 = vst.msk [vmem:[%s7494_s17 + $0x360] sm:$0xff] %vm460_vm5, %v4501_v46  ;;  %4376 = vst.msk [vmem:[#allocation2 + $0x390] sm:$0xff] %vm460_vm5, %v4344_v45  ;;  %v3511_v47 = vpop.xlane.xlu1 %3510 }
 0x63d   : > { %v3598_v39 = vmax.f32 %v3566_v42, %v3490_v28  ;;  %v3605_v0 = vmax.f32 %v3573_v3, %v3511_v47  ;;  %v3574_v42 = vld [vmem:[#allocation2 + $0x288] sm:$0xff]  ;;  %v3581_v3 = vld [vmem:[#allocation2 + $0x2c0] sm:$0xff] }
 0x63e   : > { %v4468_v5 = vld [vmem:[#allocation2 + $0x258] sm:$0xff] }
 0x63f   : > { %4596 = vst.msk [vmem:[%s7494_s17 + $0x258] sm:$0xff] %vm460_vm5, %v4468_v5  ;;  %3630 = vst.msk [vmem:[#allocation2 + $0x248] sm:$0xff] %vm460_vm5, %v3598_v39  ;;  %v4475_v4 = vld [vmem:[#allocation2 + $0x290] sm:$0xff] }
 0x640   : > { %v4227_v49 = vpop.xlane.xlu0 %4226  ;;  %4603 = vst.msk [vmem:[%s7494_s17 + $0x290] sm:$0xff] %vm460_vm5, %v4475_v4  ;;  %3637 = vst.msk [vmem:[#allocation2 + $0x280] sm:$0xff] %vm460_vm5, %v3605_v0  ;;  %v4248_v12 = vpop.xlane.xlu1 %4247 }
 0x641   : > { %v4335_v8 = vmax.f32 %v4303_v19, %v4227_v49  ;;  %v4342_v15 = vmax.f32 %v4310_v26, %v4248_v12  ;;  %v4311_v19 = vld [vmem:[#allocation2 + $0x388] sm:$0xff]  ;;  %v4318_v26 = vld [vmem:[#allocation2 + $0x3c0] sm:$0xff] }
 0x642   : > { %v4500_v31 = vld [vmem:[#allocation2 + $0x358] sm:$0xff] }
 0x643   : > { %4628 = vst.msk [vmem:[%s7494_s17 + $0x358] sm:$0xff] %vm460_vm5, %v4500_v31  ;;  %4367 = vst.msk [vmem:[#allocation2 + $0x348] sm:$0xff] %vm460_vm5, %v4335_v8  ;;  %v4507_v38 = vld [vmem:[#allocation2 + $0x390] sm:$0xff] }
 0x644   : > { %v3508_v11 = vpop.xlane.xlu0 %3507  ;;  %4635 = vst.msk [vmem:[%s7494_s17 + $0x390] sm:$0xff] %vm460_vm5, %v4507_v38  ;;  %4374 = vst.msk [vmem:[#allocation2 + $0x380] sm:$0xff] %vm460_vm5, %v4342_v15  ;;  %v3529_v32 = vpop.xlane.xlu1 %3528 }
 0x645   : > { %v3604_v6 = vmax.f32 %v3572_v16, %v3508_v11  ;;  %v3611_v10 = vmax.f32 %v3579_v48, %v3529_v32  ;;  %v3580_v16 = vld [vmem:[#allocation2 + $0x2b8] sm:$0xff]  ;;  %v3587_v48 = vld [vmem:[#allocation2 + $0x2f0] sm:$0xff] }
 0x646   : > { %v4466_v14 = vld [vmem:[#allocation2 + $0x248] sm:$0xff] }
 0x647   : > { %4594 = vst.msk [vmem:[%s7494_s17 + $0x248] sm:$0xff] %vm460_vm5, %v4466_v14  ;;  %3636 = vst.msk [vmem:[#allocation2 + $0x278] sm:$0xff] %vm460_vm5, %v3604_v6  ;;  %v4473_v53 = vld [vmem:[#allocation2 + $0x280] sm:$0xff] }
 0x648   : > { %v4245_v40 = vpop.xlane.xlu0 %4244  ;;  %4601 = vst.msk [vmem:[%s7494_s17 + $0x280] sm:$0xff] %vm460_vm5, %v4473_v53  ;;  %3643 = vst.msk [vmem:[#allocation2 + $0x2b0] sm:$0xff] %vm460_vm5, %v3611_v10  ;;  %v4266_v59 = vpop.xlane.xlu1 %4265 }
 0x649   : > { %v4341_v35 = vmax.f32 %v4309_v23, %v4245_v40  ;;  %v4348_v54 = vmax.f32 %v4316_v2, %v4266_v59  ;;  %v4317_v23 = vld [vmem:[#allocation2 + $0x3b8] sm:$0xff]  ;;  %v3585_v2 = vld [vmem:[#allocation2 + $0x2e0] sm:$0xff] }
 0x64a   : > { %v4498_v51 = vld [vmem:[#allocation2 + $0x348] sm:$0xff] }
 0x64b   : > { %4626 = vst.msk [vmem:[%s7494_s17 + $0x348] sm:$0xff] %vm460_vm5, %v4498_v51  ;;  %4373 = vst.msk [vmem:[#allocation2 + $0x378] sm:$0xff] %vm460_vm5, %v4341_v35  ;;  %v4505_v27 = vld [vmem:[#allocation2 + $0x380] sm:$0xff] }
 0x64c   : > { %v3502_v20 = vpop.xlane.xlu0 %3501  ;;  %4633 = vst.msk [vmem:[%s7494_s17 + $0x380] sm:$0xff] %vm460_vm5, %v4505_v27  ;;  %4380 = vst.msk [vmem:[#allocation2 + $0x3b0] sm:$0xff] %vm460_vm5, %v4348_v54  ;;  %v3523_v43 = vpop.xlane.xlu1 %3522 }
 0x64d   : > { %v3602_v33 = vmax.f32 %v3570_v34, %v3502_v20  ;;  %v3609_v7 = vmax.f32 %v3577_v21, %v3523_v43  ;;  %v3578_v34 = vld [vmem:[#allocation2 + $0x2a8] sm:$0xff]  ;;  %v4322_v21 = vld [vmem:[#allocation2 + $0x3e0] sm:$0xff] }
 0x64e   : > { %v4472_v36 = vld [vmem:[#allocation2 + $0x278] sm:$0xff] }
 0x64f   : > { %4600 = vst.msk [vmem:[%s7494_s17 + $0x278] sm:$0xff] %vm460_vm5, %v4472_v36  ;;  %3634 = vst.msk [vmem:[#allocation2 + $0x268] sm:$0xff] %vm460_vm5, %v3602_v33  ;;  %v4479_v25 = vld [vmem:[#allocation2 + $0x2b0] sm:$0xff] }
 0x650   : > { %v4239_v44 = vpop.xlane.xlu0 %4238  ;;  %4607 = vst.msk [vmem:[%s7494_s17 + $0x2b0] sm:$0xff] %vm460_vm5, %v4479_v25  ;;  %3641 = vst.msk [vmem:[#allocation2 + $0x2a0] sm:$0xff] %vm460_vm5, %v3609_v7  ;;  %v4260_v57 = vpop.xlane.xlu1 %4259 }
 0x651   : > { %v4339_v1 = vmax.f32 %v4307_v60, %v4239_v44  ;;  %v4346_v37 = vmax.f32 %v4314_v61, %v4260_v57  ;;  %v4315_v60 = vld [vmem:[#allocation2 + $0x3a8] sm:$0xff]  ;;  %v4324_v61 = vld [vmem:[#allocation2 + $0x3f0] sm:$0xff] }
 0x652   : > { %v4504_v55 = vld [vmem:[#allocation2 + $0x378] sm:$0xff] }
 0x653   : > { %4632 = vst.msk [vmem:[%s7494_s17 + $0x378] sm:$0xff] %vm460_vm5, %v4504_v55  ;;  %4371 = vst.msk [vmem:[#allocation2 + $0x368] sm:$0xff] %vm460_vm5, %v4339_v1  ;;  %v4511_v22 = vld [vmem:[#allocation2 + $0x3b0] sm:$0xff] }
 0x654   : > { %v3520_v13 = vpop.xlane.xlu0 %3519  ;;  %4639 = vst.msk [vmem:[%s7494_s17 + $0x3b0] sm:$0xff] %vm460_vm5, %v4511_v22  ;;  %4378 = vst.msk [vmem:[#allocation2 + $0x3a0] sm:$0xff] %vm460_vm5, %v4346_v37  ;;  %v3541_v9 = vpop.xlane.xlu1 %3540 }
 0x655   : > { %v3608_v50 = vmax.f32 %v3576_v41, %v3520_v13  ;;  %v3615_v17 = vmax.f32 %v3583_v56, %v3541_v9  ;;  %v3584_v41 = vld [vmem:[#allocation2 + $0x2d8] sm:$0xff] }
 0x656   : > { %v4470_v58 = vld [vmem:[#allocation2 + $0x268] sm:$0xff] }
 0x657   : > { %4598 = vst.msk [vmem:[%s7494_s17 + $0x268] sm:$0xff] %vm460_vm5, %v4470_v58  ;;  %3640 = vst.msk [vmem:[#allocation2 + $0x298] sm:$0xff] %vm460_vm5, %v3608_v50  ;;  %v4477_v63 = vld [vmem:[#allocation2 + $0x2a0] sm:$0xff]  ;;  %v4321_v58 = vld [vmem:[#allocation2 + $0x3d8] sm:$0xff] }
 0x658   : > { %v4257_v52 = vpop.xlane.xlu0 %4256  ;;  %4605 = vst.msk [vmem:[%s7494_s17 + $0x2a0] sm:$0xff] %vm460_vm5, %v4477_v63  ;;  %3647 = vst.msk [vmem:[#allocation2 + $0x2d0] sm:$0xff] %vm460_vm5, %v3615_v17  ;;  %v4278_v62 = vpop.xlane.xlu1 %4277  ;;  %v3582_v63 = vld [vmem:[#allocation2 + $0x2c8] sm:$0xff] }
 0x659   : > { %v4345_v18 = vmax.f32 %v4313_v24, %v4257_v52  ;;  %v4352_v45 = vmax.f32 %v4320_v29, %v4278_v62  ;;  %v4319_v62 = vld [vmem:[#allocation2 + $0x3c8] sm:$0xff] }
 0x65a   : > { %v4502_v30 = vld [vmem:[#allocation2 + $0x368] sm:$0xff] }
 0x65b   : > { %4630 = vst.msk [vmem:[%s7494_s17 + $0x368] sm:$0xff] %vm460_vm5, %v4502_v30  ;;  %4377 = vst.msk [vmem:[#allocation2 + $0x398] sm:$0xff] %vm460_vm5, %v4345_v18  ;;  %v4509_v46 = vld [vmem:[#allocation2 + $0x3a0] sm:$0xff] }
 0x65c   : > { %v3514_v28 = vpop.xlane.xlu0 %3513  ;;  %4637 = vst.msk [vmem:[%s7494_s17 + $0x3a0] sm:$0xff] %vm460_vm5, %v4509_v46  ;;  %4384 = vst.msk [vmem:[#allocation2 + $0x3d0] sm:$0xff] %vm460_vm5, %v4352_v45  ;;  %v3535_v47 = vpop.xlane.xlu1 %3534 }
 0x65d   : > { %v3606_v39 = vmax.f32 %v3574_v42, %v3514_v28  ;;  %v3613_v0 = vmax.f32 %v3581_v3, %v3535_v47  ;;  %v3586_v47 = vld [vmem:[#allocation2 + $0x2e8] sm:$0xff] }
 0x65e   : > { %v4476_v5 = vld [vmem:[#allocation2 + $0x298] sm:$0xff] }
 0x65f   : > { %4604 = vst.msk [vmem:[%s7494_s17 + $0x298] sm:$0xff] %vm460_vm5, %v4476_v5  ;;  %3638 = vst.msk [vmem:[#allocation2 + $0x288] sm:$0xff] %vm460_vm5, %v3606_v39  ;;  %v4483_v4 = vld [vmem:[#allocation2 + $0x2d0] sm:$0xff]  ;;  %v3588_v39 = vld [vmem:[#allocation2 + $0x2f8] sm:$0xff] }
 0x660   : > { %v4251_v49 = vpop.xlane.xlu0 %4250  ;;  %4611 = vst.msk [vmem:[%s7494_s17 + $0x2d0] sm:$0xff] %vm460_vm5, %v4483_v4  ;;  %3645 = vst.msk [vmem:[#allocation2 + $0x2c0] sm:$0xff] %vm460_vm5, %v3613_v0  ;;  %v4272_v12 = vpop.xlane.xlu1 %4271 }
 0x661   : > { %v4343_v8 = vmax.f32 %v4311_v19, %v4251_v49  ;;  %v4350_v15 = vmax.f32 %v4318_v26, %v4272_v12  ;;  %v4325_v12 = vld [vmem:[#allocation2 + $0x3f8] sm:$0xff] }
 0x662   : > { %v4508_v31 = vld [vmem:[#allocation2 + $0x398] sm:$0xff] }
 0x663   : > { %4636 = vst.msk [vmem:[%s7494_s17 + $0x398] sm:$0xff] %vm460_vm5, %v4508_v31  ;;  %4375 = vst.msk [vmem:[#allocation2 + $0x388] sm:$0xff] %vm460_vm5, %v4343_v8  ;;  %v4515_v38 = vld [vmem:[#allocation2 + $0x3d0] sm:$0xff]  ;;  %v4323_v8 = vld [vmem:[#allocation2 + $0x3e8] sm:$0xff] }
 0x664   : > { %v3532_v11 = vpop.xlane.xlu0 %3531  ;;  %4643 = vst.msk [vmem:[%s7494_s17 + $0x3d0] sm:$0xff] %vm460_vm5, %v4515_v38  ;;  %4382 = vst.msk [vmem:[#allocation2 + $0x3c0] sm:$0xff] %vm460_vm5, %v4350_v15  ;;  %v3553_v32 = vpop.xlane.xlu1 %3552 }
 0x665   : > { %v3612_v6 = vmax.f32 %v3580_v16, %v3532_v11  ;;  %v3619_v10 = vmax.f32 %v3587_v48, %v3553_v32 }
 0x666   : > { %v4474_v14 = vld [vmem:[#allocation2 + $0x288] sm:$0xff] }
 0x667   : > { %4602 = vst.msk [vmem:[%s7494_s17 + $0x288] sm:$0xff] %vm460_vm5, %v4474_v14  ;;  %3644 = vst.msk [vmem:[#allocation2 + $0x2b8] sm:$0xff] %vm460_vm5, %v3612_v6  ;;  %v4481_v53 = vld [vmem:[#allocation2 + $0x2c0] sm:$0xff] }
 0x668   : > { %v4269_v40 = vpop.xlane.xlu0 %4268  ;;  %4609 = vst.msk [vmem:[%s7494_s17 + $0x2c0] sm:$0xff] %vm460_vm5, %v4481_v53  ;;  %3651 = vst.msk [vmem:[#allocation2 + $0x2f0] sm:$0xff] %vm460_vm5, %v3619_v10  ;;  %v3547_v59 = vpop.xlane.xlu1 %3546 }
 0x669   : > { %v4349_v35 = vmax.f32 %v4317_v23, %v4269_v40  ;;  %v3617_v54 = vmax.f32 %v3585_v2, %v3547_v59 }
 0x66a   : > { %v4506_v51 = vld [vmem:[#allocation2 + $0x388] sm:$0xff] }
 0x66b   : > { %4634 = vst.msk [vmem:[%s7494_s17 + $0x388] sm:$0xff] %vm460_vm5, %v4506_v51  ;;  %4381 = vst.msk [vmem:[#allocation2 + $0x3b8] sm:$0xff] %vm460_vm5, %v4349_v35  ;;  %v4513_v27 = vld [vmem:[#allocation2 + $0x3c0] sm:$0xff] }
 0x66c   : > { %v3526_v20 = vpop.xlane.xlu0 %3525  ;;  %4641 = vst.msk [vmem:[%s7494_s17 + $0x3c0] sm:$0xff] %vm460_vm5, %v4513_v27  ;;  %3649 = vst.msk [vmem:[#allocation2 + $0x2e0] sm:$0xff] %vm460_vm5, %v3617_v54  ;;  %v4284_v43 = vpop.xlane.xlu1 %4283 }
 0x66d   : > { %v3610_v33 = vmax.f32 %v3578_v34, %v3526_v20  ;;  %v4354_v7 = vmax.f32 %v4322_v21, %v4284_v43 }
 0x66e   : > { %v4480_v36 = vld [vmem:[#allocation2 + $0x2b8] sm:$0xff] }
 0x66f   : > { %4608 = vst.msk [vmem:[%s7494_s17 + $0x2b8] sm:$0xff] %vm460_vm5, %v4480_v36  ;;  %3642 = vst.msk [vmem:[#allocation2 + $0x2a8] sm:$0xff] %vm460_vm5, %v3610_v33  ;;  %v4487_v25 = vld [vmem:[#allocation2 + $0x2f0] sm:$0xff] }
 0x670   : > { %v4263_v44 = vpop.xlane.xlu0 %4262  ;;  %4615 = vst.msk [vmem:[%s7494_s17 + $0x2f0] sm:$0xff] %vm460_vm5, %v4487_v25  ;;  %4386 = vst.msk [vmem:[#allocation2 + $0x3e0] sm:$0xff] %vm460_vm5, %v4354_v7  ;;  %v4290_v57 = vpop.xlane.xlu1 %4289 }
 0x671   : > { %v4347_v1 = vmax.f32 %v4315_v60, %v4263_v44  ;;  %v4356_v37 = vmax.f32 %v4324_v61, %v4290_v57 }
 0x672   : > { %v4512_v55 = vld [vmem:[#allocation2 + $0x3b8] sm:$0xff] }
 0x673   : > { %4640 = vst.msk [vmem:[%s7494_s17 + $0x3b8] sm:$0xff] %vm460_vm5, %v4512_v55  ;;  %4379 = vst.msk [vmem:[#allocation2 + $0x3a8] sm:$0xff] %vm460_vm5, %v4347_v1  ;;  %v4485_v22 = vld [vmem:[#allocation2 + $0x2e0] sm:$0xff] }
 0x674   : > { %v3544_v13 = vpop.xlane.xlu0 %3543  ;;  %4613 = vst.msk [vmem:[%s7494_s17 + $0x2e0] sm:$0xff] %vm460_vm5, %v4485_v22  ;;  %4388 = vst.msk [vmem:[#allocation2 + $0x3f0] sm:$0xff] %vm460_vm5, %v4356_v37 }
 0x675   : > { %v3616_v50 = vmax.f32 %v3584_v41, %v3544_v13 }
 0x676   : > { %v4478_v56 = vld [vmem:[#allocation2 + $0x2a8] sm:$0xff] }
 0x677   : > { %4606 = vst.msk [vmem:[%s7494_s17 + $0x2a8] sm:$0xff] %vm460_vm5, %v4478_v56  ;;  %3648 = vst.msk [vmem:[#allocation2 + $0x2d8] sm:$0xff] %vm460_vm5, %v3616_v50  ;;  %v4517_v9 = vld [vmem:[#allocation2 + $0x3e0] sm:$0xff] }
 0x678   : > { %v4281_v24 = vpop.xlane.xlu0 %4280  ;;  %4645 = vst.msk [vmem:[%s7494_s17 + $0x3e0] sm:$0xff] %vm460_vm5, %v4517_v9 }
 0x679   : > { %v4353_v17 = vmax.f32 %v4321_v58, %v4281_v24 }
 0x67a   : > { %v4510_v52 = vld [vmem:[#allocation2 + $0x3a8] sm:$0xff] }
 0x67b   : > { %4638 = vst.msk [vmem:[%s7494_s17 + $0x3a8] sm:$0xff] %vm460_vm5, %v4510_v52  ;;  %4385 = vst.msk [vmem:[#allocation2 + $0x3d8] sm:$0xff] %vm460_vm5, %v4353_v17  ;;  %v4519_v29 = vld [vmem:[#allocation2 + $0x3f0] sm:$0xff] }
 0x67c   : > { %v3538_v18 = vpop.xlane.xlu0 %3537  ;;  %4647 = vst.msk [vmem:[%s7494_s17 + $0x3f0] sm:$0xff] %vm460_vm5, %v4519_v29 }
 0x67d   : > { %v3614_v30 = vmax.f32 %v3582_v63, %v3538_v18 }
 0x67e   : > { %v4484_v42 = vld [vmem:[#allocation2 + $0x2d8] sm:$0xff] }
 0x67f   : > { %4612 = vst.msk [vmem:[%s7494_s17 + $0x2d8] sm:$0xff] %vm460_vm5, %v4484_v42  ;;  %3646 = vst.msk [vmem:[#allocation2 + $0x2c8] sm:$0xff] %vm460_vm5, %v3614_v30 }
 0x680   : > { %v4275_v45 = vpop.xlane.xlu0 %4274 }
 0x681   : > { %v4351_v28 = vmax.f32 %v4319_v62, %v4275_v45 }
 0x682   : > { %v4516_v46 = vld [vmem:[#allocation2 + $0x3d8] sm:$0xff] }
 0x683   : > { %4644 = vst.msk [vmem:[%s7494_s17 + $0x3d8] sm:$0xff] %vm460_vm5, %v4516_v46  ;;  %4383 = vst.msk [vmem:[#allocation2 + $0x3c8] sm:$0xff] %vm460_vm5, %v4351_v28 }
 0x684   : > { %v3556_v3 = vpop.xlane.xlu0 %3555 }
 0x685   : > { %v3620_v5 = vmax.f32 %v3588_v39, %v3556_v3 }
 0x686   : > { %v4482_v19 = vld [vmem:[#allocation2 + $0x2c8] sm:$0xff] }
 0x687   : > { %4610 = vst.msk [vmem:[%s7494_s17 + $0x2c8] sm:$0xff] %vm460_vm5, %v4482_v19  ;;  %3652 = vst.msk [vmem:[#allocation2 + $0x2f8] sm:$0xff] %vm460_vm5, %v3620_v5 }
 0x688   : > { %v3550_v0 = vpop.xlane.xlu0 %3549 }
 0x689   : > { %v3618_v49 = vmax.f32 %v3586_v47, %v3550_v0 }
 0x68a   : > { %v4514_v4 = vld [vmem:[#allocation2 + $0x3c8] sm:$0xff] }
 0x68b   : > { %4642 = vst.msk [vmem:[%s7494_s17 + $0x3c8] sm:$0xff] %vm460_vm5, %v4514_v4  ;;  %3650 = vst.msk [vmem:[#allocation2 + $0x2e8] sm:$0xff] %vm460_vm5, %v3618_v49 }
 0x68c   : > { %v4287_v26 = vpop.xlane.xlu0 %4286 }
 0x68d   : > { %v4355_v31 = vmax.f32 %v4323_v8, %v4287_v26 }
 0x68e   : > { %v4488_v16 = vld [vmem:[#allocation2 + $0x2f8] sm:$0xff] }
 0x68f   : > { %4616 = vst.msk [vmem:[%s7494_s17 + $0x2f8] sm:$0xff] %vm460_vm5, %v4488_v16  ;;  %4387 = vst.msk [vmem:[#allocation2 + $0x3e8] sm:$0xff] %vm460_vm5, %v4355_v31 }
 0x690   : > { %v4293_v15 = vpop.xlane.xlu0 %4292 }
 0x691   : > { %v4357_v11 = vmax.f32 %v4325_v12, %v4293_v15 }
 0x692   : > { %v4486_v38 = vld [vmem:[#allocation2 + $0x2e8] sm:$0xff] }
 0x693   : > { %4614 = vst.msk [vmem:[%s7494_s17 + $0x2e8] sm:$0xff] %vm460_vm5, %v4486_v38  ;;  %4389 = vst.msk [vmem:[#allocation2 + $0x3f8] sm:$0xff] %vm460_vm5, %v4357_v11 }
 0x696   : > { %v4518_v6 = vld [vmem:[#allocation2 + $0x3e8] sm:$0xff] }
 0x697   : > { %4646 = vst.msk [vmem:[%s7494_s17 + $0x3e8] sm:$0xff] %vm460_vm5, %v4518_v6 }
 0x69a   : > { %v4520_v48 = vld [vmem:[#allocation2 + $0x3f8] sm:$0xff] }
 0x69b   : > { %4648 = vst.msk [vmem:[%s7494_s17 + $0x3f8] sm:$0xff] %vm460_vm5, %v4520_v48 }
 0x69c PF: > { %s23_s23 = sadd.s32 1, %s5402_s23   ;;  %s8393_s21 = smov %s5398_s22 }
 0x69d   : > { %p20_p5 = scmp.ge.s32.totalorder %s23_s23, 4   ;;  %s8394_s22 = smov %s8396_s24 }
 0x69f   :  { %22 = sbr.rel (!%p20_p5) target bundleno = 2 (0x2), region = 114 }

</bundles_post_ra>
